<compile_context>
chip_gen: v5e
topology: v5e:2x2
jax: 0.10.0
libtpu: 0.0.40
codegen_flags: <defaults>
</compile_context>

<pallas_src>
import math

import jax
import jax.numpy as jnp
from jax import lax
from jax.experimental import pallas as pl
from jax.experimental.pallas import tpu as pltpu

d_Q = 64
d_V = 64
d_model = 256
n_head = 8
d_ff = 256
_LN_EPS = 1e-5
_MASK_FILL = -1000000000.0


def _layer_norm(y):
    # Identity affine (gamma=1, beta=0): LayerNorm built fresh in forward().
    mean = jnp.mean(y, axis=-1, keepdims=True)
    var = jnp.mean((y - mean) ** 2, axis=-1, keepdims=True)
    return (y - mean) * lax.rsqrt(var + _LN_EPS)


def _encoder_layer_kernel(x_ref, mask_ref, wqkv_ref, wfc_ref, w1_ref, w2_ref,
                          o_ref):
    # x_ref   : (BB, seq, d_model) float32
    # mask_ref: (BB, seq, seq) int8, nonzero == masked-out position
    # wqkv_ref: (d_model, 3*n_head*d_Q)   [W_Q | W_K | W_V] transposed weights
    # wfc_ref : (n_head*d_V, d_model)
    # w1_ref  : (d_model, d_ff), w2_ref: (d_ff, d_model)
    BB, seq, dm = x_ref.shape
    M2 = BB * seq
    hd = n_head * d_Q

    x3 = x_ref[...].astype(jnp.float32)
    x2 = x3.reshape(M2, dm)
    mask = mask_ref[...] != 0                                   # (BB, seq, seq)

    # Fused QKV projection on the merged (BB*seq, 256) slab (fills the MXU).
    qkv = jnp.dot(x2, wqkv_ref[...], preferred_element_type=jnp.float32)
    scale = 1.0 / math.sqrt(d_Q)
    q3 = (qkv[:, :hd] * scale).reshape(BB, seq, hd)             # fold scale once
    k3 = qkv[:, hd:2 * hd].reshape(BB, seq, hd)
    v3 = qkv[:, 2 * hd:].reshape(BB, seq, hd)

    # Per-head attention, accumulated straight into the output projection
    # (no lane-offset concatenate; single (BB*seq, 256) f32 accumulator).
    acc = jnp.zeros((M2, dm), dtype=jnp.float32)
    for h in range(n_head):                                     # static unroll
        qh = q3[:, :, h * d_Q:(h + 1) * d_Q]
        kh = k3[:, :, h * d_Q:(h + 1) * d_Q]
        vh = v3[:, :, h * d_V:(h + 1) * d_V]
        # Q @ K^T (batched over BB, contract last dims -> no explicit transpose)
        s = lax.dot_general(qh, kh, (((2,), (2,)), ((0,), (0,))),
                            preferred_element_type=jnp.float32)  # (BB, seq, seq)
        s = jnp.where(mask, _MASK_FILL, s)
        s = s - jnp.max(s, axis=-1, keepdims=True)
        p = jnp.exp(s)
        p = p * pl.reciprocal(jnp.sum(p, axis=-1, keepdims=True), approx=True)
        p = jnp.where(mask, 0.0, p)                              # masked_fill 0
        ctx_h = lax.dot_general(p, vh, (((2,), (1,)), ((0,), (0,))),
                                preferred_element_type=jnp.float32)  # (BB,seq,dV)
        acc = acc + jnp.dot(ctx_h.reshape(M2, d_V),
                            wfc_ref[h * d_V:(h + 1) * d_V, :],
                            preferred_element_type=jnp.float32)

    # Attention residual + LayerNorm.
    y = _layer_norm(acc + x2)                                    # (BB*seq, 256)

    # Position-wise FFN + residual + LayerNorm (fused; no HBM round trip).
    h1 = jnp.maximum(
        jnp.dot(y, w1_ref[...], preferred_element_type=jnp.float32), 0.0)
    out = _layer_norm(
        jnp.dot(h1, w2_ref[...], preferred_element_type=jnp.float32) + y)

    o_ref[...] = out.reshape(BB, seq, dm).astype(o_ref.dtype)


def _pick_block_batch(batch, cap=16):
    # Largest divisor of batch that is <= cap (keeps every block full).
    for bb in range(min(batch, cap), 0, -1):
        if batch % bb == 0:
            return bb
    return 1


def encoder_layer_forward(enc_embedding, enc_graph_attn_mask, params):
    """enc_embedding      : (batch, seq, d_model) float32
       enc_graph_attn_mask: (batch, seq, seq) bool, True == masked out
       params: transposed (in, out) PyTorch weights:
         wqkv_t: (d_model, 3*n_head*d_Q), wfc_t: (n_head*d_V, d_model),
         w1_t  : (d_model, d_ff),          w2_t : (d_ff, d_model)
    """
    batch, seq, dm = enc_embedding.shape
    assert dm == d_model
    mask_i8 = enc_graph_attn_mask.astype(jnp.int8)   # 4x smaller DMA than f32

    BB = _pick_block_batch(batch)
    grid = (batch // BB,)

    return pl.pallas_call(
        _encoder_layer_kernel,
        out_shape=jax.ShapeDtypeStruct((batch, seq, dm), enc_embedding.dtype),
        grid=grid,
        in_specs=[
            pl.BlockSpec((BB, seq, dm), lambda b: (b, 0, 0)),
            pl.BlockSpec((BB, seq, seq), lambda b: (b, 0, 0)),
            pl.BlockSpec((dm, 3 * n_head * d_Q), lambda b: (0, 0)),  # resident
            pl.BlockSpec((n_head * d_V, dm), lambda b: (0, 0)),      # resident
            pl.BlockSpec((dm, d_ff), lambda b: (0, 0)),              # resident
            pl.BlockSpec((d_ff, dm), lambda b: (0, 0)),              # resident
        ],
        out_specs=pl.BlockSpec((BB, seq, dm), lambda b: (b, 0, 0)),
        compiler_params=pltpu.CompilerParams(
            dimension_semantics=("parallel",),
            vmem_limit_bytes=32 * 1024 * 1024),
    )(enc_embedding, mask_i8, params["wqkv_t"], params["wfc_t"],
      params["w1_t"], params["w2_t"])


# --- pure-JAX reference (mirrors the PyTorch forward) ------------------------
def encoder_layer_ref(x, attn_mask, params):
    hd = n_head * d_Q
    wq_t = params["wqkv_t"][:, :hd]
    wk_t = params["wqkv_t"][:, hd:2 * hd]
    wv_t = params["wqkv_t"][:, 2 * hd:]
    B, S, _ = x.shape
    q = (x @ wq_t).reshape(B, S, n_head, d_Q).transpose(0, 2, 1, 3)
    k = (x @ wk_t).reshape(B, S, n_head, d_Q).transpose(0, 2, 1, 3)
    v = (x @ wv_t).reshape(B, S, n_head, d_V).transpose(0, 2, 1, 3)
    mask = attn_mask[:, None, :, :]
    score = jnp.einsum("bhqd,bhkd->bhqk", q, k) / math.sqrt(d_Q)
    score = jnp.where(mask, _MASK_FILL, score)
    attn = jax.nn.softmax(score, axis=-1)
    attn = jnp.where(mask, 0.0, attn)
    ctx = jnp.einsum("bhqk,bhkd->bhqd", attn, v)
    ctx = ctx.transpose(0, 2, 1, 3).reshape(B, S, n_head * d_V)
    y = _layer_norm(ctx @ params["wfc_t"] + x)
    h = jnp.maximum(y @ params["w1_t"], 0.0)
    return _layer_norm(h @ params["w2_t"] + y)


if __name__ == "__main__":
    key = jax.random.PRNGKey(0)
    k_x, k_m, k_q, k_k, k_v, k_fc, k_1, k_2 = jax.random.split(key, 8)

    batch, seq = 2, 8
    x = jax.random.normal(k_x, (batch, seq, d_model), dtype=jnp.float32)
    # True == masked-out position (as consumed by masked_fill_).
    attn_mask = jax.random.bernoulli(k_m, 0.25, (batch, seq, seq))

    def init_linear_t(k, fan_in, fan_out):
        # Transposed PyTorch nn.Linear weight, laid out (in, out); bias=False.
        bound = 1.0 / math.sqrt(fan_in)
        return jax.random.uniform(k, (fan_in, fan_out), jnp.float32,
                                  -bound, bound)

    wq_t = init_linear_t(k_q, d_model, n_head * d_Q)
    wk_t = init_linear_t(k_k, d_model, n_head * d_Q)
    wv_t = init_linear_t(k_v, d_model, n_head * d_V)
    params = {
        "wqkv_t": jnp.concatenate([wq_t, wk_t, wv_t], axis=1),
        "wfc_t": init_linear_t(k_fc, n_head * d_V, d_model),
        "w1_t": init_linear_t(k_1, d_model, d_ff),
        "w2_t": init_linear_t(k_2, d_ff, d_model),
    }

    out = encoder_layer_forward(x, attn_mask, params)
    out = jax.block_until_ready(out)
    assert out.shape == (batch, seq, d_model)

    with jax.default_matmul_precision("highest"):
        ref = encoder_layer_ref(x, attn_mask, params)
    max_err = float(jnp.max(jnp.abs(out - ref)))
    assert jnp.allclose(out, ref, atol=2e-3, rtol=2e-3), max_err

    print("KERNEL_OK")
</pallas_src>

<mosaic_0001>
module attributes {stable_mosaic.version = 11 : i64} {
  func.func @_encoder_layer_kernel(%arg0: i32, %arg1: memref<2x8x256xf32, #tpu.memory_space<vmem>>, %arg2: memref<2x8x8xi8, #tpu.memory_space<vmem>>, %arg3: memref<256x1536xf32, #tpu.memory_space<vmem>>, %arg4: memref<512x256xf32, #tpu.memory_space<vmem>>, %arg5: memref<256x256xf32, #tpu.memory_space<vmem>>, %arg6: memref<256x256xf32, #tpu.memory_space<vmem>>, %arg7: memref<2x8x256xf32, #tpu.memory_space<vmem>>) attributes {dimension_semantics = [#tpu.dimension_semantics<parallel>], iteration_bounds = array<i64: 1>, scalar_prefetch = 0 : i64, scratch_operands = 0 : i64, tpu.core_type = #tpu.core_type<tc>, window_params = [{transform_indices = @transform_0, window_bounds = array<i64: 2, 8, 256>}, {transform_indices = @transform_1, window_bounds = array<i64: 2, 8, 8>}, {pipeline_mode = #tpu.pipeline_mode<synchronous>, transform_indices = @transform_2, window_bounds = array<i64: 256, 1536>}, {pipeline_mode = #tpu.pipeline_mode<synchronous>, transform_indices = @transform_3, window_bounds = array<i64: 512, 256>}, {pipeline_mode = #tpu.pipeline_mode<synchronous>, transform_indices = @transform_4, window_bounds = array<i64: 256, 256>}, {pipeline_mode = #tpu.pipeline_mode<synchronous>, transform_indices = @transform_5, window_bounds = array<i64: 256, 256>}, {transform_indices = @transform_6, window_bounds = array<i64: 2, 8, 256>}]} {
    %c0 = arith.constant 0 : index
    %c0_0 = arith.constant 0 : index
    %c0_1 = arith.constant 0 : index
    %0 = vector.load %arg1[%c0, %c0_0, %c0_1] : memref<2x8x256xf32, #tpu.memory_space<vmem>>, vector<2x8x256xf32>
    %1 = vector.shape_cast %0 : vector<2x8x256xf32> to vector<16x256xf32>
    %c0_2 = arith.constant 0 : index
    %c0_3 = arith.constant 0 : index
    %c0_4 = arith.constant 0 : index
    %2 = vector.load %arg2[%c0_2, %c0_3, %c0_4] : memref<2x8x8xi8, #tpu.memory_space<vmem>>, vector<2x8x8xi8>
    %c0_i8 = arith.constant 0 : i8
    %3 = vector.broadcast %c0_i8 : i8 to vector<2x8x8xi8>
    %4 = arith.cmpi ne, %2, %3 : vector<2x8x8xi8>
    %c0_5 = arith.constant 0 : index
    %c0_6 = arith.constant 0 : index
    %5 = vector.load %arg3[%c0_5, %c0_6] : memref<256x1536xf32, #tpu.memory_space<vmem>>, vector<256x1536xf32>
    %cst = arith.constant dense<0.000000e+00> : vector<16x1536xf32>
    %6 = tpu.matmul %1, %5, %cst {dimension_numbers = #tpu.dot_dimension_numbers<[1], [0], [0], [1], [0, 0, 1, 1], [], []>} : vector<16x256xf32>, vector<256x1536xf32>, vector<16x1536xf32> -> vector<16x1536xf32>
    %7 = vector.extract_strided_slice %6 {offsets = [0, 0], sizes = [16, 512], strides = [1, 1]} : vector<16x1536xf32> to vector<16x512xf32>
    %cst_7 = arith.constant 1.250000e-01 : f32
    %8 = vector.broadcast %cst_7 : f32 to vector<16x512xf32>
    %9 = arith.mulf %7, %8 : vector<16x512xf32>
    %10 = vector.shape_cast %9 : vector<16x512xf32> to vector<2x8x512xf32>
    %11 = vector.extract_strided_slice %6 {offsets = [0, 512], sizes = [16, 512], strides = [1, 1]} : vector<16x1536xf32> to vector<16x512xf32>
    %12 = vector.shape_cast %11 : vector<16x512xf32> to vector<2x8x512xf32>
    %13 = vector.extract_strided_slice %6 {offsets = [0, 1024], sizes = [16, 512], strides = [1, 1]} : vector<16x1536xf32> to vector<16x512xf32>
    %14 = vector.shape_cast %13 : vector<16x512xf32> to vector<2x8x512xf32>
    %cst_8 = arith.constant 0.000000e+00 : f32
    %15 = vector.broadcast %cst_8 : f32 to vector<16x256xf32>
    %16 = vector.extract_strided_slice %10 {offsets = [0, 0, 0], sizes = [2, 8, 64], strides = [1, 1, 1]} : vector<2x8x512xf32> to vector<2x8x64xf32>
    %17 = vector.extract_strided_slice %12 {offsets = [0, 0, 0], sizes = [2, 8, 64], strides = [1, 1, 1]} : vector<2x8x512xf32> to vector<2x8x64xf32>
    %18 = vector.extract_strided_slice %14 {offsets = [0, 0, 0], sizes = [2, 8, 64], strides = [1, 1, 1]} : vector<2x8x512xf32> to vector<2x8x64xf32>
    %cst_9 = arith.constant dense<0.000000e+00> : vector<2x8x8xf32>
    %19 = tpu.matmul %16, %17, %cst_9 {dimension_numbers = #tpu.dot_dimension_numbers<[2], [2], [1], [1], [0, 0, 0, 1, 1, 1], [0], [0]>} : vector<2x8x64xf32>, vector<2x8x64xf32>, vector<2x8x8xf32> -> vector<2x8x8xf32>
    %cst_10 = arith.constant -1.000000e+09 : f32
    %20 = vector.broadcast %cst_10 : f32 to vector<2x8x8xf32>
    %21 = arith.select %4, %20, %19 : vector<2x8x8xi1>, vector<2x8x8xf32>
    %cst_11 = arith.constant dense<0xFF800000> : vector<2x8xf32>
    %22 = vector.multi_reduction <maximumf>, %21, %cst_11 [2] : vector<2x8x8xf32> to vector<2x8xf32>
    %23 = vector.shape_cast %22 : vector<2x8xf32> to vector<2x8x1xf32>
    %24 = vector.broadcast %23 : vector<2x8x1xf32> to vector<2x8x8xf32>
    %25 = arith.subf %21, %24 : vector<2x8x8xf32>
    %26 = math.exp %25 : vector<2x8x8xf32>
    %cst_12 = arith.constant dense<0.000000e+00> : vector<2x8xf32>
    %27 = vector.multi_reduction <add>, %26, %cst_12 [2] : vector<2x8x8xf32> to vector<2x8xf32>
    %28 = vector.shape_cast %27 : vector<2x8xf32> to vector<2x8x1xf32>
    %29 = tpu.reciprocal %28 {approx = true} : vector<2x8x1xf32> -> vector<2x8x1xf32>
    %30 = vector.broadcast %29 : vector<2x8x1xf32> to vector<2x8x8xf32>
    %31 = arith.mulf %26, %30 : vector<2x8x8xf32>
    %cst_13 = arith.constant 0.000000e+00 : f32
    %32 = vector.broadcast %cst_13 : f32 to vector<2x8x8xf32>
    %33 = arith.select %4, %32, %31 : vector<2x8x8xi1>, vector<2x8x8xf32>
    %cst_14 = arith.constant dense<0.000000e+00> : vector<2x8x64xf32>
    %34 = tpu.matmul %33, %18, %cst_14 {dimension_numbers = #tpu.dot_dimension_numbers<[2], [1], [1], [2], [0, 0, 0, 1, 1, 2], [0], [0]>} : vector<2x8x8xf32>, vector<2x8x64xf32>, vector<2x8x64xf32> -> vector<2x8x64xf32>
    %35 = vector.shape_cast %34 : vector<2x8x64xf32> to vector<16x64xf32>
    %c0_15 = arith.constant 0 : index
    %c0_16 = arith.constant 0 : index
    %36 = vector.load %arg4[%c0_15, %c0_16] : memref<512x256xf32, #tpu.memory_space<vmem>>, vector<64x256xf32>
    %cst_17 = arith.constant dense<0.000000e+00> : vector<16x256xf32>
    %37 = tpu.matmul %35, %36, %cst_17 {dimension_numbers = #tpu.dot_dimension_numbers<[1], [0], [0], [1], [0, 0, 1, 1], [], []>} : vector<16x64xf32>, vector<64x256xf32>, vector<16x256xf32> -> vector<16x256xf32>
    %38 = arith.addf %15, %37 : vector<16x256xf32>
    %39 = vector.extract_strided_slice %10 {offsets = [0, 0, 64], sizes = [2, 8, 64], strides = [1, 1, 1]} : vector<2x8x512xf32> to vector<2x8x64xf32>
    %40 = vector.extract_strided_slice %12 {offsets = [0, 0, 64], sizes = [2, 8, 64], strides = [1, 1, 1]} : vector<2x8x512xf32> to vector<2x8x64xf32>
    %41 = vector.extract_strided_slice %14 {offsets = [0, 0, 64], sizes = [2, 8, 64], strides = [1, 1, 1]} : vector<2x8x512xf32> to vector<2x8x64xf32>
    %cst_18 = arith.constant dense<0.000000e+00> : vector<2x8x8xf32>
    %42 = tpu.matmul %39, %40, %cst_18 {dimension_numbers = #tpu.dot_dimension_numbers<[2], [2], [1], [1], [0, 0, 0, 1, 1, 1], [0], [0]>} : vector<2x8x64xf32>, vector<2x8x64xf32>, vector<2x8x8xf32> -> vector<2x8x8xf32>
    %cst_19 = arith.constant -1.000000e+09 : f32
    %43 = vector.broadcast %cst_19 : f32 to vector<2x8x8xf32>
    %44 = arith.select %4, %43, %42 : vector<2x8x8xi1>, vector<2x8x8xf32>
    %cst_20 = arith.constant dense<0xFF800000> : vector<2x8xf32>
    %45 = vector.multi_reduction <maximumf>, %44, %cst_20 [2] : vector<2x8x8xf32> to vector<2x8xf32>
    %46 = vector.shape_cast %45 : vector<2x8xf32> to vector<2x8x1xf32>
    %47 = vector.broadcast %46 : vector<2x8x1xf32> to vector<2x8x8xf32>
    %48 = arith.subf %44, %47 : vector<2x8x8xf32>
    %49 = math.exp %48 : vector<2x8x8xf32>
    %cst_21 = arith.constant dense<0.000000e+00> : vector<2x8xf32>
    %50 = vector.multi_reduction <add>, %49, %cst_21 [2] : vector<2x8x8xf32> to vector<2x8xf32>
    %51 = vector.shape_cast %50 : vector<2x8xf32> to vector<2x8x1xf32>
    %52 = tpu.reciprocal %51 {approx = true} : vector<2x8x1xf32> -> vector<2x8x1xf32>
    %53 = vector.broadcast %52 : vector<2x8x1xf32> to vector<2x8x8xf32>
    %54 = arith.mulf %49, %53 : vector<2x8x8xf32>
    %cst_22 = arith.constant 0.000000e+00 : f32
    %55 = vector.broadcast %cst_22 : f32 to vector<2x8x8xf32>
    %56 = arith.select %4, %55, %54 : vector<2x8x8xi1>, vector<2x8x8xf32>
    %cst_23 = arith.constant dense<0.000000e+00> : vector<2x8x64xf32>
    %57 = tpu.matmul %56, %41, %cst_23 {dimension_numbers = #tpu.dot_dimension_numbers<[2], [1], [1], [2], [0, 0, 0, 1, 1, 2], [0], [0]>} : vector<2x8x8xf32>, vector<2x8x64xf32>, vector<2x8x64xf32> -> vector<2x8x64xf32>
    %58 = vector.shape_cast %57 : vector<2x8x64xf32> to vector<16x64xf32>
    %c64 = arith.constant 64 : index
    %c0_24 = arith.constant 0 : index
    %59 = vector.load %arg4[%c64, %c0_24] : memref<512x256xf32, #tpu.memory_space<vmem>>, vector<64x256xf32>
    %cst_25 = arith.constant dense<0.000000e+00> : vector<16x256xf32>
    %60 = tpu.matmul %58, %59, %cst_25 {dimension_numbers = #tpu.dot_dimension_numbers<[1], [0], [0], [1], [0, 0, 1, 1], [], []>} : vector<16x64xf32>, vector<64x256xf32>, vector<16x256xf32> -> vector<16x256xf32>
    %61 = arith.addf %38, %60 : vector<16x256xf32>
    %62 = vector.extract_strided_slice %10 {offsets = [0, 0, 128], sizes = [2, 8, 64], strides = [1, 1, 1]} : vector<2x8x512xf32> to vector<2x8x64xf32>
    %63 = vector.extract_strided_slice %12 {offsets = [0, 0, 128], sizes = [2, 8, 64], strides = [1, 1, 1]} : vector<2x8x512xf32> to vector<2x8x64xf32>
    %64 = vector.extract_strided_slice %14 {offsets = [0, 0, 128], sizes = [2, 8, 64], strides = [1, 1, 1]} : vector<2x8x512xf32> to vector<2x8x64xf32>
    %cst_26 = arith.constant dense<0.000000e+00> : vector<2x8x8xf32>
    %65 = tpu.matmul %62, %63, %cst_26 {dimension_numbers = #tpu.dot_dimension_numbers<[2], [2], [1], [1], [0, 0, 0, 1, 1, 1], [0], [0]>} : vector<2x8x64xf32>, vector<2x8x64xf32>, vector<2x8x8xf32> -> vector<2x8x8xf32>
    %cst_27 = arith.constant -1.000000e+09 : f32
    %66 = vector.broadcast %cst_27 : f32 to vector<2x8x8xf32>
    %67 = arith.select %4, %66, %65 : vector<2x8x8xi1>, vector<2x8x8xf32>
    %cst_28 = arith.constant dense<0xFF800000> : vector<2x8xf32>
    %68 = vector.multi_reduction <maximumf>, %67, %cst_28 [2] : vector<2x8x8xf32> to vector<2x8xf32>
    %69 = vector.shape_cast %68 : vector<2x8xf32> to vector<2x8x1xf32>
    %70 = vector.broadcast %69 : vector<2x8x1xf32> to vector<2x8x8xf32>
    %71 = arith.subf %67, %70 : vector<2x8x8xf32>
    %72 = math.exp %71 : vector<2x8x8xf32>
    %cst_29 = arith.constant dense<0.000000e+00> : vector<2x8xf32>
    %73 = vector.multi_reduction <add>, %72, %cst_29 [2] : vector<2x8x8xf32> to vector<2x8xf32>
    %74 = vector.shape_cast %73 : vector<2x8xf32> to vector<2x8x1xf32>
    %75 = tpu.reciprocal %74 {approx = true} : vector<2x8x1xf32> -> vector<2x8x1xf32>
    %76 = vector.broadcast %75 : vector<2x8x1xf32> to vector<2x8x8xf32>
    %77 = arith.mulf %72, %76 : vector<2x8x8xf32>
    %cst_30 = arith.constant 0.000000e+00 : f32
    %78 = vector.broadcast %cst_30 : f32 to vector<2x8x8xf32>
    %79 = arith.select %4, %78, %77 : vector<2x8x8xi1>, vector<2x8x8xf32>
    %cst_31 = arith.constant dense<0.000000e+00> : vector<2x8x64xf32>
    %80 = tpu.matmul %79, %64, %cst_31 {dimension_numbers = #tpu.dot_dimension_numbers<[2], [1], [1], [2], [0, 0, 0, 1, 1, 2], [0], [0]>} : vector<2x8x8xf32>, vector<2x8x64xf32>, vector<2x8x64xf32> -> vector<2x8x64xf32>
    %81 = vector.shape_cast %80 : vector<2x8x64xf32> to vector<16x64xf32>
    %c128 = arith.constant 128 : index
    %c0_32 = arith.constant 0 : index
    %82 = vector.load %arg4[%c128, %c0_32] : memref<512x256xf32, #tpu.memory_space<vmem>>, vector<64x256xf32>
    %cst_33 = arith.constant dense<0.000000e+00> : vector<16x256xf32>
    %83 = tpu.matmul %81, %82, %cst_33 {dimension_numbers = #tpu.dot_dimension_numbers<[1], [0], [0], [1], [0, 0, 1, 1], [], []>} : vector<16x64xf32>, vector<64x256xf32>, vector<16x256xf32> -> vector<16x256xf32>
    %84 = arith.addf %61, %83 : vector<16x256xf32>
    %85 = vector.extract_strided_slice %10 {offsets = [0, 0, 192], sizes = [2, 8, 64], strides = [1, 1, 1]} : vector<2x8x512xf32> to vector<2x8x64xf32>
    %86 = vector.extract_strided_slice %12 {offsets = [0, 0, 192], sizes = [2, 8, 64], strides = [1, 1, 1]} : vector<2x8x512xf32> to vector<2x8x64xf32>
    %87 = vector.extract_strided_slice %14 {offsets = [0, 0, 192], sizes = [2, 8, 64], strides = [1, 1, 1]} : vector<2x8x512xf32> to vector<2x8x64xf32>
    %cst_34 = arith.constant dense<0.000000e+00> : vector<2x8x8xf32>
    %88 = tpu.matmul %85, %86, %cst_34 {dimension_numbers = #tpu.dot_dimension_numbers<[2], [2], [1], [1], [0, 0, 0, 1, 1, 1], [0], [0]>} : vector<2x8x64xf32>, vector<2x8x64xf32>, vector<2x8x8xf32> -> vector<2x8x8xf32>
    %cst_35 = arith.constant -1.000000e+09 : f32
    %89 = vector.broadcast %cst_35 : f32 to vector<2x8x8xf32>
    %90 = arith.select %4, %89, %88 : vector<2x8x8xi1>, vector<2x8x8xf32>
    %cst_36 = arith.constant dense<0xFF800000> : vector<2x8xf32>
    %91 = vector.multi_reduction <maximumf>, %90, %cst_36 [2] : vector<2x8x8xf32> to vector<2x8xf32>
    %92 = vector.shape_cast %91 : vector<2x8xf32> to vector<2x8x1xf32>
    %93 = vector.broadcast %92 : vector<2x8x1xf32> to vector<2x8x8xf32>
    %94 = arith.subf %90, %93 : vector<2x8x8xf32>
    %95 = math.exp %94 : vector<2x8x8xf32>
    %cst_37 = arith.constant dense<0.000000e+00> : vector<2x8xf32>
    %96 = vector.multi_reduction <add>, %95, %cst_37 [2] : vector<2x8x8xf32> to vector<2x8xf32>
    %97 = vector.shape_cast %96 : vector<2x8xf32> to vector<2x8x1xf32>
    %98 = tpu.reciprocal %97 {approx = true} : vector<2x8x1xf32> -> vector<2x8x1xf32>
    %99 = vector.broadcast %98 : vector<2x8x1xf32> to vector<2x8x8xf32>
    %100 = arith.mulf %95, %99 : vector<2x8x8xf32>
    %cst_38 = arith.constant 0.000000e+00 : f32
    %101 = vector.broadcast %cst_38 : f32 to vector<2x8x8xf32>
    %102 = arith.select %4, %101, %100 : vector<2x8x8xi1>, vector<2x8x8xf32>
    %cst_39 = arith.constant dense<0.000000e+00> : vector<2x8x64xf32>
    %103 = tpu.matmul %102, %87, %cst_39 {dimension_numbers = #tpu.dot_dimension_numbers<[2], [1], [1], [2], [0, 0, 0, 1, 1, 2], [0], [0]>} : vector<2x8x8xf32>, vector<2x8x64xf32>, vector<2x8x64xf32> -> vector<2x8x64xf32>
    %104 = vector.shape_cast %103 : vector<2x8x64xf32> to vector<16x64xf32>
    %c192 = arith.constant 192 : index
    %c0_40 = arith.constant 0 : index
    %105 = vector.load %arg4[%c192, %c0_40] : memref<512x256xf32, #tpu.memory_space<vmem>>, vector<64x256xf32>
    %cst_41 = arith.constant dense<0.000000e+00> : vector<16x256xf32>
    %106 = tpu.matmul %104, %105, %cst_41 {dimension_numbers = #tpu.dot_dimension_numbers<[1], [0], [0], [1], [0, 0, 1, 1], [], []>} : vector<16x64xf32>, vector<64x256xf32>, vector<16x256xf32> -> vector<16x256xf32>
    %107 = arith.addf %84, %106 : vector<16x256xf32>
    %108 = vector.extract_strided_slice %10 {offsets = [0, 0, 256], sizes = [2, 8, 64], strides = [1, 1, 1]} : vector<2x8x512xf32> to vector<2x8x64xf32>
    %109 = vector.extract_strided_slice %12 {offsets = [0, 0, 256], sizes = [2, 8, 64], strides = [1, 1, 1]} : vector<2x8x512xf32> to vector<2x8x64xf32>
    %110 = vector.extract_strided_slice %14 {offsets = [0, 0, 256], sizes = [2, 8, 64], strides = [1, 1, 1]} : vector<2x8x512xf32> to vector<2x8x64xf32>
    %cst_42 = arith.constant dense<0.000000e+00> : vector<2x8x8xf32>
    %111 = tpu.matmul %108, %109, %cst_42 {dimension_numbers = #tpu.dot_dimension_numbers<[2], [2], [1], [1], [0, 0, 0, 1, 1, 1], [0], [0]>} : vector<2x8x64xf32>, vector<2x8x64xf32>, vector<2x8x8xf32> -> vector<2x8x8xf32>
    %cst_43 = arith.constant -1.000000e+09 : f32
    %112 = vector.broadcast %cst_43 : f32 to vector<2x8x8xf32>
    %113 = arith.select %4, %112, %111 : vector<2x8x8xi1>, vector<2x8x8xf32>
    %cst_44 = arith.constant dense<0xFF800000> : vector<2x8xf32>
    %114 = vector.multi_reduction <maximumf>, %113, %cst_44 [2] : vector<2x8x8xf32> to vector<2x8xf32>
    %115 = vector.shape_cast %114 : vector<2x8xf32> to vector<2x8x1xf32>
    %116 = vector.broadcast %115 : vector<2x8x1xf32> to vector<2x8x8xf32>
    %117 = arith.subf %113, %116 : vector<2x8x8xf32>
    %118 = math.exp %117 : vector<2x8x8xf32>
    %cst_45 = arith.constant dense<0.000000e+00> : vector<2x8xf32>
    %119 = vector.multi_reduction <add>, %118, %cst_45 [2] : vector<2x8x8xf32> to vector<2x8xf32>
    %120 = vector.shape_cast %119 : vector<2x8xf32> to vector<2x8x1xf32>
    %121 = tpu.reciprocal %120 {approx = true} : vector<2x8x1xf32> -> vector<2x8x1xf32>
    %122 = vector.broadcast %121 : vector<2x8x1xf32> to vector<2x8x8xf32>
    %123 = arith.mulf %118, %122 : vector<2x8x8xf32>
    %cst_46 = arith.constant 0.000000e+00 : f32
    %124 = vector.broadcast %cst_46 : f32 to vector<2x8x8xf32>
    %125 = arith.select %4, %124, %123 : vector<2x8x8xi1>, vector<2x8x8xf32>
    %cst_47 = arith.constant dense<0.000000e+00> : vector<2x8x64xf32>
    %126 = tpu.matmul %125, %110, %cst_47 {dimension_numbers = #tpu.dot_dimension_numbers<[2], [1], [1], [2], [0, 0, 0, 1, 1, 2], [0], [0]>} : vector<2x8x8xf32>, vector<2x8x64xf32>, vector<2x8x64xf32> -> vector<2x8x64xf32>
    %127 = vector.shape_cast %126 : vector<2x8x64xf32> to vector<16x64xf32>
    %c256 = arith.constant 256 : index
    %c0_48 = arith.constant 0 : index
    %128 = vector.load %arg4[%c256, %c0_48] : memref<512x256xf32, #tpu.memory_space<vmem>>, vector<64x256xf32>
    %cst_49 = arith.constant dense<0.000000e+00> : vector<16x256xf32>
    %129 = tpu.matmul %127, %128, %cst_49 {dimension_numbers = #tpu.dot_dimension_numbers<[1], [0], [0], [1], [0, 0, 1, 1], [], []>} : vector<16x64xf32>, vector<64x256xf32>, vector<16x256xf32> -> vector<16x256xf32>
    %130 = arith.addf %107, %129 : vector<16x256xf32>
    %131 = vector.extract_strided_slice %10 {offsets = [0, 0, 320], sizes = [2, 8, 64], strides = [1, 1, 1]} : vector<2x8x512xf32> to vector<2x8x64xf32>
    %132 = vector.extract_strided_slice %12 {offsets = [0, 0, 320], sizes = [2, 8, 64], strides = [1, 1, 1]} : vector<2x8x512xf32> to vector<2x8x64xf32>
    %133 = vector.extract_strided_slice %14 {offsets = [0, 0, 320], sizes = [2, 8, 64], strides = [1, 1, 1]} : vector<2x8x512xf32> to vector<2x8x64xf32>
    %cst_50 = arith.constant dense<0.000000e+00> : vector<2x8x8xf32>
    %134 = tpu.matmul %131, %132, %cst_50 {dimension_numbers = #tpu.dot_dimension_numbers<[2], [2], [1], [1], [0, 0, 0, 1, 1, 1], [0], [0]>} : vector<2x8x64xf32>, vector<2x8x64xf32>, vector<2x8x8xf32> -> vector<2x8x8xf32>
    %cst_51 = arith.constant -1.000000e+09 : f32
    %135 = vector.broadcast %cst_51 : f32 to vector<2x8x8xf32>
    %136 = arith.select %4, %135, %134 : vector<2x8x8xi1>, vector<2x8x8xf32>
    %cst_52 = arith.constant dense<0xFF800000> : vector<2x8xf32>
    %137 = vector.multi_reduction <maximumf>, %136, %cst_52 [2] : vector<2x8x8xf32> to vector<2x8xf32>
    %138 = vector.shape_cast %137 : vector<2x8xf32> to vector<2x8x1xf32>
    %139 = vector.broadcast %138 : vector<2x8x1xf32> to vector<2x8x8xf32>
    %140 = arith.subf %136, %139 : vector<2x8x8xf32>
    %141 = math.exp %140 : vector<2x8x8xf32>
    %cst_53 = arith.constant dense<0.000000e+00> : vector<2x8xf32>
    %142 = vector.multi_reduction <add>, %141, %cst_53 [2] : vector<2x8x8xf32> to vector<2x8xf32>
    %143 = vector.shape_cast %142 : vector<2x8xf32> to vector<2x8x1xf32>
    %144 = tpu.reciprocal %143 {approx = true} : vector<2x8x1xf32> -> vector<2x8x1xf32>
    %145 = vector.broadcast %144 : vector<2x8x1xf32> to vector<2x8x8xf32>
    %146 = arith.mulf %141, %145 : vector<2x8x8xf32>
    %cst_54 = arith.constant 0.000000e+00 : f32
    %147 = vector.broadcast %cst_54 : f32 to vector<2x8x8xf32>
    %148 = arith.select %4, %147, %146 : vector<2x8x8xi1>, vector<2x8x8xf32>
    %cst_55 = arith.constant dense<0.000000e+00> : vector<2x8x64xf32>
    %149 = tpu.matmul %148, %133, %cst_55 {dimension_numbers = #tpu.dot_dimension_numbers<[2], [1], [1], [2], [0, 0, 0, 1, 1, 2], [0], [0]>} : vector<2x8x8xf32>, vector<2x8x64xf32>, vector<2x8x64xf32> -> vector<2x8x64xf32>
    %150 = vector.shape_cast %149 : vector<2x8x64xf32> to vector<16x64xf32>
    %c320 = arith.constant 320 : index
    %c0_56 = arith.constant 0 : index
    %151 = vector.load %arg4[%c320, %c0_56] : memref<512x256xf32, #tpu.memory_space<vmem>>, vector<64x256xf32>
    %cst_57 = arith.constant dense<0.000000e+00> : vector<16x256xf32>
    %152 = tpu.matmul %150, %151, %cst_57 {dimension_numbers = #tpu.dot_dimension_numbers<[1], [0], [0], [1], [0, 0, 1, 1], [], []>} : vector<16x64xf32>, vector<64x256xf32>, vector<16x256xf32> -> vector<16x256xf32>
    %153 = arith.addf %130, %152 : vector<16x256xf32>
    %154 = vector.extract_strided_slice %10 {offsets = [0, 0, 384], sizes = [2, 8, 64], strides = [1, 1, 1]} : vector<2x8x512xf32> to vector<2x8x64xf32>
    %155 = vector.extract_strided_slice %12 {offsets = [0, 0, 384], sizes = [2, 8, 64], strides = [1, 1, 1]} : vector<2x8x512xf32> to vector<2x8x64xf32>
    %156 = vector.extract_strided_slice %14 {offsets = [0, 0, 384], sizes = [2, 8, 64], strides = [1, 1, 1]} : vector<2x8x512xf32> to vector<2x8x64xf32>
    %cst_58 = arith.constant dense<0.000000e+00> : vector<2x8x8xf32>
    %157 = tpu.matmul %154, %155, %cst_58 {dimension_numbers = #tpu.dot_dimension_numbers<[2], [2], [1], [1], [0, 0, 0, 1, 1, 1], [0], [0]>} : vector<2x8x64xf32>, vector<2x8x64xf32>, vector<2x8x8xf32> -> vector<2x8x8xf32>
    %cst_59 = arith.constant -1.000000e+09 : f32
    %158 = vector.broadcast %cst_59 : f32 to vector<2x8x8xf32>
    %159 = arith.select %4, %158, %157 : vector<2x8x8xi1>, vector<2x8x8xf32>
    %cst_60 = arith.constant dense<0xFF800000> : vector<2x8xf32>
    %160 = vector.multi_reduction <maximumf>, %159, %cst_60 [2] : vector<2x8x8xf32> to vector<2x8xf32>
    %161 = vector.shape_cast %160 : vector<2x8xf32> to vector<2x8x1xf32>
    %162 = vector.broadcast %161 : vector<2x8x1xf32> to vector<2x8x8xf32>
    %163 = arith.subf %159, %162 : vector<2x8x8xf32>
    %164 = math.exp %163 : vector<2x8x8xf32>
    %cst_61 = arith.constant dense<0.000000e+00> : vector<2x8xf32>
    %165 = vector.multi_reduction <add>, %164, %cst_61 [2] : vector<2x8x8xf32> to vector<2x8xf32>
    %166 = vector.shape_cast %165 : vector<2x8xf32> to vector<2x8x1xf32>
    %167 = tpu.reciprocal %166 {approx = true} : vector<2x8x1xf32> -> vector<2x8x1xf32>
    %168 = vector.broadcast %167 : vector<2x8x1xf32> to vector<2x8x8xf32>
    %169 = arith.mulf %164, %168 : vector<2x8x8xf32>
    %cst_62 = arith.constant 0.000000e+00 : f32
    %170 = vector.broadcast %cst_62 : f32 to vector<2x8x8xf32>
    %171 = arith.select %4, %170, %169 : vector<2x8x8xi1>, vector<2x8x8xf32>
    %cst_63 = arith.constant dense<0.000000e+00> : vector<2x8x64xf32>
    %172 = tpu.matmul %171, %156, %cst_63 {dimension_numbers = #tpu.dot_dimension_numbers<[2], [1], [1], [2], [0, 0, 0, 1, 1, 2], [0], [0]>} : vector<2x8x8xf32>, vector<2x8x64xf32>, vector<2x8x64xf32> -> vector<2x8x64xf32>
    %173 = vector.shape_cast %172 : vector<2x8x64xf32> to vector<16x64xf32>
    %c384 = arith.constant 384 : index
    %c0_64 = arith.constant 0 : index
    %174 = vector.load %arg4[%c384, %c0_64] : memref<512x256xf32, #tpu.memory_space<vmem>>, vector<64x256xf32>
    %cst_65 = arith.constant dense<0.000000e+00> : vector<16x256xf32>
    %175 = tpu.matmul %173, %174, %cst_65 {dimension_numbers = #tpu.dot_dimension_numbers<[1], [0], [0], [1], [0, 0, 1, 1], [], []>} : vector<16x64xf32>, vector<64x256xf32>, vector<16x256xf32> -> vector<16x256xf32>
    %176 = arith.addf %153, %175 : vector<16x256xf32>
    %177 = vector.extract_strided_slice %10 {offsets = [0, 0, 448], sizes = [2, 8, 64], strides = [1, 1, 1]} : vector<2x8x512xf32> to vector<2x8x64xf32>
    %178 = vector.extract_strided_slice %12 {offsets = [0, 0, 448], sizes = [2, 8, 64], strides = [1, 1, 1]} : vector<2x8x512xf32> to vector<2x8x64xf32>
    %179 = vector.extract_strided_slice %14 {offsets = [0, 0, 448], sizes = [2, 8, 64], strides = [1, 1, 1]} : vector<2x8x512xf32> to vector<2x8x64xf32>
    %cst_66 = arith.constant dense<0.000000e+00> : vector<2x8x8xf32>
    %180 = tpu.matmul %177, %178, %cst_66 {dimension_numbers = #tpu.dot_dimension_numbers<[2], [2], [1], [1], [0, 0, 0, 1, 1, 1], [0], [0]>} : vector<2x8x64xf32>, vector<2x8x64xf32>, vector<2x8x8xf32> -> vector<2x8x8xf32>
    %cst_67 = arith.constant -1.000000e+09 : f32
    %181 = vector.broadcast %cst_67 : f32 to vector<2x8x8xf32>
    %182 = arith.select %4, %181, %180 : vector<2x8x8xi1>, vector<2x8x8xf32>
    %cst_68 = arith.constant dense<0xFF800000> : vector<2x8xf32>
    %183 = vector.multi_reduction <maximumf>, %182, %cst_68 [2] : vector<2x8x8xf32> to vector<2x8xf32>
    %184 = vector.shape_cast %183 : vector<2x8xf32> to vector<2x8x1xf32>
    %185 = vector.broadcast %184 : vector<2x8x1xf32> to vector<2x8x8xf32>
    %186 = arith.subf %182, %185 : vector<2x8x8xf32>
    %187 = math.exp %186 : vector<2x8x8xf32>
    %cst_69 = arith.constant dense<0.000000e+00> : vector<2x8xf32>
    %188 = vector.multi_reduction <add>, %187, %cst_69 [2] : vector<2x8x8xf32> to vector<2x8xf32>
    %189 = vector.shape_cast %188 : vector<2x8xf32> to vector<2x8x1xf32>
    %190 = tpu.reciprocal %189 {approx = true} : vector<2x8x1xf32> -> vector<2x8x1xf32>
    %191 = vector.broadcast %190 : vector<2x8x1xf32> to vector<2x8x8xf32>
    %192 = arith.mulf %187, %191 : vector<2x8x8xf32>
    %cst_70 = arith.constant 0.000000e+00 : f32
    %193 = vector.broadcast %cst_70 : f32 to vector<2x8x8xf32>
    %194 = arith.select %4, %193, %192 : vector<2x8x8xi1>, vector<2x8x8xf32>
    %cst_71 = arith.constant dense<0.000000e+00> : vector<2x8x64xf32>
    %195 = tpu.matmul %194, %179, %cst_71 {dimension_numbers = #tpu.dot_dimension_numbers<[2], [1], [1], [2], [0, 0, 0, 1, 1, 2], [0], [0]>} : vector<2x8x8xf32>, vector<2x8x64xf32>, vector<2x8x64xf32> -> vector<2x8x64xf32>
    %196 = vector.shape_cast %195 : vector<2x8x64xf32> to vector<16x64xf32>
    %c448 = arith.constant 448 : index
    %c0_72 = arith.constant 0 : index
    %197 = vector.load %arg4[%c448, %c0_72] : memref<512x256xf32, #tpu.memory_space<vmem>>, vector<64x256xf32>
    %cst_73 = arith.constant dense<0.000000e+00> : vector<16x256xf32>
    %198 = tpu.matmul %196, %197, %cst_73 {dimension_numbers = #tpu.dot_dimension_numbers<[1], [0], [0], [1], [0, 0, 1, 1], [], []>} : vector<16x64xf32>, vector<64x256xf32>, vector<16x256xf32> -> vector<16x256xf32>
    %199 = arith.addf %176, %198 : vector<16x256xf32>
    %200 = arith.addf %199, %1 : vector<16x256xf32>
    %cst_74 = arith.constant dense<0.000000e+00> : vector<16xf32>
    %201 = vector.multi_reduction <add>, %200, %cst_74 [1] : vector<16x256xf32> to vector<16xf32>
    %202 = vector.shape_cast %201 : vector<16xf32> to vector<16x1xf32>
    %cst_75 = arith.constant 2.560000e+02 : f32
    %203 = vector.broadcast %cst_75 : f32 to vector<16x1xf32>
    %204 = arith.divf %202, %203 : vector<16x1xf32>
    %205 = vector.broadcast %204 : vector<16x1xf32> to vector<16x256xf32>
    %206 = arith.subf %200, %205 : vector<16x256xf32>
    %207 = arith.mulf %206, %206 : vector<16x256xf32>
    %cst_76 = arith.constant dense<0.000000e+00> : vector<16xf32>
    %208 = vector.multi_reduction <add>, %207, %cst_76 [1] : vector<16x256xf32> to vector<16xf32>
    %209 = vector.shape_cast %208 : vector<16xf32> to vector<16x1xf32>
    %cst_77 = arith.constant 2.560000e+02 : f32
    %210 = vector.broadcast %cst_77 : f32 to vector<16x1xf32>
    %211 = arith.divf %209, %210 : vector<16x1xf32>
    %212 = vector.broadcast %204 : vector<16x1xf32> to vector<16x256xf32>
    %213 = arith.subf %200, %212 : vector<16x256xf32>
    %cst_78 = arith.constant 9.99999974E-6 : f32
    %214 = vector.broadcast %cst_78 : f32 to vector<16x1xf32>
    %215 = arith.addf %211, %214 : vector<16x1xf32>
    %216 = math.rsqrt %215 : vector<16x1xf32>
    %217 = vector.broadcast %216 : vector<16x1xf32> to vector<16x256xf32>
    %218 = arith.mulf %213, %217 : vector<16x256xf32>
    %c0_79 = arith.constant 0 : index
    %c0_80 = arith.constant 0 : index
    %219 = vector.load %arg5[%c0_79, %c0_80] : memref<256x256xf32, #tpu.memory_space<vmem>>, vector<256x256xf32>
    %cst_81 = arith.constant dense<0.000000e+00> : vector<16x256xf32>
    %220 = tpu.matmul %218, %219, %cst_81 {dimension_numbers = #tpu.dot_dimension_numbers<[1], [0], [0], [1], [0, 0, 1, 1], [], []>} : vector<16x256xf32>, vector<256x256xf32>, vector<16x256xf32> -> vector<16x256xf32>
    %cst_82 = arith.constant 0.000000e+00 : f32
    %221 = vector.broadcast %cst_82 : f32 to vector<16x256xf32>
    %222 = arith.maximumf %220, %221 : vector<16x256xf32>
    %c0_83 = arith.constant 0 : index
    %c0_84 = arith.constant 0 : index
    %223 = vector.load %arg6[%c0_83, %c0_84] : memref<256x256xf32, #tpu.memory_space<vmem>>, vector<256x256xf32>
    %cst_85 = arith.constant dense<0.000000e+00> : vector<16x256xf32>
    %224 = tpu.matmul %222, %223, %cst_85 {dimension_numbers = #tpu.dot_dimension_numbers<[1], [0], [0], [1], [0, 0, 1, 1], [], []>} : vector<16x256xf32>, vector<256x256xf32>, vector<16x256xf32> -> vector<16x256xf32>
    %225 = arith.addf %224, %218 : vector<16x256xf32>
    %cst_86 = arith.constant dense<0.000000e+00> : vector<16xf32>
    %226 = vector.multi_reduction <add>, %225, %cst_86 [1] : vector<16x256xf32> to vector<16xf32>
    %227 = vector.shape_cast %226 : vector<16xf32> to vector<16x1xf32>
    %cst_87 = arith.constant 2.560000e+02 : f32
    %228 = vector.broadcast %cst_87 : f32 to vector<16x1xf32>
    %229 = arith.divf %227, %228 : vector<16x1xf32>
    %230 = vector.broadcast %229 : vector<16x1xf32> to vector<16x256xf32>
    %231 = arith.subf %225, %230 : vector<16x256xf32>
    %232 = arith.mulf %231, %231 : vector<16x256xf32>
    %cst_88 = arith.constant dense<0.000000e+00> : vector<16xf32>
    %233 = vector.multi_reduction <add>, %232, %cst_88 [1] : vector<16x256xf32> to vector<16xf32>
    %234 = vector.shape_cast %233 : vector<16xf32> to vector<16x1xf32>
    %cst_89 = arith.constant 2.560000e+02 : f32
    %235 = vector.broadcast %cst_89 : f32 to vector<16x1xf32>
    %236 = arith.divf %234, %235 : vector<16x1xf32>
    %237 = vector.broadcast %229 : vector<16x1xf32> to vector<16x256xf32>
    %238 = arith.subf %225, %237 : vector<16x256xf32>
    %cst_90 = arith.constant 9.99999974E-6 : f32
    %239 = vector.broadcast %cst_90 : f32 to vector<16x1xf32>
    %240 = arith.addf %236, %239 : vector<16x1xf32>
    %241 = math.rsqrt %240 : vector<16x1xf32>
    %242 = vector.broadcast %241 : vector<16x1xf32> to vector<16x256xf32>
    %243 = arith.mulf %238, %242 : vector<16x256xf32>
    %244 = vector.shape_cast %243 : vector<16x256xf32> to vector<2x8x256xf32>
    %c0_91 = arith.constant 0 : index
    %c0_92 = arith.constant 0 : index
    %c0_93 = arith.constant 0 : index
    %245 = vector.load %arg7[%c0_91, %c0_92, %c0_93] : memref<2x8x256xf32, #tpu.memory_space<vmem>>, vector<2x8x256xf32>
    tpu.vector_store %arg7[%c0_91, %c0_92, %c0_93], %244 {strides = array<i32>} : memref<2x8x256xf32, #tpu.memory_space<vmem>>, vector<2x8x256xf32>,
    return
  }
  func.func @transform_0(%arg0: i32) -> (i32, i32, i32) {
    %c0_i32 = arith.constant 0 : i32
    %c0_i32_0 = arith.constant 0 : i32
    %c0_i32_1 = arith.constant 0 : i32
    return %arg0, %c0_i32, %c0_i32_0 : i32, i32, i32
  }
  func.func @transform_1(%arg0: i32) -> (i32, i32, i32) {
    %c0_i32 = arith.constant 0 : i32
    %c0_i32_0 = arith.constant 0 : i32
    %c0_i32_1 = arith.constant 0 : i32
    return %arg0, %c0_i32, %c0_i32_0 : i32, i32, i32
  }
  func.func @transform_2(%arg0: i32) -> (i32, i32) {
    %c0_i32 = arith.constant 0 : i32
    %c0_i32_0 = arith.constant 0 : i32
    %c0_i32_1 = arith.constant 0 : i32
    return %c0_i32, %c0_i32_0 : i32, i32
  }
  func.func @transform_3(%arg0: i32) -> (i32, i32) {
    %c0_i32 = arith.constant 0 : i32
    %c0_i32_0 = arith.constant 0 : i32
    %c0_i32_1 = arith.constant 0 : i32
    return %c0_i32, %c0_i32_0 : i32, i32
  }
  func.func @transform_4(%arg0: i32) -> (i32, i32) {
    %c0_i32 = arith.constant 0 : i32
    %c0_i32_0 = arith.constant 0 : i32
    %c0_i32_1 = arith.constant 0 : i32
    return %c0_i32, %c0_i32_0 : i32, i32
  }
  func.func @transform_5(%arg0: i32) -> (i32, i32) {
    %c0_i32 = arith.constant 0 : i32
    %c0_i32_0 = arith.constant 0 : i32
    %c0_i32_1 = arith.constant 0 : i32
    return %c0_i32, %c0_i32_0 : i32, i32
  }
  func.func @transform_6(%arg0: i32) -> (i32, i32, i32) {
    %c0_i32 = arith.constant 0 : i32
    %c0_i32_0 = arith.constant 0 : i32
    %c0_i32_1 = arith.constant 0 : i32
    return %arg0, %c0_i32, %c0_i32_0 : i32, i32, i32
  }
}

</mosaic_0001>

<bundles_post_ra>
// kernel: tpu_custom_call.1
= control target key start
LH: loop header
LB: loop body
LE: loop exit
PB: predicated region body
PF: predicated region fallthrough
CT: control target
= control target key end

     0   :  { %11 = vsyncpa [#allocation3], 0  ;;  %s4072_s0 = inlined_call_operand.hbm [shape: f32[2,8,256], index: 0, kind: input, shape index: {}]   ;;  %s4073_s1 = inlined_call_operand.hbm [shape: s8[2,8,8], index: 1, kind: input, shape index: {}]   ;;  %s4074_s2 = inlined_call_operand.hbm [shape: f32[256,1536], index: 2, kind: input, shape index: {}]   ;;  %s4075_s3 = inlined_call_operand.hbm [shape: f32[512,256], index: 3, kind: input, shape index: {}]   ;;  %s4076_s4 = inlined_call_operand.hbm [shape: f32[256,256], index: 4, kind: input, shape index: {}]   ;;  %s4077_s5 = inlined_call_operand.hbm [shape: f32[256,256], index: 5, kind: input, shape index: {}]   ;;  %s4078_s6 = inlined_call_operand.hbm [shape: f32[2,8,256], index: 6, kind: output, shape index: {}]  }
   0x1   :  { %12 = vsyncpa [#allocation6], 0 }
   0x2   :  { %13 = vsyncpa [#allocation9], 0 }
   0x3   :  { %14 = vsyncpa [#allocation12], 0  ;;  %s33_s23 = sshll.u32 %s4073_s1, 4  ;;  %s34_s23 = int_to_ptr.hbm [resolvable:$true] %s33_s23 }
   0x4   :  { %15 = vsyncpa [#allocation4], 0  ;;  %s3497_s24 = smov [#allocation5]   ;;  %s3498_s26 = smov 32  }
   0x5   :  { %s35_s25 = sshll.u32 %s3497_s24, 4  ;;  %s3499_s27 = smov 2   ;;  %s36_s25 = int_to_ptr.vmem [resolvable:$true] %s35_s25 }
   0x6   :  { %41 = dma.hbm_to_vmem [thread:$0]  %s34_s23, 64, %s36_s25, [#allocation6], %s3498_s26, %s3498_s26, %s3499_s27  }
   0x7   :  { %s59_s30 = sshll.u32 %s4075_s3, 4  ;;  %s3500_s7 = smov [#allocation8]   ;;  %s60_s30 = int_to_ptr.hbm [resolvable:$true] %s59_s30 }
   0x8   :  { %s61_s8 = sshll.u32 %s3500_s7, 4  ;;  %s20_s11 = sshll.u32 %s4072_s0, 4  ;;  %s62_s8 = int_to_ptr.vmem [resolvable:$true] %s61_s8  ;;  %s21_s11 = int_to_ptr.hbm [resolvable:$true] %s20_s11 }
   0x9   :  { %s3501_s1 = smov 256   ;;  %s3502_s12 = smov 16  }
   0xa   :  { %67 = dma.hbm_to_vmem [thread:$0]  %s60_s30, 16384, %s62_s8, [#allocation9], %s3501_s1, %s3501_s1, %s3502_s12  }
   0xb   :  { %s46_s15 = sshll.u32 %s4074_s2, 4  ;;  %s3503_s3 = smov [#allocation2]   ;;  %s47_s15 = int_to_ptr.hbm [resolvable:$true] %s46_s15 }
   0xc   :  { %s22_s16 = sshll.u32 %s3503_s3, 4  ;;  %s3504_s0 = smov [#allocation7]   ;;  %s23_s16 = int_to_ptr.vmem [resolvable:$true] %s22_s16 }
   0xd   :  { %28 = dma.hbm_to_vmem [thread:$0]  %s21_s11, 512, %s23_s16, [#allocation3], %s3501_s1, %s3501_s1, %s3502_s12  }
   0xe   :  { %s48_s17 = sshll.u32 %s3504_s0, 4  ;;  %s3505_s18 = smov 1536   ;;  %s49_s17 = int_to_ptr.vmem [resolvable:$true] %s48_s17 }
   0xf   :  { %s3506_s19 = smov 96   ;;  %s72_s22 = sshll.u32 %s4076_s4, 4  ;;  %s73_s22 = int_to_ptr.hbm [resolvable:$true] %s72_s22 }
  0x10   :  { %54 = dma.hbm_to_vmem [thread:$0]  %s47_s15, 49152, %s49_s17, [#allocation6], %s3505_s18, %s3505_s18, %s3506_s19  }
  0x11   :  { %s3507_s2 = smov [#allocation10]   ;;  %s85_s26 = sshll.u32 %s4077_s5, 4  ;;  %s86_s26 = int_to_ptr.hbm [resolvable:$true] %s85_s26 }
  0x12   :  { %s74_s23 = sshll.u32 %s3507_s2, 4  ;;  %s3508_s27 = smov [#allocation11]   ;;  %s75_s23 = int_to_ptr.vmem [resolvable:$true] %s74_s23 }
  0x13   :  { %80 = dma.hbm_to_vmem [thread:$0]  %s73_s22, 8192, %s75_s23, [#allocation9], %s3501_s1, %s3501_s1, %s3502_s12  }
  0x14   :  { %s87_s28 = sshll.u32 %s3508_s27, 4  ;;  %s88_s28 = int_to_ptr.vmem [resolvable:$true] %s87_s28 }
  0x15   :  { %93 = dma.hbm_to_vmem [thread:$0]  %s86_s26, 8192, %s88_s28, [#allocation12], %s3501_s1, %s3501_s1, %s3502_s12  }
  0x16   :  { %3487 = dma.done.wait [#allocation3], 512  }
  0x17   :  { %3488 = vsyncadd [#allocation3], 4294966784 }
  0x18   :  { %3489 = dma.done.wait [#allocation6], 49216  }
  0x19   :  { %3490 = vsyncadd [#allocation6], 4294918080 }
  0x1a   :  { %3491 = dma.done.wait [#allocation9], 24576  }
  0x1b   :  { %3492 = vsyncadd [#allocation9], 4294942720 }
  0x1c   :  { %3493 = dma.done.wait [#allocation12], 8192  }
  0x1d   :  { %3494 = vsyncadd [#allocation12], 4294959104  ;;  %v308_v0 = vld [vmem:[#allocation7 + $0x5a0] sm:$0xff]  ;;  %v309_v12 = vld [vmem:[#allocation7 + $0x5a8] sm:$0xff]  ;;  %vm1072_vm0 = vcmask 523264   ;;  %s3509_s4 = smov 64  }
  0x1e   :  { %v500_v1 = vld [vmem:[#allocation7 + $0xba0] sm:$0xff]  ;;  %512 = vmatpush.msra.mxu0 %v308_v0  ;;  %v297_v13 = vld [vmem:[#allocation7 + $0x548] sm:$0xff]  ;;  %558 = vmatpush.msra.mxu2 %v309_v12  ;;  %v310_v52 = vld [vmem:[#allocation7 + $0x5b0] sm:$0xff]  ;;  %vm1133_vm4 = vcmask 64512   ;;  %s3512_s5 = smov [#allocation13]   ;;  %s3125_s8 = sshll.u32 %s4078_s6, 4  ;;  %s3126_s8 = int_to_ptr.hbm [resolvable:$true] %s3125_s8 }
  0x1f   :  { %v296_v2 = vld [vmem:[#allocation7 + $0x540] sm:$0xff]  ;;  %535 = vmatpush.msra.mxu1 %v500_v1  ;;  %v285_v16 = vld [vmem:[#allocation7 + $0x4e8] sm:$0xff]  ;;  %v502_v53 = vld [vmem:[#allocation7 + $0xbb0] sm:$0xff]  ;;  %s3123_s29 = sshll.u32 %s3512_s5, 4  ;;  %s3124_s29 = int_to_ptr.vmem [resolvable:$true] %s3123_s29 }
  0x20   :  { %v488_v3 = vld [vmem:[#allocation7 + $0xb40] sm:$0xff]  ;;  %513 = vmatpush.msra.mxu0 %v296_v2  ;;  %559 = vmatpush.msra.mxu2 %v297_v13  ;;  %v501_v19 = vld [vmem:[#allocation7 + $0xba8] sm:$0xff]  ;;  %v298_v56 = vld [vmem:[#allocation7 + $0x550] sm:$0xff] }
  0x21   :  { %v284_v4 = vld [vmem:[#allocation7 + $0x4e0] sm:$0xff]  ;;  %536 = vmatpush.msra.mxu1 %v488_v3  ;;  %v273_v20 = vld [vmem:[#allocation7 + $0x488] sm:$0xff]  ;;  %581 = vmatpush.msra.mxu3 %v501_v19  ;;  %v490_v57 = vld [vmem:[#allocation7 + $0xb50] sm:$0xff] }
  0x22   :  { %v476_v5 = vld [vmem:[#allocation7 + $0xae0] sm:$0xff]  ;;  %514 = vmatpush.msra.mxu0 %v284_v4  ;;  %v489_v21 = vld [vmem:[#allocation7 + $0xb48] sm:$0xff]  ;;  %560 = vmatpush.msra.mxu2 %v285_v16  ;;  %v286_v60 = vld [vmem:[#allocation7 + $0x4f0] sm:$0xff] }
  0x23   :  { %v272_v6 = vld [vmem:[#allocation7 + $0x480] sm:$0xff]  ;;  %537 = vmatpush.msra.mxu1 %v476_v5  ;;  %v261_v24 = vld [vmem:[#allocation7 + $0x428] sm:$0xff]  ;;  %582 = vmatpush.msra.mxu3 %v489_v21  ;;  %v478_v61 = vld [vmem:[#allocation7 + $0xaf0] sm:$0xff] }
  0x24   :  { %v464_v7 = vld [vmem:[#allocation7 + $0xa80] sm:$0xff]  ;;  %515 = vmatpush.msra.mxu0 %v272_v6  ;;  %v477_v25 = vld [vmem:[#allocation7 + $0xae8] sm:$0xff]  ;;  %561 = vmatpush.msra.mxu2 %v273_v20  ;;  %v274_v0 = vld [vmem:[#allocation7 + $0x490] sm:$0xff] }
  0x25   :  { %v260_v8 = vld [vmem:[#allocation7 + $0x420] sm:$0xff]  ;;  %538 = vmatpush.msra.mxu1 %v464_v7  ;;  %v249_v28 = vld [vmem:[#allocation7 + $0x3c8] sm:$0xff]  ;;  %583 = vmatpush.msra.mxu3 %v477_v25  ;;  %v466_v1 = vld [vmem:[#allocation7 + $0xa90] sm:$0xff] }
  0x26   :  { %v452_v9 = vld [vmem:[#allocation7 + $0xa20] sm:$0xff]  ;;  %516 = vmatpush.msra.mxu0 %v260_v8  ;;  %v465_v29 = vld [vmem:[#allocation7 + $0xa88] sm:$0xff]  ;;  %562 = vmatpush.msra.mxu2 %v261_v24  ;;  %v262_v4 = vld [vmem:[#allocation7 + $0x430] sm:$0xff] }
  0x27   :  { %v248_v10 = vld [vmem:[#allocation7 + $0x3c0] sm:$0xff]  ;;  %539 = vmatpush.msra.mxu1 %v452_v9  ;;  %v237_v32 = vld [vmem:[#allocation7 + $0x368] sm:$0xff]  ;;  %584 = vmatpush.msra.mxu3 %v465_v29  ;;  %v454_v5 = vld [vmem:[#allocation7 + $0xa30] sm:$0xff] }
  0x28   :  { %v440_v11 = vld [vmem:[#allocation7 + $0x9c0] sm:$0xff]  ;;  %517 = vmatpush.msra.mxu0 %v248_v10  ;;  %v453_v33 = vld [vmem:[#allocation7 + $0xa28] sm:$0xff]  ;;  %563 = vmatpush.msra.mxu2 %v249_v28  ;;  %v250_v8 = vld [vmem:[#allocation7 + $0x3d0] sm:$0xff] }
  0x29   :  { %v236_v14 = vld [vmem:[#allocation7 + $0x360] sm:$0xff]  ;;  %540 = vmatpush.msra.mxu1 %v440_v11  ;;  %v225_v36 = vld [vmem:[#allocation7 + $0x308] sm:$0xff]  ;;  %585 = vmatpush.msra.mxu3 %v453_v33  ;;  %v442_v9 = vld [vmem:[#allocation7 + $0x9d0] sm:$0xff] }
  0x2a   :  { %v428_v15 = vld [vmem:[#allocation7 + $0x960] sm:$0xff]  ;;  %518 = vmatpush.msra.mxu0 %v236_v14  ;;  %v441_v37 = vld [vmem:[#allocation7 + $0x9c8] sm:$0xff]  ;;  %564 = vmatpush.msra.mxu2 %v237_v32  ;;  %v311_v10 = vld [vmem:[#allocation7 + $0x5b8] sm:$0xff] }
  0x2b   :  { %v224_v17 = vld [vmem:[#allocation7 + $0x300] sm:$0xff]  ;;  %541 = vmatpush.msra.mxu1 %v428_v15  ;;  %v213_v40 = vld [vmem:[#allocation7 + $0x2a8] sm:$0xff]  ;;  %586 = vmatpush.msra.mxu3 %v441_v37  ;;  %v238_v12 = vld [vmem:[#allocation7 + $0x370] sm:$0xff] }
  0x2c   :  { %v416_v18 = vld [vmem:[#allocation7 + $0x900] sm:$0xff]  ;;  %519 = vmatpush.msra.mxu0 %v224_v17  ;;  %v429_v41 = vld [vmem:[#allocation7 + $0x968] sm:$0xff]  ;;  %565 = vmatpush.msra.mxu2 %v225_v36  ;;  %v430_v13 = vld [vmem:[#allocation7 + $0x970] sm:$0xff] }
  0x2d   :  { %v212_v22 = vld [vmem:[#allocation7 + $0x2a0] sm:$0xff]  ;;  %542 = vmatpush.msra.mxu1 %v416_v18  ;;  %v201_v44 = vld [vmem:[#allocation7 + $0x248] sm:$0xff]  ;;  %587 = vmatpush.msra.mxu3 %v429_v41  ;;  %v299_v14 = vld [vmem:[#allocation7 + $0x558] sm:$0xff] }
  0x2e   :  { %v404_v23 = vld [vmem:[#allocation7 + $0x8a0] sm:$0xff]  ;;  %520 = vmatpush.msra.mxu0 %v212_v22  ;;  %v417_v45 = vld [vmem:[#allocation7 + $0x908] sm:$0xff]  ;;  %566 = vmatpush.msra.mxu2 %v213_v40  ;;  %v226_v16 = vld [vmem:[#allocation7 + $0x310] sm:$0xff] }
  0x2f   :  { %v200_v26 = vld [vmem:[#allocation7 + $0x240] sm:$0xff]  ;;  %543 = vmatpush.msra.mxu1 %v404_v23  ;;  %v189_v48 = vld [vmem:[#allocation7 + $0x1e8] sm:$0xff]  ;;  %588 = vmatpush.msra.mxu3 %v417_v45  ;;  %v418_v17 = vld [vmem:[#allocation7 + $0x910] sm:$0xff] }
  0x30   :  { %v392_v27 = vld [vmem:[#allocation7 + $0x840] sm:$0xff]  ;;  %521 = vmatpush.msra.mxu0 %v200_v26  ;;  %v405_v49 = vld [vmem:[#allocation7 + $0x8a8] sm:$0xff]  ;;  %567 = vmatpush.msra.mxu2 %v201_v44  ;;  %v287_v18 = vld [vmem:[#allocation7 + $0x4f8] sm:$0xff] }
  0x31   :  { %v188_v30 = vld [vmem:[#allocation7 + $0x1e0] sm:$0xff]  ;;  %544 = vmatpush.msra.mxu1 %v392_v27  ;;  %v177_v54 = vld [vmem:[#allocation7 + $0x188] sm:$0xff]  ;;  %589 = vmatpush.msra.mxu3 %v405_v49  ;;  %v214_v20 = vld [vmem:[#allocation7 + $0x2b0] sm:$0xff] }
  0x32   :  { %v380_v31 = vld [vmem:[#allocation7 + $0x7e0] sm:$0xff]  ;;  %522 = vmatpush.msra.mxu0 %v188_v30  ;;  %568 = vmatpush.msra.mxu2 %v189_v48  ;;  %v393_v55 = vld [vmem:[#allocation7 + $0x848] sm:$0xff]  ;;  %v406_v21 = vld [vmem:[#allocation7 + $0x8b0] sm:$0xff] }
  0x33   :  { %v176_v34 = vld [vmem:[#allocation7 + $0x180] sm:$0xff]  ;;  %545 = vmatpush.msra.mxu1 %v380_v31  ;;  %v165_v58 = vld [vmem:[#allocation7 + $0x128] sm:$0xff]  ;;  %590 = vmatpush.msra.mxu3 %v393_v55  ;;  %v275_v22 = vld [vmem:[#allocation7 + $0x498] sm:$0xff] }
  0x34   :  { %v368_v35 = vld [vmem:[#allocation7 + $0x780] sm:$0xff]  ;;  %523 = vmatpush.msra.mxu0 %v176_v34  ;;  %v381_v59 = vld [vmem:[#allocation7 + $0x7e8] sm:$0xff]  ;;  %569 = vmatpush.msra.mxu2 %v177_v54  ;;  %v202_v24 = vld [vmem:[#allocation7 + $0x250] sm:$0xff] }
  0x35   :  { %v164_v38 = vld [vmem:[#allocation7 + $0x120] sm:$0xff]  ;;  %546 = vmatpush.msra.mxu1 %v368_v35  ;;  %v153_v62 = vld [vmem:[#allocation7 + $0xc8] sm:$0xff]  ;;  %591 = vmatpush.msra.mxu3 %v381_v59  ;;  %v394_v25 = vld [vmem:[#allocation7 + $0x850] sm:$0xff] }
  0x36   :  { %v356_v39 = vld [vmem:[#allocation7 + $0x720] sm:$0xff]  ;;  %524 = vmatpush.msra.mxu0 %v164_v38  ;;  %v369_v63 = vld [vmem:[#allocation7 + $0x788] sm:$0xff]  ;;  %570 = vmatpush.msra.mxu2 %v165_v58  ;;  %v263_v26 = vld [vmem:[#allocation7 + $0x438] sm:$0xff] }
  0x37   :  { %v152_v42 = vld [vmem:[#allocation7 + $0xc0] sm:$0xff]  ;;  %547 = vmatpush.msra.mxu1 %v356_v39  ;;  %v141_v2 = vld [vmem:[#allocation7 + $0x68] sm:$0xff]  ;;  %592 = vmatpush.msra.mxu3 %v369_v63  ;;  %v503_v27 = vld [vmem:[#allocation7 + $0xbb8] sm:$0xff] }
  0x38   :  { %v344_v43 = vld [vmem:[#allocation7 + $0x6c0] sm:$0xff]  ;;  %525 = vmatpush.msra.mxu0 %v152_v42  ;;  %v357_v3 = vld [vmem:[#allocation7 + $0x728] sm:$0xff]  ;;  %571 = vmatpush.msra.mxu2 %v153_v62  ;;  %v190_v28 = vld [vmem:[#allocation7 + $0x1f0] sm:$0xff] }
  0x39   :  { %v140_v46 = vld [vmem:[#allocation7 + $0x60] sm:$0xff]  ;;  %548 = vmatpush.msra.mxu1 %v344_v43  ;;  %v129_v6 = vld [vmem:[#allocation7 + $0x8] sm:$0xff]  ;;  %593 = vmatpush.msra.mxu3 %v357_v3  ;;  %v382_v29 = vld [vmem:[#allocation7 + $0x7f0] sm:$0xff] }
  0x3a   :  { %v332_v47 = vld [vmem:[#allocation7 + $0x660] sm:$0xff]  ;;  %526 = vmatpush.msra.mxu0 %v140_v46  ;;  %v345_v7 = vld [vmem:[#allocation7 + $0x6c8] sm:$0xff]  ;;  %572 = vmatpush.msra.mxu2 %v141_v2  ;;  %v251_v30 = vld [vmem:[#allocation7 + $0x3d8] sm:$0xff] }
  0x3b   :  { %v128_v50 = vld [vmem:[#allocation7] sm:$0xff]  ;;  %549 = vmatpush.msra.mxu1 %v332_v47  ;;  %v333_v11 = vld [vmem:[#allocation7 + $0x668] sm:$0xff]  ;;  %594 = vmatpush.msra.mxu3 %v345_v7  ;;  %v491_v31 = vld [vmem:[#allocation7 + $0xb58] sm:$0xff] }
  0x3c   :  { %v320_v51 = vld [vmem:[#allocation7 + $0x600] sm:$0xff]  ;;  %527 = vmatpush.msra.mxu0 %v128_v50  ;;  %573 = vmatpush.msra.mxu2 %v129_v6  ;;  %v321_v15 = vld [vmem:[#allocation7 + $0x608] sm:$0xff]  ;;  %v178_v32 = vld [vmem:[#allocation7 + $0x190] sm:$0xff] }
  0x3d   :  { %550 = vmatpush.msra.mxu1 %v320_v51  ;;  %595 = vmatpush.msra.mxu3 %v333_v11  ;;  %v3578_v19 = vld [vmem:[#allocation2] sm:$0xff]  ;;  %v3580_v23 = vld [vmem:[#allocation2 + $0x8] sm:$0xff]  ;;  %v370_v33 = vld [vmem:[#allocation7 + $0x790] sm:$0xff] }
  0x3e   :  { %604 = vmatpush.msrb.mxu0 %v310_v52  ;;  %650 = vmatpush.msrb.mxu2 %v311_v10  ;;  %v239_v34 = vld [vmem:[#allocation7 + $0x378] sm:$0xff]  ;;  %v166_v36 = vld [vmem:[#allocation7 + $0x130] sm:$0xff]  ;;  %v312_v50 = vld [vmem:[#allocation7 + $0x5c0] sm:$0xff] }
  0x3f   :  { %627 = vmatpush.msrb.mxu1 %v502_v53  ;;  %596 = vmatpush.msra.mxu3 %v321_v15  ;;  %v479_v35 = vld [vmem:[#allocation7 + $0xaf8] sm:$0xff]  ;;  %v358_v37 = vld [vmem:[#allocation7 + $0x730] sm:$0xff]  ;;  %v504_v51 = vld [vmem:[#allocation7 + $0xbc0] sm:$0xff] }
  0x40   :  { %605 = vmatpush.msrb.mxu0 %v298_v56  ;;  %651 = vmatpush.msrb.mxu2 %v299_v14  ;;  %v227_v38 = vld [vmem:[#allocation7 + $0x318] sm:$0xff]  ;;  %v154_v40 = vld [vmem:[#allocation7 + $0xd0] sm:$0xff]  ;;  %v300_v54 = vld [vmem:[#allocation7 + $0x560] sm:$0xff] }
  0x41   :  { %628 = vmatpush.msrb.mxu1 %v490_v57  ;;  %528 = vmatmul.f32.vlgmr.msra.gmra.mxu0 %v3578_v19  ;;  %v467_v39 = vld [vmem:[#allocation7 + $0xa98] sm:$0xff]  ;;  %v346_v41 = vld [vmem:[#allocation7 + $0x6d0] sm:$0xff]  ;;  %v492_v55 = vld [vmem:[#allocation7 + $0xb60] sm:$0xff] }
  0x42   :  { %606 = vmatpush.msrb.mxu0 %v286_v60  ;;  %652 = vmatpush.msrb.mxu2 %v287_v18  ;;  %v3584_v42 = vld [vmem:[#allocation2 + $0x10] sm:$0xff]  ;;  %v3586_v43 = vld [vmem:[#allocation2 + $0x18] sm:$0xff]  ;;  %v288_v58 = vld [vmem:[#allocation7 + $0x500] sm:$0xff] }
  0x43   :  { %629 = vmatpush.msrb.mxu1 %v478_v61  ;;  %673 = vmatpush.msrb.mxu3 %v503_v27  ;;  %v142_v44 = vld [vmem:[#allocation7 + $0x70] sm:$0xff]  ;;  %v215_v46 = vld [vmem:[#allocation7 + $0x2b8] sm:$0xff]  ;;  %v480_v59 = vld [vmem:[#allocation7 + $0xb00] sm:$0xff] }
  0x44   :  { %607 = vmatpush.msrb.mxu0 %v274_v0  ;;  %653 = vmatpush.msrb.mxu2 %v275_v22  ;;  %v334_v45 = vld [vmem:[#allocation7 + $0x670] sm:$0xff]  ;;  %v455_v47 = vld [vmem:[#allocation7 + $0xa38] sm:$0xff]  ;;  %v276_v62 = vld [vmem:[#allocation7 + $0x4a0] sm:$0xff] }
  0x45   :  { %630 = vmatpush.msrb.mxu1 %v466_v1  ;;  %674 = vmatpush.msrb.mxu3 %v491_v31  ;;  %v130_v48 = vld [vmem:[#allocation7 + $0x10] sm:$0xff]  ;;  %v203_v52 = vld [vmem:[#allocation7 + $0x258] sm:$0xff]  ;;  %v468_v63 = vld [vmem:[#allocation7 + $0xaa0] sm:$0xff] }
  0x46   :  { %608 = vmatpush.msrb.mxu0 %v262_v4  ;;  %551 = vmatmul.f32.vlgmr.msra.gmra.mxu1 %v3580_v23  ;;  %v322_v49 = vld [vmem:[#allocation7 + $0x610] sm:$0xff]  ;;  %v443_v53 = vld [vmem:[#allocation7 + $0x9d8] sm:$0xff]  ;;  %v264_v0 = vld [vmem:[#allocation7 + $0x440] sm:$0xff] }
  0x47   :  { %631 = vmatpush.msrb.mxu1 %v454_v5  ;;  %654 = vmatpush.msrb.mxu2 %v263_v26  ;;  %v191_v56 = vld [vmem:[#allocation7 + $0x1f8] sm:$0xff]  ;;  %v456_v1 = vld [vmem:[#allocation7 + $0xa40] sm:$0xff]  ;;  %v301_v26 = vld [vmem:[#allocation7 + $0x568] sm:$0xff] }
  0x48   :  { %609 = vmatpush.msrb.mxu0 %v250_v8  ;;  %675 = vmatpush.msrb.mxu3 %v479_v35  ;;  %v431_v57 = vld [vmem:[#allocation7 + $0x978] sm:$0xff]  ;;  %v252_v4 = vld [vmem:[#allocation7 + $0x3e0] sm:$0xff] }
  0x49   :  { %632 = vmatpush.msrb.mxu1 %v442_v9  ;;  %655 = vmatpush.msrb.mxu2 %v251_v30  ;;  %v179_v60 = vld [vmem:[#allocation7 + $0x198] sm:$0xff]  ;;  %v444_v5 = vld [vmem:[#allocation7 + $0x9e0] sm:$0xff]  ;;  %v289_v30 = vld [vmem:[#allocation7 + $0x508] sm:$0xff] }
  0x4a   :  { %610 = vmatpush.msrb.mxu0 %v238_v12  ;;  %676 = vmatpush.msrb.mxu3 %v467_v39  ;;  %v419_v61 = vld [vmem:[#allocation7 + $0x918] sm:$0xff]  ;;  %v240_v8 = vld [vmem:[#allocation7 + $0x380] sm:$0xff] }
  0x4b   :  { %633 = vmatpush.msrb.mxu1 %v430_v13  ;;  %656 = vmatpush.msrb.mxu2 %v239_v34  ;;  %v167_v2 = vld [vmem:[#allocation7 + $0x138] sm:$0xff]  ;;  %v432_v9 = vld [vmem:[#allocation7 + $0x980] sm:$0xff]  ;;  %v277_v34 = vld [vmem:[#allocation7 + $0x4a8] sm:$0xff] }
  0x4c   :  { %611 = vmatpush.msrb.mxu0 %v226_v16  ;;  %677 = vmatpush.msrb.mxu3 %v455_v47  ;;  %v407_v3 = vld [vmem:[#allocation7 + $0x8b8] sm:$0xff]  ;;  %v228_v12 = vld [vmem:[#allocation7 + $0x320] sm:$0xff]  ;;  %v241_v47 = vld [vmem:[#allocation7 + $0x388] sm:$0xff] }
  0x4d   :  { %634 = vmatpush.msrb.mxu1 %v418_v17  ;;  %657 = vmatpush.msrb.mxu2 %v227_v38  ;;  %v155_v6 = vld [vmem:[#allocation7 + $0xd8] sm:$0xff]  ;;  %v420_v13 = vld [vmem:[#allocation7 + $0x920] sm:$0xff]  ;;  %v265_v38 = vld [vmem:[#allocation7 + $0x448] sm:$0xff] }
  0x4e   :  { %612 = vmatpush.msrb.mxu0 %v214_v20  ;;  %554 = vmatmul.f32.gmra.mxu1 %v3586_v43  ;;  %v395_v7 = vld [vmem:[#allocation7 + $0x858] sm:$0xff]  ;;  %v216_v16 = vld [vmem:[#allocation7 + $0x2c0] sm:$0xff] }
  0x4f   :  { %635 = vmatpush.msrb.mxu1 %v406_v21  ;;  %531 = vmatmul.f32.gmra.mxu0 %v3584_v42  ;;  %v143_v10 = vld [vmem:[#allocation7 + $0x78] sm:$0xff]  ;;  %v408_v17 = vld [vmem:[#allocation7 + $0x8c0] sm:$0xff]  ;;  %v313_v21 = vld [vmem:[#allocation7 + $0x5c8] sm:$0xff] }
  0x50   :  { %613 = vmatpush.msrb.mxu0 %v202_v24  ;;  %658 = vmatpush.msrb.mxu2 %v215_v46  ;;  %v383_v11 = vld [vmem:[#allocation7 + $0x7f8] sm:$0xff]  ;;  %v204_v18 = vld [vmem:[#allocation7 + $0x260] sm:$0xff]  ;;  %v505_v46 = vld [vmem:[#allocation7 + $0xbc8] sm:$0xff] }
  0x51   :  { %636 = vmatpush.msrb.mxu1 %v394_v25  ;;  %678 = vmatpush.msrb.mxu3 %v443_v53  ;;  %v131_v14 = vld [vmem:[#allocation7 + $0x18] sm:$0xff]  ;;  %v396_v20 = vld [vmem:[#allocation7 + $0x860] sm:$0xff]  ;;  %v205_v53 = vld [vmem:[#allocation7 + $0x268] sm:$0xff] }
  0x52   :  { %614 = vmatpush.msrb.mxu0 %v190_v28  ;;  %659 = vmatpush.msrb.mxu2 %v203_v52  ;;  %v371_v15 = vld [vmem:[#allocation7 + $0x798] sm:$0xff]  ;;  %v192_v22 = vld [vmem:[#allocation7 + $0x200] sm:$0xff]  ;;  %v469_v52 = vld [vmem:[#allocation7 + $0xaa8] sm:$0xff] }
  0x53   :  { %637 = vmatpush.msrb.mxu1 %v382_v29  ;;  %679 = vmatpush.msrb.mxu3 %v431_v57  ;;  %v384_v24 = vld [vmem:[#allocation7 + $0x800] sm:$0xff]  ;;  %v359_v25 = vld [vmem:[#allocation7 + $0x738] sm:$0xff]  ;;  %v181_v57 = vld [vmem:[#allocation7 + $0x1a8] sm:$0xff] }
  0x54   :  { %615 = vmatpush.msrb.mxu0 %v178_v32  ;;  %660 = vmatpush.msrb.mxu2 %v191_v56  ;;  %v180_v27 = vld [vmem:[#allocation7 + $0x1a0] sm:$0xff]  ;;  %v347_v29 = vld [vmem:[#allocation7 + $0x6d8] sm:$0xff]  ;;  %v445_v56 = vld [vmem:[#allocation7 + $0x9e8] sm:$0xff] }
  0x55   :  { %638 = vmatpush.msrb.mxu1 %v370_v33  ;;  %680 = vmatpush.msrb.mxu3 %v419_v61  ;;  %v372_v28 = vld [vmem:[#allocation7 + $0x7a0] sm:$0xff]  ;;  %v335_v33 = vld [vmem:[#allocation7 + $0x678] sm:$0xff]  ;;  %v157_v61 = vld [vmem:[#allocation7 + $0xe8] sm:$0xff] }
  0x56   :  { %616 = vmatpush.msrb.mxu0 %v166_v36  ;;  %661 = vmatpush.msrb.mxu2 %v179_v60  ;;  %v168_v31 = vld [vmem:[#allocation7 + $0x140] sm:$0xff]  ;;  %v421_v60 = vld [vmem:[#allocation7 + $0x928] sm:$0xff] }
  0x57   :  { %639 = vmatpush.msrb.mxu1 %v358_v37  ;;  %681 = vmatpush.msrb.mxu3 %v407_v3  ;;  %v360_v32 = vld [vmem:[#allocation7 + $0x740] sm:$0xff]  ;;  %v323_v37 = vld [vmem:[#allocation7 + $0x618] sm:$0xff] }
  0x58   :  { %617 = vmatpush.msrb.mxu0 %v154_v40  ;;  %662 = vmatpush.msrb.mxu2 %v167_v2  ;;  %v156_v35 = vld [vmem:[#allocation7 + $0xe0] sm:$0xff]  ;;  %v385_v2 = vld [vmem:[#allocation7 + $0x808] sm:$0xff]  ;;  %v315_v3 = vld [vmem:[#allocation7 + $0x5d8] sm:$0xff] }
  0x59   :  { %640 = vmatpush.msrb.mxu1 %v346_v41  ;;  %682 = vmatpush.msrb.mxu3 %v395_v7  ;;  %v348_v36 = vld [vmem:[#allocation7 + $0x6e0] sm:$0xff]  ;;  %v253_v41 = vld [vmem:[#allocation7 + $0x3e8] sm:$0xff]  ;;  %v291_v7 = vld [vmem:[#allocation7 + $0x518] sm:$0xff] }
  0x5a   :  { %618 = vmatpush.msrb.mxu0 %v142_v44  ;;  %663 = vmatpush.msrb.mxu2 %v155_v6  ;;  %v144_v39 = vld [vmem:[#allocation7 + $0x80] sm:$0xff]  ;;  %v361_v6 = vld [vmem:[#allocation7 + $0x748] sm:$0xff] }
  0x5b   :  { %641 = vmatpush.msrb.mxu1 %v334_v45  ;;  %683 = vmatpush.msrb.mxu3 %v383_v11  ;;  %v336_v40 = vld [vmem:[#allocation7 + $0x680] sm:$0xff]  ;;  %v267_v11 = vld [vmem:[#allocation7 + $0x458] sm:$0xff] }
  0x5c   :  { %619 = vmatpush.msrb.mxu0 %v130_v48  ;;  %664 = vmatpush.msrb.mxu2 %v143_v10  ;;  %v132_v44 = vld [vmem:[#allocation7 + $0x20] sm:$0xff]  ;;  %v493_v48 = vld [vmem:[#allocation7 + $0xb68] sm:$0xff] }
  0x5d   :  { %642 = vmatpush.msrb.mxu1 %v322_v49  ;;  %620 = vmatmul.f32.vlgmr.msrb.gmra.mxu0 %v3578_v19  ;;  %v324_v45 = vld [vmem:[#allocation7 + $0x620] sm:$0xff]  ;;  %v229_v49 = vld [vmem:[#allocation7 + $0x328] sm:$0xff] }
  0x5e   :  { %696 = vmatpush.msra.mxu0 %v312_v50  ;;  %643 = vmatmul.f32.vlgmr.msrb.gmra.mxu1 %v3580_v23  ;;  %v481_v50 = vld [vmem:[#allocation7 + $0xb08] sm:$0xff] }
  0x5f   :  { %719 = vmatpush.msra.mxu1 %v504_v51  ;;  %665 = vmatpush.msrb.mxu2 %v131_v14  ;;  %v217_v51 = vld [vmem:[#allocation7 + $0x2c8] sm:$0xff]  ;;  %v507_v14 = vld [vmem:[#allocation7 + $0xbd8] sm:$0xff] }
  0x60   :  { %697 = vmatpush.msra.mxu0 %v300_v54  ;;  %684 = vmatpush.msrb.mxu3 %v371_v15  ;;  %v457_v54 = vld [vmem:[#allocation7 + $0xa48] sm:$0xff]  ;;  %v243_v15 = vld [vmem:[#allocation7 + $0x398] sm:$0xff] }
  0x61   :  { %720 = vmatpush.msra.mxu1 %v492_v55  ;;  %574 = vmatmul.f32.vlgmr.msra.gmra.mxu2 %v3578_v19  ;;  %v193_v55 = vld [vmem:[#allocation7 + $0x208] sm:$0xff] }
  0x62   :  { %698 = vmatpush.msra.mxu0 %v288_v58  ;;  %742 = vmatpush.msra.mxu2 %v313_v21  ;;  %v433_v58 = vld [vmem:[#allocation7 + $0x988] sm:$0xff]  ;;  %v471_v21 = vld [vmem:[#allocation7 + $0xab8] sm:$0xff] }
  0x63   :  { %721 = vmatpush.msra.mxu1 %v480_v59  ;;  %685 = vmatpush.msrb.mxu3 %v359_v25  ;;  %v169_v59 = vld [vmem:[#allocation7 + $0x148] sm:$0xff]  ;;  %v195_v25 = vld [vmem:[#allocation7 + $0x218] sm:$0xff] }
  0x64   :  { %699 = vmatpush.msra.mxu0 %v276_v62  ;;  %743 = vmatpush.msra.mxu2 %v301_v26  ;;  %v409_v62 = vld [vmem:[#allocation7 + $0x8c8] sm:$0xff]  ;;  %v447_v26 = vld [vmem:[#allocation7 + $0x9f8] sm:$0xff] }
  0x65   :  { %722 = vmatpush.msra.mxu1 %v468_v63  ;;  %623 = vmatmul.f32.gmra.mxu0 %v3584_v42  ;;  %v145_v63 = vld [vmem:[#allocation7 + $0x88] sm:$0xff] }
  0x66   :  { %700 = vmatpush.msra.mxu0 %v264_v0  ;;  %646 = vmatmul.f32.gmra.mxu1 %v3586_v43  ;;  %v397_v0 = vld [vmem:[#allocation7 + $0x868] sm:$0xff] }
  0x67   :  { %723 = vmatpush.msra.mxu1 %v456_v1  ;;  %686 = vmatpush.msrb.mxu3 %v347_v29  ;;  %v133_v1 = vld [vmem:[#allocation7 + $0x28] sm:$0xff]  ;;  %v171_v29 = vld [vmem:[#allocation7 + $0x158] sm:$0xff] }
  0x68   :  { %701 = vmatpush.msra.mxu0 %v252_v4  ;;  %744 = vmatpush.msra.mxu2 %v289_v30  ;;  %v373_v4 = vld [vmem:[#allocation7 + $0x7a8] sm:$0xff]  ;;  %v423_v30 = vld [vmem:[#allocation7 + $0x938] sm:$0xff] }
  0x69   :  { %724 = vmatpush.msra.mxu1 %v444_v5  ;;  %687 = vmatpush.msrb.mxu3 %v335_v33  ;;  %v303_v5 = vld [vmem:[#allocation7 + $0x578] sm:$0xff]  ;;  %v337_v10 = vld [vmem:[#allocation7 + $0x688] sm:$0xff] }
  0x6a   :  { %702 = vmatpush.msra.mxu0 %v240_v8  ;;  %745 = vmatpush.msra.mxu2 %v277_v34  ;;  %v349_v8 = vld [vmem:[#allocation7 + $0x6e8] sm:$0xff]  ;;  %v147_v33 = vld [vmem:[#allocation7 + $0x98] sm:$0xff] }
  0x6b   :  { %725 = vmatpush.msra.mxu1 %v432_v9  ;;  %688 = vmatpush.msrb.mxu3 %v323_v37  ;;  %v279_v9 = vld [vmem:[#allocation7 + $0x4b8] sm:$0xff]  ;;  %v317_v37 = vld [vmem:[#allocation7 + $0x5e8] sm:$0xff] }
  0x6c   :  { %703 = vmatpush.msra.mxu0 %v228_v12  ;;  %746 = vmatpush.msra.mxu2 %v265_v38  ;;  %v325_v12 = vld [vmem:[#allocation7 + $0x628] sm:$0xff]  ;;  %v399_v34 = vld [vmem:[#allocation7 + $0x878] sm:$0xff] }
  0x6d   :  { %726 = vmatpush.msra.mxu1 %v420_v13  ;;  %597 = vmatmul.f32.vlgmr.msra.gmra.mxu3 %v3580_v23  ;;  %v255_v13 = vld [vmem:[#allocation7 + $0x3f8] sm:$0xff] }
  0x6e   :  { %704 = vmatpush.msra.mxu0 %v216_v16  ;;  %747 = vmatpush.msra.mxu2 %v253_v41  ;;  %v495_v16 = vld [vmem:[#allocation7 + $0xb78] sm:$0xff]  ;;  %v293_v41 = vld [vmem:[#allocation7 + $0x528] sm:$0xff] }
  0x6f   :  { %727 = vmatpush.msra.mxu1 %v408_v17  ;;  %765 = vmatpush.msra.mxu3 %v505_v46  ;;  %v231_v17 = vld [vmem:[#allocation7 + $0x338] sm:$0xff] }
  0x70   :  { %705 = vmatpush.msra.mxu0 %v204_v18  ;;  %748 = vmatpush.msra.mxu2 %v241_v47  ;;  %v483_v18 = vld [vmem:[#allocation7 + $0xb18] sm:$0xff]  ;;  %v269_v47 = vld [vmem:[#allocation7 + $0x468] sm:$0xff] }
  0x71   :  { %728 = vmatpush.msra.mxu1 %v396_v20  ;;  %766 = vmatpush.msra.mxu3 %v493_v48  ;;  %v219_v20 = vld [vmem:[#allocation7 + $0x2d8] sm:$0xff] }
  0x72   :  { %706 = vmatpush.msra.mxu0 %v192_v22  ;;  %577 = vmatmul.f32.gmra.mxu2 %v3584_v42  ;;  %v207_v22 = vld [vmem:[#allocation7 + $0x278] sm:$0xff] }
  0x73   :  { %729 = vmatpush.msra.mxu1 %v384_v24  ;;  %749 = vmatpush.msra.mxu2 %v229_v49  ;;  %v459_v24 = vld [vmem:[#allocation7 + $0xa58] sm:$0xff]  ;;  %v257_v49 = vld [vmem:[#allocation7 + $0x408] sm:$0xff] }
  0x74   :  { %707 = vmatpush.msra.mxu0 %v180_v27  ;;  %767 = vmatpush.msra.mxu3 %v481_v50  ;;  %v183_v27 = vld [vmem:[#allocation7 + $0x1b8] sm:$0xff]  ;;  %v509_v50 = vld [vmem:[#allocation7 + $0xbe8] sm:$0xff] }
  0x75   :  { %730 = vmatpush.msra.mxu1 %v372_v28  ;;  %750 = vmatpush.msra.mxu2 %v217_v51  ;;  %v435_v28 = vld [vmem:[#allocation7 + $0x998] sm:$0xff]  ;;  %v245_v51 = vld [vmem:[#allocation7 + $0x3a8] sm:$0xff] }
  0x76   :  { %708 = vmatpush.msra.mxu0 %v168_v31  ;;  %768 = vmatpush.msra.mxu3 %v469_v52  ;;  %v159_v31 = vld [vmem:[#allocation7 + $0xf8] sm:$0xff]  ;;  %v497_v52 = vld [vmem:[#allocation7 + $0xb88] sm:$0xff] }
  0x77   :  { %731 = vmatpush.msra.mxu1 %v360_v32  ;;  %751 = vmatpush.msra.mxu2 %v205_v53  ;;  %v411_v32 = vld [vmem:[#allocation7 + $0x8d8] sm:$0xff]  ;;  %v233_v53 = vld [vmem:[#allocation7 + $0x348] sm:$0xff] }
  0x78   :  { %709 = vmatpush.msra.mxu0 %v156_v35  ;;  %600 = vmatmul.f32.gmra.mxu3 %v3586_v43  ;;  %v135_v35 = vld [vmem:[#allocation7 + $0x38] sm:$0xff] }
  0x79   :  { %732 = vmatpush.msra.mxu1 %v348_v36  ;;  %769 = vmatpush.msra.mxu3 %v457_v54  ;;  %v387_v36 = vld [vmem:[#allocation7 + $0x818] sm:$0xff]  ;;  %v485_v54 = vld [vmem:[#allocation7 + $0xb28] sm:$0xff] }
  0x7a   :  { %710 = vmatpush.msra.mxu0 %v144_v39  ;;  %752 = vmatpush.msra.mxu2 %v193_v55  ;;  %v375_v38 = vld [vmem:[#allocation7 + $0x7b8] sm:$0xff]  ;;  %v305_v39 = vld [vmem:[#allocation7 + $0x588] sm:$0xff] }
  0x7b   :  { %733 = vmatpush.msra.mxu1 %v336_v40  ;;  %770 = vmatpush.msra.mxu3 %v445_v56  ;;  %v363_v40 = vld [vmem:[#allocation7 + $0x758] sm:$0xff]  ;;  %v221_v55 = vld [vmem:[#allocation7 + $0x2e8] sm:$0xff] }
  0x7c   :  { %711 = vmatpush.msra.mxu0 %v132_v44  ;;  %666 = vmatmul.f32.vlgmr.msrb.gmra.mxu2 %v3578_v19  ;;  %v351_v44 = vld [vmem:[#allocation7 + $0x6f8] sm:$0xff]  ;;  %v473_v56 = vld [vmem:[#allocation7 + $0xac8] sm:$0xff] }
  0x7d   :  { %734 = vmatpush.msra.mxu1 %v324_v45  ;;  %712 = vmatmul.f32.vlgmr.msra.gmra.mxu0 %v3578_v19  ;;  %v281_v45 = vld [vmem:[#allocation7 + $0x4c8] sm:$0xff]  ;;  %v339_v46 = vld [vmem:[#allocation7 + $0x698] sm:$0xff] }
  0x7e   :  { %735 = vmatmul.f32.vlgmr.msra.gmra.mxu1 %v3580_v23  ;;  %753 = vmatpush.msra.mxu2 %v181_v57  ;;  %v327_v48 = vld [vmem:[#allocation7 + $0x638] sm:$0xff]  ;;  %v209_v57 = vld [vmem:[#allocation7 + $0x288] sm:$0xff] }
  0x7f   :  { %771 = vmatpush.msra.mxu3 %v433_v58  ;;  %v461_v58 = vld [vmem:[#allocation7 + $0xa68] sm:$0xff] }
  0x80   :  { %754 = vmatpush.msra.mxu2 %v169_v59  ;;  %689 = vmatmul.f32.vlgmr.msrb.gmra.mxu3 %v3580_v23  ;;  %v197_v59 = vld [vmem:[#allocation7 + $0x228] sm:$0xff] }
  0x81   :  { %772 = vmatpush.msra.mxu3 %v421_v60  ;;  %v449_v60 = vld [vmem:[#allocation7 + $0xa08] sm:$0xff] }
  0x82   :  { %755 = vmatpush.msra.mxu2 %v157_v61  ;;  %v185_v61 = vld [vmem:[#allocation7 + $0x1c8] sm:$0xff] }
  0x83   :  { %773 = vmatpush.msra.mxu3 %v409_v62  ;;  %v437_v62 = vld [vmem:[#allocation7 + $0x9a8] sm:$0xff] }
  0x84   :  { %756 = vmatpush.msra.mxu2 %v145_v63  ;;  %v173_v63 = vld [vmem:[#allocation7 + $0x168] sm:$0xff] }
  0x85   :  { %715 = vmatmul.f32.gmra.mxu0 %v3584_v42  ;;  %774 = vmatpush.msra.mxu3 %v397_v0  ;;  %v425_v0 = vld [vmem:[#allocation7 + $0x948] sm:$0xff] }
  0x86   :  { %738 = vmatmul.f32.gmra.mxu1 %v3586_v43  ;;  %669 = vmatmul.f32.gmra.mxu2 %v3584_v42 }
  0x87   :  { %757 = vmatpush.msra.mxu2 %v133_v1  ;;  %775 = vmatpush.msra.mxu3 %v385_v2  ;;  %v161_v1 = vld [vmem:[#allocation7 + $0x108] sm:$0xff] }
  0x88   :  { %692 = vmatmul.f32.gmra.mxu3 %v3586_v43  ;;  %v413_v2 = vld [vmem:[#allocation7 + $0x8e8] sm:$0xff] }
  0x89   :  { %834 = vmatpush.msrb.mxu2 %v315_v3  ;;  %776 = vmatpush.msra.mxu3 %v373_v4  ;;  %v149_v3 = vld [vmem:[#allocation7 + $0xa8] sm:$0xff] }
  0x8a   :  { %v401_v4 = vld [vmem:[#allocation7 + $0x888] sm:$0xff] }
  0x8b   :  { %835 = vmatpush.msrb.mxu2 %v303_v5  ;;  %777 = vmatpush.msra.mxu3 %v361_v6  ;;  %v137_v5 = vld [vmem:[#allocation7 + $0x48] sm:$0xff] }
  0x8c   :  { %v389_v6 = vld [vmem:[#allocation7 + $0x828] sm:$0xff] }
  0x8d   :  { %836 = vmatpush.msrb.mxu2 %v291_v7  ;;  %778 = vmatpush.msra.mxu3 %v349_v8  ;;  %v319_v7 = vld [vmem:[#allocation7 + $0x5f8] sm:$0xff]  ;;  %v377_v8 = vld [vmem:[#allocation7 + $0x7c8] sm:$0xff] }
  0x8e   :  { %758 = vmatmul.f32.vlgmr.msra.gmra.mxu2 %v3578_v19 }
  0x8f   :  { %837 = vmatpush.msrb.mxu2 %v279_v9  ;;  %779 = vmatpush.msra.mxu3 %v337_v10  ;;  %v307_v9 = vld [vmem:[#allocation7 + $0x598] sm:$0xff]  ;;  %v365_v10 = vld [vmem:[#allocation7 + $0x768] sm:$0xff] }
  0x91   :  { %838 = vmatpush.msrb.mxu2 %v267_v11  ;;  %780 = vmatpush.msra.mxu3 %v325_v12  ;;  %v295_v11 = vld [vmem:[#allocation7 + $0x538] sm:$0xff]  ;;  %v353_v12 = vld [vmem:[#allocation7 + $0x708] sm:$0xff] }
  0x92   :  { %781 = vmatmul.f32.vlgmr.msra.gmra.mxu3 %v3580_v23 }
  0x93   :  { %839 = vmatpush.msrb.mxu2 %v255_v13  ;;  %857 = vmatpush.msrb.mxu3 %v507_v14  ;;  %v283_v13 = vld [vmem:[#allocation7 + $0x4d8] sm:$0xff] }
  0x95   :  { %840 = vmatpush.msrb.mxu2 %v243_v15  ;;  %858 = vmatpush.msrb.mxu3 %v495_v16  ;;  %v341_v16 = vld [vmem:[#allocation7 + $0x6a8] sm:$0xff] }
  0x96   :  { %761 = vmatmul.f32.gmra.mxu2 %v3584_v42 }
  0x97   :  { %841 = vmatpush.msrb.mxu2 %v231_v17  ;;  %859 = vmatpush.msrb.mxu3 %v483_v18  ;;  %v271_v17 = vld [vmem:[#allocation7 + $0x478] sm:$0xff]  ;;  %v329_v18 = vld [vmem:[#allocation7 + $0x648] sm:$0xff] }
  0x99   :  { %842 = vmatpush.msrb.mxu2 %v219_v20  ;;  %860 = vmatpush.msrb.mxu3 %v471_v21  ;;  %v259_v20 = vld [vmem:[#allocation7 + $0x418] sm:$0xff] }
  0x9a   :  { %784 = vmatmul.f32.gmra.mxu3 %v3586_v43  ;;  %v511_v21 = vld [vmem:[#allocation7 + $0xbf8] sm:$0xff] }
  0x9b   :  { %843 = vmatpush.msrb.mxu2 %v207_v22  ;;  %861 = vmatpush.msrb.mxu3 %v459_v24  ;;  %v247_v22 = vld [vmem:[#allocation7 + $0x3b8] sm:$0xff] }
  0x9c   :  { %v499_v24 = vld [vmem:[#allocation7 + $0xb98] sm:$0xff] }
  0x9d   :  { %844 = vmatpush.msrb.mxu2 %v195_v25  ;;  %862 = vmatpush.msrb.mxu3 %v447_v26  ;;  %v235_v25 = vld [vmem:[#allocation7 + $0x358] sm:$0xff] }
  0x9e   :  { %v487_v26 = vld [vmem:[#allocation7 + $0xb38] sm:$0xff] }
  0x9f   :  { %845 = vmatpush.msrb.mxu2 %v183_v27  ;;  %863 = vmatpush.msrb.mxu3 %v435_v28  ;;  %v223_v27 = vld [vmem:[#allocation7 + $0x2f8] sm:$0xff] }
  0xa1   :  { %846 = vmatpush.msrb.mxu2 %v171_v29  ;;  %864 = vmatpush.msrb.mxu3 %v423_v30  ;;  %v475_v29 = vld [vmem:[#allocation7 + $0xad8] sm:$0xff] }
  0xa3   :  { %847 = vmatpush.msrb.mxu2 %v159_v31  ;;  %865 = vmatpush.msrb.mxu3 %v411_v32  ;;  %v211_v31 = vld [vmem:[#allocation7 + $0x298] sm:$0xff] }
  0xa4   :  { %v463_v32 = vld [vmem:[#allocation7 + $0xa78] sm:$0xff] }
  0xa5   :  { %848 = vmatpush.msrb.mxu2 %v147_v33  ;;  %866 = vmatpush.msrb.mxu3 %v399_v34  ;;  %v199_v33 = vld [vmem:[#allocation7 + $0x238] sm:$0xff] }
  0xa6   :  { %v451_v34 = vld [vmem:[#allocation7 + $0xa18] sm:$0xff] }
  0xa7   :  { %849 = vmatpush.msrb.mxu2 %v135_v35  ;;  %867 = vmatpush.msrb.mxu3 %v387_v36  ;;  %v187_v35 = vld [vmem:[#allocation7 + $0x1d8] sm:$0xff] }
  0xa8   :  { %850 = vmatmul.f32.vlgmr.msrb.gmra.mxu2 %v3578_v19  ;;  %v439_v36 = vld [vmem:[#allocation7 + $0x9b8] sm:$0xff] }
  0xa9   :  { %926 = vmatpush.msra.mxu2 %v317_v37  ;;  %868 = vmatpush.msrb.mxu3 %v375_v38  ;;  %v175_v37 = vld [vmem:[#allocation7 + $0x178] sm:$0xff] }
  0xaa   :  { %v427_v38 = vld [vmem:[#allocation7 + $0x958] sm:$0xff] }
  0xab   :  { %927 = vmatpush.msra.mxu2 %v305_v39  ;;  %869 = vmatpush.msrb.mxu3 %v363_v40  ;;  %v163_v40 = vld [vmem:[#allocation7 + $0x118] sm:$0xff] }
  0xad   :  { %928 = vmatpush.msra.mxu2 %v293_v41  ;;  %870 = vmatpush.msrb.mxu3 %v351_v44  ;;  %v415_v41 = vld [vmem:[#allocation7 + $0x8f8] sm:$0xff] }
  0xaf   :  { %929 = vmatpush.msra.mxu2 %v281_v45  ;;  %871 = vmatpush.msrb.mxu3 %v339_v46  ;;  %v151_v45 = vld [vmem:[#allocation7 + $0xb8] sm:$0xff] }
  0xb0   :  { %853 = vmatmul.f32.gmra.mxu2 %v3584_v42  ;;  %v403_v46 = vld [vmem:[#allocation7 + $0x898] sm:$0xff] }
  0xb1   :  { %930 = vmatpush.msra.mxu2 %v269_v47  ;;  %872 = vmatpush.msrb.mxu3 %v327_v48  ;;  %v139_v47 = vld [vmem:[#allocation7 + $0x58] sm:$0xff]  ;;  %v314_v48 = vld [vmem:[#allocation7 + $0x5d0] sm:$0xff] }
  0xb2   :  { %873 = vmatmul.f32.vlgmr.msrb.gmra.mxu3 %v3580_v23  ;;  %788 = vmatpush.msrb.mxu0 %v314_v48  ;;  %v268_v48 = vld [vmem:[#allocation7 + $0x460] sm:$0xff] }
  0xb3   :  { %931 = vmatpush.msra.mxu2 %v257_v49  ;;  %949 = vmatpush.msra.mxu3 %v509_v50  ;;  %v506_v49 = vld [vmem:[#allocation7 + $0xbd0] sm:$0xff] }
  0xb4   :  { %v302_v50 = vld [vmem:[#allocation7 + $0x570] sm:$0xff]  ;;  %811 = vmatpush.msrb.mxu1 %v506_v49  ;;  %v460_v49 = vld [vmem:[#allocation7 + $0xa60] sm:$0xff] }
  0xb5   :  { %932 = vmatpush.msra.mxu2 %v245_v51  ;;  %950 = vmatpush.msra.mxu3 %v497_v52  ;;  %v391_v51 = vld [vmem:[#allocation7 + $0x838] sm:$0xff] }
  0xb6   :  { %v379_v52 = vld [vmem:[#allocation7 + $0x7d8] sm:$0xff]  ;;  %789 = vmatpush.msrb.mxu0 %v302_v50 }
  0xb7   :  { %933 = vmatpush.msra.mxu2 %v233_v53  ;;  %951 = vmatpush.msra.mxu3 %v485_v54  ;;  %v494_v53 = vld [vmem:[#allocation7 + $0xb70] sm:$0xff] }
  0xb8   :  { %v290_v54 = vld [vmem:[#allocation7 + $0x510] sm:$0xff]  ;;  %812 = vmatpush.msrb.mxu1 %v494_v53 }
  0xb9   :  { %934 = vmatpush.msra.mxu2 %v221_v55  ;;  %952 = vmatpush.msra.mxu3 %v473_v56  ;;  %v482_v55 = vld [vmem:[#allocation7 + $0xb10] sm:$0xff]  ;;  %v367_v56 = vld [vmem:[#allocation7 + $0x778] sm:$0xff] }
  0xba   :  { %876 = vmatmul.f32.gmra.mxu3 %v3586_v43  ;;  %790 = vmatpush.msrb.mxu0 %v290_v54  ;;  %v244_v54 = vld [vmem:[#allocation7 + $0x3a0] sm:$0xff] }
  0xbb   :  { %935 = vmatpush.msra.mxu2 %v209_v57  ;;  %953 = vmatpush.msra.mxu3 %v461_v58  ;;  %v278_v57 = vld [vmem:[#allocation7 + $0x4b0] sm:$0xff] }
  0xbc   :  { %813 = vmatpush.msrb.mxu1 %v482_v55  ;;  %791 = vmatpush.msrb.mxu0 %v278_v57  ;;  %v436_v55 = vld [vmem:[#allocation7 + $0x9a0] sm:$0xff]  ;;  %v3667_v57 = vld [vmem:[#allocation2 + $0x18] sm:$0xff] }
  0xbd   :  { %936 = vmatpush.msra.mxu2 %v197_v59  ;;  %954 = vmatpush.msra.mxu3 %v449_v60  ;;  %v470_v59 = vld [vmem:[#allocation7 + $0xab0] sm:$0xff] }
  0xbe   :  { %v3615_v14 = vpop.f32.mrf.mxu0  ;;  %v266_v60 = vld [vmem:[#allocation7 + $0x450] sm:$0xff]  ;;  %814 = vmatpush.msrb.mxu1 %v470_v59  ;;  %v232_v59 = vld [vmem:[#allocation7 + $0x340] sm:$0xff] }
  0xbf   :  { %937 = vmatpush.msra.mxu2 %v185_v61  ;;  %955 = vmatpush.msra.mxu3 %v437_v62  ;;  %v355_v62 = vld [vmem:[#allocation7 + $0x718] sm:$0xff] }
  0xc0   :  { %792 = vmatpush.msrb.mxu0 %v266_v60  ;;  %v424_v60 = vld [vmem:[#allocation7 + $0x940] sm:$0xff] }
  0xc1   :  { %938 = vmatpush.msra.mxu2 %v173_v63  ;;  %956 = vmatpush.msra.mxu3 %v425_v0  ;;  %v458_v63 = vld [vmem:[#allocation7 + $0xa50] sm:$0xff]  ;;  %v343_v0 = vld [vmem:[#allocation7 + $0x6b8] sm:$0xff] }
  0xc2   :  { %815 = vmatpush.msrb.mxu1 %v458_v63  ;;  %v412_v63 = vld [vmem:[#allocation7 + $0x8e0] sm:$0xff] }
  0xc3   :  { %939 = vmatpush.msra.mxu2 %v161_v1  ;;  %957 = vmatpush.msra.mxu3 %v413_v2  ;;  %v3617_v15 = vpop.f32.mrf.mxu1  ;;  %v446_v1 = vld [vmem:[#allocation7 + $0x9f0] sm:$0xff] }
  0xc4   :  { %v242_v2 = vld [vmem:[#allocation7 + $0x390] sm:$0xff]  ;;  %816 = vmatpush.msrb.mxu1 %v446_v1 }
  0xc5   :  { %940 = vmatpush.msra.mxu2 %v149_v3  ;;  %958 = vmatpush.msra.mxu3 %v401_v4  ;;  %v331_v3 = vld [vmem:[#allocation7 + $0x658] sm:$0xff]  ;;  %v434_v4 = vld [vmem:[#allocation7 + $0x990] sm:$0xff] }
  0xc6   :  { %817 = vmatpush.msrb.mxu1 %v434_v4 }
  0xc7   :  { %941 = vmatpush.msra.mxu2 %v137_v5  ;;  %959 = vmatpush.msra.mxu3 %v389_v6  ;;  %v230_v5 = vld [vmem:[#allocation7 + $0x330] sm:$0xff] }
  0xc8   :  { %942 = vmatmul.f32.vlgmr.msra.gmra.mxu2 %v3578_v19  ;;  %v422_v6 = vld [vmem:[#allocation7 + $0x930] sm:$0xff] }
  0xc9   :  { %1018 = vmatpush.msrb.mxu2 %v319_v7  ;;  %960 = vmatpush.msra.mxu3 %v377_v8  ;;  %v218_v7 = vld [vmem:[#allocation7 + $0x2d0] sm:$0xff] }
  0xca   :  { %818 = vmatpush.msrb.mxu1 %v422_v6  ;;  %v376_v6 = vld [vmem:[#allocation7 + $0x7c0] sm:$0xff] }
  0xcb   :  { %1019 = vmatpush.msrb.mxu2 %v307_v9  ;;  %961 = vmatpush.msra.mxu3 %v365_v10  ;;  %v3623_v30 = vpop.f32.mrf.mxu1  ;;  %v410_v9 = vld [vmem:[#allocation7 + $0x8d0] sm:$0xff]  ;;  %v553_v10 = vadd.f32 %v3617_v15, %v3615_v14 }
  0xcc   :  { %v3621_v28 = vpop.f32.mrf.mxu0  ;;  %819 = vmatpush.msrb.mxu1 %v410_v9  ;;  %v182_v14 = vld [vmem:[#allocation7 + $0x1b0] sm:$0xff]  ;;  %v160_v9 = vld [vmem:[#allocation7 + $0x100] sm:$0xff] }
  0xcd   :  { %1020 = vmatpush.msrb.mxu2 %v295_v11  ;;  %962 = vmatpush.msra.mxu3 %v353_v12  ;;  %v206_v12 = vld [vmem:[#allocation7 + $0x270] sm:$0xff] }
  0xce   :  { %v374_v15 = vld [vmem:[#allocation7 + $0x7b0] sm:$0xff] }
  0xcf   :  { %1021 = vmatpush.msrb.mxu2 %v283_v13  ;;  %963 = vmatpush.msra.mxu3 %v341_v16  ;;  %v398_v13 = vld [vmem:[#allocation7 + $0x870] sm:$0xff] }
  0xd0   :  { %945 = vmatmul.f32.gmra.mxu2 %v3584_v42  ;;  %820 = vmatpush.msrb.mxu1 %v398_v13  ;;  %v194_v16 = vld [vmem:[#allocation7 + $0x210] sm:$0xff]  ;;  %v136_v13 = vld [vmem:[#allocation7 + $0x40] sm:$0xff] }
  0xd1   :  { %1022 = vmatpush.msrb.mxu2 %v271_v17  ;;  %964 = vmatpush.msra.mxu3 %v329_v18  ;;  %v386_v17 = vld [vmem:[#allocation7 + $0x810] sm:$0xff] }
  0xd2   :  { %965 = vmatmul.f32.vlgmr.msra.gmra.mxu3 %v3580_v23  ;;  %821 = vmatpush.msrb.mxu1 %v386_v17  ;;  %v510_v17 = vld [vmem:[#allocation7 + $0xbf0] sm:$0xff] }
  0xd3   :  { %1023 = vmatpush.msrb.mxu2 %v259_v20  ;;  %1041 = vmatpush.msrb.mxu3 %v511_v21  ;;  %v556_v21 = vadd.f32 %v3623_v30, %v3621_v28  ;;  %v134_v28 = vld [vmem:[#allocation7 + $0x30] sm:$0xff] }
  0xd4   :  { %822 = vmatpush.msrb.mxu1 %v374_v15  ;;  %v326_v30 = vld [vmem:[#allocation7 + $0x630] sm:$0xff] }
  0xd5   :  { %1024 = vmatpush.msrb.mxu2 %v247_v22  ;;  %1042 = vmatpush.msrb.mxu3 %v499_v24  ;;  %v170_v24 = vld [vmem:[#allocation7 + $0x150] sm:$0xff] }
  0xd6   :  { %v306_v15 = vld [vmem:[#allocation7 + $0x590] sm:$0xff] }
  0xd7   :  { %1025 = vmatpush.msrb.mxu2 %v235_v25  ;;  %1043 = vmatpush.msrb.mxu3 %v487_v26  ;;  %v362_v25 = vld [vmem:[#allocation7 + $0x750] sm:$0xff] }
  0xd8   :  { %v350_v26 = vld [vmem:[#allocation7 + $0x6f0] sm:$0xff]  ;;  %823 = vmatpush.msrb.mxu1 %v362_v25 }
  0xd9   :  { %1026 = vmatpush.msrb.mxu2 %v223_v27  ;;  %1044 = vmatpush.msrb.mxu3 %v475_v29  ;;  %v1068_v27 = vmul.f32 0.125, %v556_v21  ;;  %v146_v29 = vld [vmem:[#allocation7 + $0x90] sm:$0xff] }
  0xda   :  { %968 = vmatmul.f32.gmra.mxu3 %v3586_v43  ;;  %v3626_v39 = vpop.f32.mrf.mxu0  ;;  %824 = vmatpush.msrb.mxu1 %v350_v26  ;;  %v486_v21 = vld [vmem:[#allocation7 + $0xb30] sm:$0xff] }
  0xdb   :  { %1027 = vmatpush.msrb.mxu2 %v211_v31  ;;  %1045 = vmatpush.msrb.mxu3 %v463_v32  ;;  %v3628_v44 = vpop.f32.mrf.mxu1  ;;  %v338_v31 = vld [vmem:[#allocation7 + $0x690] sm:$0xff] }
  0xdc   :  { %825 = vmatpush.msrb.mxu1 %v338_v31  ;;  %v270_v25 = vld [vmem:[#allocation7 + $0x470] sm:$0xff] }
  0xdd   :  { %1028 = vmatpush.msrb.mxu2 %v199_v33  ;;  %1046 = vmatpush.msrb.mxu3 %v451_v34  ;;  %v316_v33 = vld [vmem:[#allocation7 + $0x5e0] sm:$0xff] }
  0xde   :  { %v508_v34 = vld [vmem:[#allocation7 + $0xbe0] sm:$0xff]  ;;  %826 = vmatpush.msrb.mxu1 %v326_v30  ;;  %v438_v30 = vld [vmem:[#allocation7 + $0x9b0] sm:$0xff] }
  0xdf   :  { %1029 = vmatpush.msrb.mxu2 %v187_v35  ;;  %1047 = vmatpush.msrb.mxu3 %v439_v36  ;;  %v304_v36 = vld [vmem:[#allocation7 + $0x580] sm:$0xff] }
  0xe0   :  { %903 = vmatpush.msra.mxu1 %v508_v34  ;;  %v426_v34 = vld [vmem:[#allocation7 + $0x950] sm:$0xff] }
  0xe1   :  { %1030 = vmatpush.msrb.mxu2 %v175_v37  ;;  %1048 = vmatpush.msrb.mxu3 %v427_v38  ;;  %v496_v37 = vld [vmem:[#allocation7 + $0xb80] sm:$0xff] }
  0xe2   :  { %v3631_v58 = vpop.f32.mrf.mxu0  ;;  %v292_v38 = vld [vmem:[#allocation7 + $0x520] sm:$0xff]  ;;  %904 = vmatpush.msra.mxu1 %v496_v37  ;;  %v414_v37 = vld [vmem:[#allocation7 + $0x8f0] sm:$0xff] }
  0xe3   :  { %1031 = vmatpush.msrb.mxu2 %v163_v40  ;;  %1049 = vmatpush.msrb.mxu3 %v415_v41  ;;  %v3633_v61 = vpop.f32.mrf.mxu1  ;;  %v484_v40 = vld [vmem:[#allocation7 + $0xb20] sm:$0xff] }
  0xe4   :  { %v3649_v32 = vpop.f32.mrf.mxu2  ;;  %v3654_v41 = vld [vmem:[#allocation2] sm:$0xff]  ;;  %905 = vmatpush.msra.mxu1 %v484_v40  ;;  %v402_v40 = vld [vmem:[#allocation7 + $0x890] sm:$0xff] }
  0xe5   :  { %1032 = vmatpush.msrb.mxu2 %v151_v45  ;;  %1050 = vmatpush.msrb.mxu3 %v403_v46  ;;  %v3657_v45 = vld [vmem:[#allocation2 + $0x8] sm:$0xff] }
  0xe6   :  { %827 = vmatmul.f32.vlgmr.msrb.gmra.mxu1 %v3657_v45  ;;  %v280_v46 = vld [vmem:[#allocation7 + $0x4c0] sm:$0xff] }
  0xe7   :  { %1033 = vmatpush.msrb.mxu2 %v139_v47  ;;  %1051 = vmatpush.msrb.mxu3 %v391_v51  ;;  %v472_v47 = vld [vmem:[#allocation7 + $0xac0] sm:$0xff] }
  0xe8   :  { %1034 = vmatmul.f32.vlgmr.msrb.gmra.mxu2 %v3578_v19  ;;  %v254_v19 = vld [vmem:[#allocation7 + $0x3f0] sm:$0xff]  ;;  %906 = vmatpush.msra.mxu1 %v472_v47  ;;  %v256_v51 = vld [vmem:[#allocation7 + $0x400] sm:$0xff] }
  0xe9   :  { %1052 = vmatpush.msrb.mxu3 %v379_v52  ;;  %793 = vmatpush.msrb.mxu0 %v254_v19  ;;  %v448_v52 = vld [vmem:[#allocation7 + $0xa00] sm:$0xff]  ;;  %v198_v47 = vld [vmem:[#allocation7 + $0x230] sm:$0xff] }
  0xea   :  { %907 = vmatpush.msra.mxu1 %v460_v49  ;;  %v208_v19 = vld [vmem:[#allocation7 + $0x280] sm:$0xff] }
  0xeb   :  { %1053 = vmatpush.msrb.mxu3 %v367_v56  ;;  %794 = vmatpush.msrb.mxu0 %v242_v2  ;;  %v3664_v56 = vld [vmem:[#allocation2 + $0x10] sm:$0xff]  ;;  %v196_v2 = vld [vmem:[#allocation7 + $0x220] sm:$0xff] }
  0xec   :  { %908 = vmatpush.msra.mxu1 %v448_v52  ;;  %v378_v52 = vld [vmem:[#allocation7 + $0x7d0] sm:$0xff] }
  0xed   :  { %1054 = vmatpush.msrb.mxu3 %v355_v62  ;;  %795 = vmatpush.msrb.mxu0 %v230_v5  ;;  %v220_v62 = vld [vmem:[#allocation7 + $0x2e0] sm:$0xff] }
  0xee   :  { %830 = vmatmul.f32.gmra.mxu1 %v3667_v57  ;;  %v184_v5 = vld [vmem:[#allocation7 + $0x1c0] sm:$0xff] }
  0xef   :  { %1055 = vmatpush.msrb.mxu3 %v343_v0  ;;  %796 = vmatpush.msrb.mxu0 %v218_v7  ;;  %v400_v0 = vld [vmem:[#allocation7 + $0x880] sm:$0xff] }
  0xf0   :  { %1037 = vmatmul.f32.gmra.mxu2 %v3584_v42  ;;  %v3652_v35 = vpop.f32.mrf.mxu3  ;;  %909 = vmatpush.msra.mxu1 %v436_v55  ;;  %v172_v7 = vld [vmem:[#allocation7 + $0x160] sm:$0xff]  ;;  %v366_v55 = vld [vmem:[#allocation7 + $0x770] sm:$0xff] }
  0xf1   :  { %1056 = vmatpush.msrb.mxu3 %v331_v3  ;;  %797 = vmatpush.msrb.mxu0 %v206_v12  ;;  %v388_v3 = vld [vmem:[#allocation7 + $0x820] sm:$0xff] }
  0xf2   :  { %1057 = vmatmul.f32.vlgmr.msrb.gmra.mxu3 %v3580_v23  ;;  %v1064_v23 = vmul.f32 0.125, %v553_v10  ;;  %910 = vmatpush.msra.mxu1 %v424_v60  ;;  %v352_v10 = vld [vmem:[#allocation7 + $0x700] sm:$0xff]  ;;  %v354_v60 = vld [vmem:[#allocation7 + $0x710] sm:$0xff] }
  0xf3   :  { %798 = vmatpush.msrb.mxu0 %v194_v16  ;;  %v318_v16 = vld [vmem:[#allocation7 + $0x5f0] sm:$0xff] }
  0xf4   :  { %911 = vmatpush.msra.mxu1 %v412_v63  ;;  %v342_v63 = vld [vmem:[#allocation7 + $0x6b0] sm:$0xff] }
  0xf5   :  { %799 = vmatpush.msrb.mxu0 %v182_v14  ;;  %v3660_v50 = vpop.f32.mrf.mxu2 }
  0xf6   :  { %912 = vmatpush.msra.mxu1 %v400_v0  ;;  %v138_v0 = vld [vmem:[#allocation7 + $0x50] sm:$0xff] }
  0xf7   :  { %800 = vmatpush.msrb.mxu0 %v170_v24  ;;  %v474_v24 = vld [vmem:[#allocation7 + $0xad0] sm:$0xff] }
  0xf8   :  { %913 = vmatpush.msra.mxu1 %v388_v3 }
  0xfa   :  { %v713_v8 = vpop.f32.mrf.mxu0  ;;  %1060 = vmatmul.f32.gmra.mxu3 %v3586_v43  ;;  %v158_v43 = vld [vmem:[#allocation7 + $0xf0] sm:$0xff]  ;;  %914 = vmatpush.msra.mxu1 %v376_v6 }
  0xfb   :  { %v736_v11 = vpop.f32.mrf.mxu1  ;;  %801 = vmatpush.msrb.mxu0 %v158_v43  ;;  %v3662_v53 = vpop.f32.mrf.mxu3  ;;  %v462_v43 = vld [vmem:[#allocation7 + $0xa70] sm:$0xff] }
  0xfc   :  { %v737_v42 = vadd.f32 %v736_v11, %v713_v8  ;;  %v364_v8 = vld [vmem:[#allocation7 + $0x760] sm:$0xff] }
  0xfd   :  { %802 = vmatpush.msrb.mxu0 %v146_v29  ;;  %915 = vmatpush.msra.mxu1 %v364_v8  ;;  %v148_v11 = vld [vmem:[#allocation7 + $0xa0] sm:$0xff]  ;;  %v450_v29 = vld [vmem:[#allocation7 + $0xa10] sm:$0xff] }
  0xfe   :  { %1222 = vrot.lane.b32.xlu0 %v737_v42, %s3509_s4  ;;  %3141 = vmatpush.xpose.msk.msra.mxu2 %vm1072_vm0, %v737_v42  ;;  %v340_v42 = vld [vmem:[#allocation7 + $0x6a0] sm:$0xff] }
  0xff   :  { %803 = vmatpush.msrb.mxu0 %v134_v28  ;;  %v3670_v1 = vpop.f32.mrf.mxu2  ;;  %916 = vmatpush.msra.mxu1 %v352_v10  ;;  %v246_v28 = vld [vmem:[#allocation7 + $0x3b0] sm:$0xff] }
 0x100   :  { %804 = vmatmul.f32.vlgmr.msrb.gmra.mxu0 %v3654_v41 }
 0x101   :  { %3142 = vmatmul.msk.f32.vlgmr.msra.gmra.mxu2 %vm1072_vm0, %v1064_v23  ;;  %880 = vmatpush.msra.mxu0 %v316_v33  ;;  %v234_v33 = vld [vmem:[#allocation7 + $0x350] sm:$0xff] }
 0x102   :  { %v716_v18 = vpop.f32.mrf.mxu0  ;;  %917 = vmatpush.msra.mxu1 %v340_v42 }
 0x103   :  { %v739_v20 = vpop.f32.mrf.mxu1  ;;  %881 = vmatpush.msra.mxu0 %v304_v36  ;;  %v3672_v4 = vpop.f32.mrf.mxu3  ;;  %v222_v36 = vld [vmem:[#allocation7 + $0x2f0] sm:$0xff] }
 0x104   :  { %v740_v22 = vadd.f32 %v739_v20, %v716_v18  ;;  %v498_v18 = vld [vmem:[#allocation7 + $0xb90] sm:$0xff] }
 0x105   :  { %882 = vmatpush.msra.mxu0 %v292_v38  ;;  %v294_v20 = vld [vmem:[#allocation7 + $0x530] sm:$0xff] }
 0x106   :  { %1220 = vrot.lane.b32.xlu0 %v1064_v23, %s3509_s4  ;;  %1250 = vrot.lane.b32.xlu1 %v740_v22, %s3509_s4  ;;  %v328_v23 = vld [vmem:[#allocation7 + $0x640] sm:$0xff]  ;;  %v210_v38 = vld [vmem:[#allocation7 + $0x290] sm:$0xff] }
 0x107   :  { %3143 = vmatpush.xpose.msk.msra.mxu3 %vm1072_vm0, %v740_v22  ;;  %883 = vmatpush.msra.mxu0 %v280_v46  ;;  %v282_v22 = vld [vmem:[#allocation7 + $0x4d0] sm:$0xff] }
 0x108   :  { %807 = vmatmul.f32.gmra.mxu0 %v3664_v56  ;;  %918 = vmatpush.msra.mxu1 %v328_v23  ;;  %v1368_v23 = vld [vmem:[#allocation8 + $0xe0] sm:$0xff] }
 0x109   :  { %884 = vmatpush.msra.mxu0 %v268_v48  ;;  %v3674_v12 = vpop.f32.mrf.mxu2  ;;  %919 = vmatmul.f32.vlgmr.msra.gmra.mxu1 %v3657_v45  ;;  %v390_v48 = vld [vmem:[#allocation7 + $0x830] sm:$0xff] }
 0x10a   :  { %3144 = vmatmul.msk.f32.vlgmr.msra.gmra.mxu3 %vm1072_vm0, %v1068_v27  ;;  %995 = vmatpush.msrb.mxu1 %v510_v17  ;;  %v1364_v17 = vld [vmem:[#allocation8 + $0xc0] sm:$0xff] }
 0x10b   :  { %885 = vmatpush.msra.mxu0 %v256_v51  ;;  %v3676_v14 = vpop.f32.mrf.mxu3  ;;  %v186_v51 = vld [vmem:[#allocation7 + $0x1d0] sm:$0xff] }
 0x10c   :  { %996 = vmatpush.msrb.mxu1 %v498_v18 }
 0x10d   :  { %886 = vmatpush.msra.mxu0 %v244_v54  ;;  %v174_v54 = vld [vmem:[#allocation7 + $0x170] sm:$0xff] }
 0x10e   :  { %1248 = vrot.lane.b32.xlu1 %v1068_v27, %s3509_s4  ;;  %997 = vmatpush.msrb.mxu1 %v486_v21  ;;  %v258_v27 = vld [vmem:[#allocation7 + $0x410] sm:$0xff]  ;;  %v1360_v21 = vld [vmem:[#allocation8 + $0xa0] sm:$0xff] }
 0x10f   :  { %887 = vmatpush.msra.mxu0 %v232_v59  ;;  %v162_v59 = vld [vmem:[#allocation7 + $0x110] sm:$0xff] }
 0x110   :  { %998 = vmatpush.msrb.mxu1 %v474_v24 }
 0x111   :  { %888 = vmatpush.msra.mxu0 %v220_v62  ;;  %v3680_v26 = vpop.f32.mrf.mxu2  ;;  %922 = vmatmul.f32.gmra.mxu1 %v3667_v57  ;;  %v150_v62 = vld [vmem:[#allocation7 + $0xb0] sm:$0xff] }
 0x112   :  { %999 = vmatpush.msrb.mxu1 %v462_v43 }
 0x113   :  { %889 = vmatpush.msra.mxu0 %v208_v19 }
 0x114   :  { %1000 = vmatpush.msrb.mxu1 %v450_v29  ;;  %v1367_v29 = vld [vmem:[#allocation8 + $0xd8] sm:$0xff] }
 0x115   :  { %890 = vmatpush.msra.mxu0 %v196_v2  ;;  %v3682_v31 = vpop.f32.mrf.mxu3  ;;  %v330_v2 = vld [vmem:[#allocation7 + $0x650] sm:$0xff] }
 0x116   :  { %1001 = vmatpush.msrb.mxu1 %v438_v30  ;;  %v3711_v30 = vadd.f32 %v3682_v31, %v3680_v26  ;;  %v1361_v26 = vld [vmem:[#allocation8 + $0xa8] sm:$0xff] }
 0x117   :  { %891 = vmatpush.msra.mxu0 %v184_v5 }
 0x118   :  { %1002 = vmatpush.msrb.mxu1 %v426_v34  ;;  %v1356_v34 = vld [vmem:[#allocation8 + $0x80] sm:$0xff] }
 0x119   :  { %892 = vmatpush.msra.mxu0 %v172_v7  ;;  %v3686_v46 = vpop.f32.mrf.mxu2 }
 0x11a   :  { %1003 = vmatpush.msrb.mxu1 %v414_v37 }
 0x11b   :  { %893 = vmatpush.msra.mxu0 %v160_v9 }
 0x11c   :  { %1004 = vmatpush.msrb.mxu1 %v402_v40  ;;  %v1363_v40 = vld [vmem:[#allocation8 + $0xb8] sm:$0xff] }
 0x11d   :  { %894 = vmatpush.msra.mxu0 %v148_v11  ;;  %v3688_v49 = vpop.f32.mrf.mxu3 }
 0x11e   :  { %1005 = vmatpush.msrb.mxu1 %v390_v48  ;;  %v1359_v48 = vld [vmem:[#allocation8 + $0x98] sm:$0xff] }
 0x11f   :  { %895 = vmatpush.msra.mxu0 %v136_v13  ;;  %v1370_v13 = vld [vmem:[#allocation8 + $0xf0] sm:$0xff] }
 0x120   :  { %896 = vmatmul.f32.vlgmr.msra.gmra.mxu0 %v3654_v41  ;;  %1006 = vmatpush.msrb.mxu1 %v378_v52 }
 0x121   :  { %972 = vmatpush.msrb.mxu0 %v318_v16  ;;  %v1366_v16 = vld [vmem:[#allocation8 + $0xd0] sm:$0xff] }
 0x122   :  { %1007 = vmatpush.msrb.mxu1 %v366_v55  ;;  %v786_v55 = vadd.f32 %v3688_v49, %v3686_v46 }
 0x123   :  { %973 = vmatpush.msrb.mxu0 %v306_v15  ;;  %v1371_v15 = vld [vmem:[#allocation8 + $0xf8] sm:$0xff] }
 0x124   :  { %1008 = vmatpush.msrb.mxu1 %v354_v60 }
 0x125   :  { %974 = vmatpush.msrb.mxu0 %v294_v20 }
 0x126   :  { %1009 = vmatpush.msrb.mxu1 %v342_v63 }
 0x127   :  { %975 = vmatpush.msrb.mxu0 %v282_v22  ;;  %v1369_v22 = vld [vmem:[#allocation8 + $0xe8] sm:$0xff] }
 0x128   :  { %899 = vmatmul.f32.gmra.mxu0 %v3664_v56  ;;  %1010 = vmatpush.msrb.mxu1 %v330_v2 }
 0x129   :  { %976 = vmatpush.msrb.mxu0 %v270_v25  ;;  %1011 = vmatmul.f32.vlgmr.msrb.gmra.mxu1 %v3657_v45  ;;  %v3510_v25 = vmov 0  }
 0x12b   :  { %977 = vmatpush.msrb.mxu0 %v258_v27  ;;  %v3690_v19 = vpop.f32.mrf.mxu2  ;;  %v1358_v27 = vld [vmem:[#allocation8 + $0x90] sm:$0xff] }
 0x12d   :  { %978 = vmatpush.msrb.mxu0 %v246_v28 }
 0x12f   :  { %979 = vmatpush.msrb.mxu0 %v234_v33 }
 0x131   :  { %980 = vmatpush.msrb.mxu0 %v222_v36  ;;  %1014 = vmatmul.f32.gmra.mxu1 %v3667_v57  ;;  %v1362_v57 = vld [vmem:[#allocation8 + $0xb0] sm:$0xff]  ;;  %v1365_v36 = vld [vmem:[#allocation8 + $0xc8] sm:$0xff] }
 0x133   :  { %981 = vmatpush.msrb.mxu0 %v210_v38  ;;  %v3696_v5 = vpop.f32.mrf.mxu2  ;;  %v125_v38 = vld [vmem:[#allocation5 + $0x2] sm:$0x3] }
 0x134   :  { %vm127_vm2 = vnez %v125_v38 }
 0x135   :  { %982 = vmatpush.msrb.mxu0 %v198_v47  ;;  %v3692_v3 = vpop.f32.mrf.mxu3 }
 0x137   :  { %983 = vmatpush.msrb.mxu0 %v186_v51 }
 0x139   :  { %984 = vmatpush.msrb.mxu0 %v174_v54  ;;  %v1126_v54 = vsel %vm127_vm2, 16843009, %v3510_v25 }
 0x13b   :  { %985 = vmatpush.msrb.mxu0 %v162_v59 }
 0x13d   :  { %986 = vmatpush.msrb.mxu0 %v150_v62  ;;  %v3698_v6 = vpop.f32.mrf.mxu3  ;;  %v1357_v62 = vld [vmem:[#allocation8 + $0x88] sm:$0xff] }
 0x13f   :  { %987 = vmatpush.msrb.mxu0 %v138_v0  ;;  %v1128_v0 = vunpack.c.0.s8 %v1126_v54  ;;  %v602_v54 = vadd.f32 %v3662_v53, %v3660_v50 }
 0x140   :  { %988 = vmatmul.f32.vlgmr.msrb.gmra.mxu0 %v3654_v41 }
 0x141   :  { %vm3730_vm5 = vcmp.ne.s32.totalorder %v1128_v0, 0 }
 0x148   :  { %991 = vmatmul.f32.gmra.mxu0 %v3664_v56  ;;  %v124_v56 = vld [vmem:[#allocation5] sm:$0x3] }
 0x149   :  { %vm126_vm1 = vnez %v124_v56 }
 0x14a   :  { %v1125_v43 = vsel %vm126_vm1, 16843009, %v3510_v25 }
 0x14b   :  { %v943_v7 = vpop.f32.mrf.mxu2  ;;  %v1127_v37 = vunpack.c.0.s8 %v1125_v43 }
 0x14d   :  { %vm3718_vm3 = vcmp.ne.s32.totalorder %v1127_v37, 0 }
 0x153   :  { %v946_v10 = vpop.f32.mrf.mxu2 }
 0x155   :  { %v966_v8 = vpop.f32.mrf.mxu3 }
 0x156   :  { %v3702_v9 = vadd.f32 %v966_v8, %v943_v7 }
 0x15d   :  { %v969_v11 = vpop.f32.mrf.mxu3 }
 0x15e   :  { %v3704_v42 = vadd.f32 %v969_v11, %v946_v10 }
 0x163   :  { %v3739_v10 = vpop.f32.mrf.mxu1 }
 0x16b   :  { %v1035_v45 = vpop.f32.mrf.mxu2 }
 0x170   :  { %v1223_v41 = vpop.permute.xlu0 %1222 }
 0x171   :  { %3147 = vmatpush.xpose.msk.msra.mxu0 %vm1072_vm0, %v1223_v41 }
 0x173   :  { %v1038_v24 = vpop.f32.mrf.mxu2 }
 0x175   :  { %1386 = vmatpush.msrb.mxu0 %v1370_v13  ;;  %v1058_v28 = vpop.f32.mrf.mxu3  ;;  %v3743_v13 = vpop.f32.mrf.mxu1 }
 0x176   :  { %v3713_v33 = vadd.f32 %v1058_v28, %v1035_v45 }
 0x177   :  { %1387 = vmatpush.msrb.mxu0 %v1368_v23 }
 0x178   :  { %v1221_v18 = vpop.permute.xlu0 %1220  ;;  %v1251_v20 = vpop.permute.xlu1 %1250 }
 0x179   :  { %1388 = vmatpush.msrb.mxu0 %v1366_v16  ;;  %3149 = vmatpush.xpose.msk.msra.mxu1 %vm1072_vm0, %v1251_v20 }
 0x17a   :  { %3148 = vmatmul.msk.f32.vlgmr.msra.gmra.mxu0 %vm1072_vm0, %v1221_v18 }
 0x17b   :  { %1389 = vmatpush.msrb.mxu0 %v1364_v17 }
 0x17d   :  { %1390 = vmatpush.msrb.mxu0 %v1362_v57  ;;  %1409 = vmatpush.msrb.mxu1 %v1371_v15  ;;  %v1061_v51 = vpop.f32.mrf.mxu3  ;;  %v3737_v8 = vpop.f32.mrf.mxu0 }
 0x17e   :  { %v3724_v59 = vadd.f32 %v1061_v51, %v1038_v24 }
 0x17f   :  { %1391 = vmatpush.msrb.mxu0 %v1360_v21  ;;  %1410 = vmatpush.msrb.mxu1 %v1369_v22 }
 0x180   :  { %v1249_v47 = vpop.permute.xlu1 %1248 }
 0x181   :  { %1392 = vmatpush.msrb.mxu0 %v1358_v27  ;;  %1411 = vmatpush.msrb.mxu1 %v1367_v29 }
 0x182   :  { %3150 = vmatmul.msk.f32.vlgmr.msra.gmra.mxu1 %vm1072_vm0, %v1249_v47 }
 0x183   :  { %1393 = vmatpush.msrb.mxu0 %v1356_v34  ;;  %1412 = vmatpush.msrb.mxu1 %v1365_v36 }
 0x184   :  { %v1096_v52 = vpop.f32.mrf.mxu2 }
 0x185   :  { %3161 = vmatpush.xpose.msk.msra.mxu0 %vm1072_vm0, %v3711_v30  ;;  %1413 = vmatpush.msrb.mxu1 %v1363_v40  ;;  %v1131_v60 = vsel %vm3718_vm3, -1e+09, %v1096_v52  ;;  %v3741_v11 = vpop.f32.mrf.mxu0 }
 0x186   :  { %v1134_v63 = vsel %vm1133_vm4, %v1131_v60, -inf  ;;  %v920_v45 = vpop.f32.mrf.mxu1 }
 0x187   :  { %1414 = vmatpush.msrb.mxu1 %v1361_v26  ;;  %1135 = vmax.xlane.f32.xlu2 %v1134_v63 }
 0x189   :  { %1415 = vmatpush.msrb.mxu1 %v1359_v48 }
 0x18b   :  { %1416 = vmatpush.msrb.mxu1 %v1357_v62 }
 0x18d   :  { %3163 = vmatpush.xpose.msk.msra.mxu1 %vm1072_vm0, %v786_v55  ;;  %v1122_v7 = vpop.f32.mrf.mxu3 }
 0x18e   :  { %v1132_v46 = vsel %vm3730_vm5, -1e+09, %v1122_v7  ;;  %v923_v56 = vpop.f32.mrf.mxu1 }
 0x18f   :  { %v1137_v49 = vsel %vm1133_vm4, %v1132_v46, -inf }
 0x190   :  { %1138 = vmax.xlane.f32.xlu2 %v1137_v49 }
 0x19d   :  { %v897_v41 = vpop.f32.mrf.mxu0 }
 0x19e   :  { %v3745_v23 = vadd.f32 %v920_v45, %v897_v41 }
 0x1a0   :  { %1176 = vmatpush.msrb.mxu2 %v3745_v23 }
 0x1a5   :  { %v900_v16 = vpop.f32.mrf.mxu0 }
 0x1a6   :  { %v924_v17 = vadd.f32 %v923_v56, %v900_v16  ;;  %v1012_v15 = vpop.f32.mrf.mxu1 }
 0x1a8   :  { %1199 = vmatpush.msrb.mxu3 %v924_v17 }
 0x1ae   :  { %v1015_v21 = vpop.f32.mrf.mxu1 }
 0x1bd   :  { %v989_v57 = vpop.f32.mrf.mxu0 }
 0x1be   :  { %v3748_v18 = vadd.f32 %v1012_v15, %v989_v57 }
 0x1c5   :  { %v992_v20 = vpop.f32.mrf.mxu0 }
 0x1c6   :  { %v3750_v22 = vadd.f32 %v1015_v21, %v992_v20 }
 0x1f7   :  { %v1245_v24 = vpop.f32.mrf.mxu0 }
 0x1f8   :  { %v1276_v25 = vsel %vm3718_vm3, -1e+09, %v1245_v24  ;;  %v1219_v24 = vld [vmem:[#allocation8 + $0x78] sm:$0xff] }
 0x1f9   :  { %v1278_v43 = vsel %vm1133_vm4, %v1276_v25, -inf }
 0x1fa   :  { %1279 = vmax.xlane.f32.xlu0 %v1278_v43  ;;  %v1136_v27 = vpop.xlane.xlu2 %1135  ;;  %v1215_v43 = vld [vmem:[#allocation8 + $0x58] sm:$0xff] }
 0x1fb   :  { %v1140_v29 = vsub.f32 %v1131_v60, %v1136_v27  ;;  %v3766_v60 = vmul.f32 0.125, %v602_v54  ;;  %v1213_v27 = vld [vmem:[#allocation8 + $0x48] sm:$0xff] }
 0x1fd   :  { %v1142_v28 = vmul.f32 1.442695, %v1140_v29  ;;  %v1211_v29 = vld [vmem:[#allocation8 + $0x38] sm:$0xff] }
 0x1ff   :  { %v1273_v34 = vpop.f32.mrf.mxu1  ;;  %3237 = vpow2.f32 %v1142_v28  ;;  %v1209_v28 = vld [vmem:[#allocation8 + $0x28] sm:$0xff] }
 0x200   :  { %v1277_v36 = vsel %vm3730_vm5, -1e+09, %v1273_v34  ;;  %v1207_v34 = vld [vmem:[#allocation8 + $0x18] sm:$0xff] }
 0x201   :  { %v1281_v37 = vsel %vm1133_vm4, %v1277_v36, -inf }
 0x202   :  { %1282 = vmax.xlane.f32.xlu1 %v1281_v37 }
 0x203   :  { %v1139_v38 = vpop.xlane.xlu2 %1138 }
 0x204   :  { %v1141_v40 = vsub.f32 %v1132_v46, %v1139_v38 }
 0x205   :  { %v3238_v47 = vpop.eup %3237 }
 0x206   :  { %v1144_v26 = vmul.f32 1.442695, %v1141_v40  ;;  %v1146_v48 = vsel %vm1133_vm4, %v3238_v47, 0.0 }
 0x207   :  { %1147 = vadd.xlane.f32.xlu2 %v1146_v48 }
 0x208   :  { %3239 = vpow2.f32 %v1144_v26 }
 0x20e   :  { %1330 = vrot.lane.b32.xlu0 %v924_v17, %s3509_s4  ;;  %v3240_v51 = vpop.eup %3239 }
 0x20f   :  { %v1149_v52 = vsel %vm1133_vm4, %v3240_v51, 0.0 }
 0x210   :  { %1150 = vadd.xlane.f32.xlu2 %v1149_v52 }
 0x216   :  { %1674 = vrot.lane.b32.xlu0 %v3711_v30, %s3509_s4 }
 0x21e   :  { %1702 = vrot.lane.b32.xlu0 %v786_v55, %s3509_s4 }
 0x226   :  { %1700 = vrot.lane.b32.xlu0 %v3766_v60, %s3509_s4 }
 0x26d   :  { %v1280_v62 = vpop.xlane.xlu0 %1279 }
 0x26e   :  { %v1284_v63 = vsub.f32 %v1276_v25, %v1280_v62  ;;  %v1217_v25 = vld [vmem:[#allocation8 + $0x68] sm:$0xff]  ;;  %v1216_v62 = vld [vmem:[#allocation8 + $0x60] sm:$0xff] }
 0x270   :  { %v1286_v0 = vmul.f32 1.442695, %v1284_v63 }
 0x272   :  { %3241 = vpow2.f32 %v1286_v0  ;;  %v1214_v0 = vld [vmem:[#allocation8 + $0x50] sm:$0xff] }
 0x275   :  { %v1283_v7 = vpop.xlane.xlu1 %1282 }
 0x276   :  { %v1285_v46 = vsub.f32 %v1277_v36, %v1283_v7  ;;  %v1205_v36 = vld [vmem:[#allocation8 + $0x8] sm:$0xff]  ;;  %v1212_v7 = vld [vmem:[#allocation8 + $0x40] sm:$0xff] }
 0x278   :  { %v3242_v49 = vpop.eup %3241  ;;  %v1288_v41 = vmul.f32 1.442695, %v1285_v46  ;;  %v1210_v46 = vld [vmem:[#allocation8 + $0x30] sm:$0xff] }
 0x279   :  { %v1290_v30 = vsel %vm1133_vm4, %v3242_v49, 0.0 }
 0x27a   :  { %3243 = vpow2.f32 %v1288_v41  ;;  %1291 = vadd.xlane.f32.xlu2 %v1290_v30  ;;  %v1148_v55 = vpop.xlane.xlu2 %1147  ;;  %v1206_v30 = vld [vmem:[#allocation8 + $0x10] sm:$0xff] }
 0x27b   :  { %3245 = vrcp.f32 %v1148_v55 }
 0x280   :  { %v3244_v50 = vpop.eup %3243  ;;  %v1331_v53 = vpop.permute.xlu0 %1330 }
 0x281   :  { %1351 = vmatpush.msra.mxu3 %v1331_v53  ;;  %v1293_v45 = vsel %vm1133_vm4, %v3244_v50, 0.0  ;;  %v3246_v16 = vpop.eup %3245 }
 0x282   :  { %1294 = vadd.xlane.f32.xlu2 %v1293_v45  ;;  %v1154_v56 = vmul.f32 %v3246_v16, %v3238_v47 }
 0x283   :  { %v1151_v17 = vpop.xlane.xlu2 %1150 }
 0x284   :  { %3247 = vrcp.f32 %v1151_v17  ;;  %v1156_v57 = vsel %vm3718_vm3, 0.0, %v1154_v56  ;;  %v599_v56 = vadd.f32 %v3652_v35, %v3649_v32 }
 0x285   :  { %3145 = vmatmul.msk.f32.vlgmr.msrb.gmra.mxu2 %vm1133_vm4, %v1156_v57 }
 0x286   :  { %v1065_v17 = vmul.f32 0.125, %v599_v56  ;;  %v1603_v56 = vld [vmem:[#allocation8 + $0x118] sm:$0xff] }
 0x288   :  { %v1675_v63 = vpop.permute.xlu0 %1674 }
 0x28a   :  { %v3248_v15 = vpop.eup %3247 }
 0x28b   :  { %v1155_v20 = vmul.f32 %v3248_v15, %v3240_v51  ;;  %v1218_v51 = vld [vmem:[#allocation8 + $0x70] sm:$0xff] }
 0x28d   :  { %v1157_v21 = vsel %vm3730_vm5, 0.0, %v1155_v20 }
 0x28e   :  { %3146 = vmatmul.msk.f32.vlgmr.msrb.gmra.mxu3 %vm1133_vm4, %v1157_v21 }
 0x28f   :  { %1461 = vmatpush.msrb.mxu3 %v1219_v24 }
 0x290   :  { %v1703_v55 = vpop.permute.xlu0 %1702 }
 0x291   :  { %1462 = vmatpush.msrb.mxu3 %v1217_v25 }
 0x293   :  { %1463 = vmatpush.msrb.mxu3 %v1215_v43 }
 0x295   :  { %1464 = vmatpush.msrb.mxu3 %v1213_v27 }
 0x297   :  { %1465 = vmatpush.msrb.mxu3 %v1211_v29 }
 0x299   :  { %1466 = vmatpush.msrb.mxu3 %v1209_v28 }
 0x29a   :  { %1303 = vrot.lane.b32.xlu2 %v3745_v23, %s3509_s4 }
 0x29b   :  { %1467 = vmatpush.msrb.mxu3 %v1207_v34 }
 0x29d   :  { %1468 = vmatpush.msrb.mxu3 %v1205_v36 }
 0x2ed   :  { %v1292_v37 = vpop.xlane.xlu2 %1291 }
 0x2ee   :  { %3249 = vrcp.f32 %v1292_v37 }
 0x2f4   :  { %v3250_v23 = vpop.eup %3249 }
 0x2f5   :  { %v1295_v38 = vpop.xlane.xlu2 %1294  ;;  %v1298_v40 = vmul.f32 %v3250_v23, %v3242_v49  ;;  %v1208_v49 = vld [vmem:[#allocation8 + $0x20] sm:$0xff] }
 0x2f6   :  { %3251 = vrcp.f32 %v1295_v38 }
 0x2f7   :  { %v1300_v52 = vsel %vm3718_vm3, 0.0, %v1298_v40 }
 0x2fc   :  { %v3252_v47 = vpop.eup %3251 }
 0x2fd   :  { %v1299_v26 = vmul.f32 %v3252_v47, %v3244_v50  ;;  %v1304_v48 = vpop.permute.xlu2 %1303  ;;  %v1204_v50 = vld [vmem:[#allocation8] sm:$0xff] }
 0x2fe   :  { %1324 = vmatpush.msra.mxu2 %v1304_v48  ;;  %v1614_v48 = vld [vmem:[#allocation8 + $0x170] sm:$0xff] }
 0x2ff   :  { %3151 = vmatmul.msk.f32.vlgmr.msra.gmra.mxu2 %vm1133_vm4, %v1300_v52  ;;  %v1301_v54 = vsel %vm3730_vm5, 0.0, %v1299_v26  ;;  %v1612_v52 = vld [vmem:[#allocation8 + $0x160] sm:$0xff] }
 0x300   :  { %1438 = vmatpush.msrb.mxu2 %v1218_v51  ;;  %3152 = vmatmul.msk.f32.vlgmr.msra.gmra.mxu3 %vm1133_vm4, %v1301_v54  ;;  %v1615_v51 = vld [vmem:[#allocation8 + $0x178] sm:$0xff]  ;;  %v1613_v54 = vld [vmem:[#allocation8 + $0x168] sm:$0xff] }
 0x301   :  { %1595 = vmatpush.msra.mxu3 %v3704_v42 }
 0x302   :  { %1439 = vmatpush.msrb.mxu2 %v1216_v62  ;;  %v1610_v62 = vld [vmem:[#allocation8 + $0x150] sm:$0xff] }
 0x304   :  { %1440 = vmatpush.msrb.mxu2 %v1214_v0  ;;  %v1608_v0 = vld [vmem:[#allocation8 + $0x140] sm:$0xff] }
 0x306   :  { %1441 = vmatpush.msrb.mxu2 %v1212_v7  ;;  %v1609_v7 = vld [vmem:[#allocation8 + $0x148] sm:$0xff] }
 0x308   :  { %1442 = vmatpush.msrb.mxu2 %v1210_v46  ;;  %v1178_v41 = vpop.f32.mrf.mxu2 }
 0x309   :  { %3159 = vmatmul.msk.f32.vlgmr.msrb.gmra.mxu3 %vm1072_vm0, %v1178_v41 }
 0x30a   :  { %1443 = vmatpush.msrb.mxu2 %v1208_v49  ;;  %3173 = vmatpush.xpose.msk.msrb.mxu3 %vm1072_vm0, %v1703_v55  ;;  %v1606_v49 = vld [vmem:[#allocation8 + $0x130] sm:$0xff] }
 0x30c   :  { %1444 = vmatpush.msrb.mxu2 %v1206_v30 }
 0x30e   :  { %1445 = vmatpush.msrb.mxu2 %v1204_v50  ;;  %v1604_v50 = vld [vmem:[#allocation8 + $0x120] sm:$0xff] }
 0x30f   :  { %3157 = vmatmul.msk.f32.vlgmr.msrb.gmra.mxu2 %vm1072_vm0, %v1178_v41  ;;  %v1607_v41 = vld [vmem:[#allocation8 + $0x138] sm:$0xff] }
 0x310   :  { %1572 = vmatpush.msra.mxu2 %v3702_v9 }
 0x311   :  { %v1201_v53 = vpop.f32.mrf.mxu3 }
 0x312   :  { %3171 = vmatpush.xpose.msk.msrb.mxu2 %vm1072_vm0, %v1675_v63  ;;  %3160 = vmatmul.msk.f32.gmra.mxu3 %vm1072_vm0, %v1201_v53  ;;  %v1611_v63 = vld [vmem:[#allocation8 + $0x158] sm:$0xff] }
 0x317   :  { %3158 = vmatmul.msk.f32.gmra.mxu2 %vm1072_vm0, %v1201_v53  ;;  %v1605_v53 = vld [vmem:[#allocation8 + $0x128] sm:$0xff] }
 0x382   :  { %v1326_v45 = vpop.f32.mrf.mxu2 }
 0x383   :  { %3153 = vmatmul.msk.f32.vlgmr.msrb.gmra.mxu0 %vm1072_vm0, %v1326_v45  ;;  %3155 = vmatmul.msk.f32.vlgmr.msrb.gmra.mxu1 %vm1072_vm0, %v1326_v45  ;;  %v1353_v16 = vpop.f32.mrf.mxu3 }
 0x384   :  { %1630 = vmatpush.msrb.mxu0 %v1614_v48  ;;  %1653 = vmatpush.msrb.mxu1 %v1615_v51 }
 0x386   :  { %1631 = vmatpush.msrb.mxu0 %v1612_v52  ;;  %1654 = vmatpush.msrb.mxu1 %v1613_v54 }
 0x388   :  { %1632 = vmatpush.msrb.mxu0 %v1610_v62  ;;  %1655 = vmatpush.msrb.mxu1 %v1611_v63 }
 0x38a   :  { %1633 = vmatpush.msrb.mxu0 %v1608_v0  ;;  %1656 = vmatpush.msrb.mxu1 %v1609_v7 }
 0x38b   :  { %3154 = vmatmul.msk.f32.gmra.mxu0 %vm1072_vm0, %v1353_v16  ;;  %3156 = vmatmul.msk.f32.gmra.mxu1 %vm1072_vm0, %v1353_v16  ;;  %v1602_v16 = vld [vmem:[#allocation8 + $0x110] sm:$0xff] }
 0x38c   :  { %1634 = vmatpush.msrb.mxu0 %v1606_v49  ;;  %1657 = vmatpush.msrb.mxu1 %v1607_v41 }
 0x38e   :  { %1635 = vmatpush.msrb.mxu0 %v1604_v50  ;;  %1658 = vmatpush.msrb.mxu1 %v1605_v53 }
 0x390   :  { %1636 = vmatpush.msrb.mxu0 %v1602_v16  ;;  %1659 = vmatpush.msrb.mxu1 %v1603_v56  ;;  %v1822_v16 = vld [vmem:[#allocation8 + $0x1f0] sm:$0xff]  ;;  %v1823_v56 = vld [vmem:[#allocation8 + $0x1f8] sm:$0xff] }
 0x393   :  { %3162 = vmatmul.msk.f32.vlgmr.msra.gmra.mxu0 %vm1072_vm0, %v1065_v17  ;;  %3164 = vmatmul.msk.f32.vlgmr.msra.gmra.mxu1 %vm1072_vm0, %v3766_v60 }
 0x400   :  { %v3803_v57 = vpop.f32.mrf.mxu0  ;;  %v3805_v15 = vpop.f32.mrf.mxu1 }
 0x408   :  { %v3807_v20 = vpop.f32.mrf.mxu0  ;;  %v3809_v21 = vpop.f32.mrf.mxu1 }
 0x410   :  { %v1499_v24 = vpop.f32.mrf.mxu0  ;;  %v1525_v35 = vpop.f32.mrf.mxu1 }
 0x411   :  { %v1528_v25 = vsel %vm3718_vm3, -1e+09, %v1499_v24  ;;  %v1529_v43 = vsel %vm3730_vm5, -1e+09, %v1525_v35 }
 0x412   :  { %v1530_v32 = vsel %vm1133_vm4, %v1528_v25, -inf  ;;  %v1533_v60 = vsel %vm1133_vm4, %v1529_v43, -inf }
 0x413   :  { %1531 = vmax.xlane.f32.xlu1 %v1530_v32  ;;  %v1701_v32 = vpop.permute.xlu0 %1700 }
 0x41b   :  { %1534 = vmax.xlane.f32.xlu1 %v1533_v60  ;;  %v1601_v60 = vld [vmem:[#allocation8 + $0x108] sm:$0xff] }
 0x41c   :  { %1660 = vmatpush.msrb.mxu1 %v1601_v60  ;;  %v1815_v60 = vld [vmem:[#allocation8 + $0x1b8] sm:$0xff] }
 0x41e   :  { %1861 = vmatpush.msra.mxu1 %v1823_v56 }
 0x486   :  { %v1532_v27 = vpop.xlane.xlu1 %1531 }
 0x487   :  { %v1536_v29 = vsub.f32 %v1528_v25, %v1532_v27  ;;  %v1447_v27 = vpop.f32.mrf.mxu2 }
 0x488   :  { %v1448_v51 = vadd.f32 %v1447_v27, %v3803_v57  ;;  %v1813_v27 = vld [vmem:[#allocation8 + $0x1a8] sm:$0xff] }
 0x489   :  { %v1538_v28 = vmul.f32 1.442695, %v1536_v29  ;;  %v1470_v29 = vpop.f32.mrf.mxu3 }
 0x48a   :  { %v1471_v52 = vadd.f32 %v1470_v29, %v3805_v15  ;;  %v3853_v15 = vadd.f32 %v3743_v13, %v3741_v11  ;;  %v1819_v11 = vld [vmem:[#allocation8 + $0x1d8] sm:$0xff]  ;;  %v1816_v13 = vld [vmem:[#allocation8 + $0x1c0] sm:$0xff]  ;;  %v1810_v29 = vld [vmem:[#allocation8 + $0x190] sm:$0xff] }
 0x48b   :  { %3253 = vpow2.f32 %v1538_v28 }
 0x48e   :  { %v1535_v34 = vpop.xlane.xlu1 %1534 }
 0x48f   :  { %v1537_v36 = vsub.f32 %v1529_v43, %v1535_v34  ;;  %v1600_v43 = vld [vmem:[#allocation8 + $0x100] sm:$0xff]  ;;  %v3828_v28 = vpop.f32.mrf.mxu2 }
 0x490   :  { %1637 = vmatpush.msrb.mxu0 %v1600_v43  ;;  %v1814_v43 = vld [vmem:[#allocation8 + $0x1b0] sm:$0xff] }
 0x491   :  { %v3254_v37 = vpop.eup %3253  ;;  %v1540_v38 = vmul.f32 1.442695, %v1537_v36  ;;  %v3830_v34 = vpop.f32.mrf.mxu3 }
 0x492   :  { %v1542_v23 = vsel %vm1133_vm4, %v3254_v37, 0.0  ;;  %1838 = vmatpush.msra.mxu0 %v1822_v16 }
 0x493   :  { %3255 = vpow2.f32 %v1540_v38  ;;  %1543 = vadd.xlane.f32.xlu2 %v1542_v23 }
 0x499   :  { %v3256_v40 = vpop.eup %3255 }
 0x49a   :  { %v1545_v47 = vsel %vm1133_vm4, %v3256_v40, 0.0 }
 0x49b   :  { %1546 = vadd.xlane.f32.xlu1 %v1545_v47 }
 0x4b4   :  { %1672 = vrot.lane.b32.xlu1 %v1065_v17, %s3509_s4 }
 0x506   :  { %v1544_v26 = vpop.xlane.xlu2 %1543 }
 0x507   :  { %3257 = vrcp.f32 %v1544_v26 }
 0x50d   :  { %v3258_v46 = vpop.eup %3257 }
 0x50e   :  { %v1550_v30 = vmul.f32 %v3258_v46, %v3254_v37  ;;  %v1547_v55 = vpop.xlane.xlu1 %1546 }
 0x50f   :  { %3259 = vrcp.f32 %v1547_v55 }
 0x510   :  { %v1552_v45 = vsel %vm3718_vm3, 0.0, %v1550_v30 }
 0x511   :  { %3165 = vmatmul.msk.f32.vlgmr.msra.gmra.mxu2 %vm1133_vm4, %v1552_v45 }
 0x515   :  { %v3260_v17 = vpop.eup %3259 }
 0x516   :  { %v1551_v24 = vmul.f32 %v3260_v17, %v3256_v40  ;;  %v1820_v17 = vld [vmem:[#allocation8 + $0x1e0] sm:$0xff] }
 0x517   :  { %1839 = vmatpush.msra.mxu0 %v1820_v17 }
 0x518   :  { %v1553_v25 = vsel %vm3730_vm5, 0.0, %v1551_v24  ;;  %v1821_v24 = vld [vmem:[#allocation8 + $0x1e8] sm:$0xff] }
 0x519   :  { %3166 = vmatmul.msk.f32.vlgmr.msra.gmra.mxu3 %vm1133_vm4, %v1553_v25  ;;  %v1818_v25 = vld [vmem:[#allocation8 + $0x1d0] sm:$0xff]  ;;  %1862 = vmatpush.msra.mxu1 %v1821_v24 }
 0x51a   :  { %1840 = vmatpush.msra.mxu0 %v1818_v25 }
 0x51b   :  { %1863 = vmatpush.msra.mxu1 %v1819_v11  ;;  %v1451_v11 = vadd.f32 %v3828_v28, %v3807_v20 }
 0x51c   :  { %1841 = vmatpush.msra.mxu0 %v1816_v13  ;;  %v1474_v13 = vadd.f32 %v3830_v34, %v3809_v21 }
 0x51e   :  { %1842 = vmatpush.msra.mxu0 %v1814_v43 }
 0x521   :  { %3174 = vmatmul.msk.f32.vlgmr.msrb.gmra.mxu3 %vm1072_vm0, %v1701_v32  ;;  %v1817_v32 = vld [vmem:[#allocation8 + $0x1c8] sm:$0xff] }
 0x522   :  { %1864 = vmatpush.msra.mxu1 %v1817_v32 }
 0x524   :  { %1865 = vmatpush.msra.mxu1 %v1815_v60 }
 0x526   :  { %v1673_v35 = vpop.permute.xlu1 %1672  ;;  %1866 = vmatpush.msra.mxu1 %v1813_v27 }
 0x527   :  { %3172 = vmatmul.msk.f32.vlgmr.msrb.gmra.mxu2 %vm1072_vm0, %v1673_v35 }
 0x594   :  { %v1574_v36 = vpop.f32.mrf.mxu2 }
 0x595   :  { %3167 = vmatmul.msk.f32.vlgmr.msrb.gmra.mxu0 %vm1072_vm0, %v1574_v36  ;;  %3169 = vmatmul.msk.f32.vlgmr.msrb.gmra.mxu1 %vm1072_vm0, %v1574_v36  ;;  %v1811_v36 = vld [vmem:[#allocation8 + $0x198] sm:$0xff] }
 0x596   :  { %1867 = vmatpush.msra.mxu1 %v1811_v36 }
 0x59c   :  { %v1597_v37 = vpop.f32.mrf.mxu3 }
 0x59d   :  { %3168 = vmatmul.msk.f32.gmra.mxu0 %vm1072_vm0, %v1597_v37  ;;  %3170 = vmatmul.msk.f32.gmra.mxu1 %vm1072_vm0, %v1597_v37 }
 0x5a4   :  { %v1725_v38 = vpop.f32.mrf.mxu3 }
 0x5a5   :  { %v1729_v23 = vsel %vm3730_vm5, -1e+09, %v1725_v38 }
 0x5a6   :  { %v1733_v40 = vsel %vm1133_vm4, %v1729_v23, -inf }
 0x5a7   :  { %1734 = vmax.xlane.f32.xlu1 %v1733_v40 }
 0x5aa   :  { %v1697_v47 = vpop.f32.mrf.mxu2 }
 0x5ab   :  { %v1728_v26 = vsel %vm3718_vm3, -1e+09, %v1697_v47 }
 0x5ac   :  { %v1730_v48 = vsel %vm1133_vm4, %v1728_v26, -inf }
 0x5ad   :  { %1731 = vmax.xlane.f32.xlu0 %v1730_v48  ;;  %v829_v48 = vadd.f32 %v3739_v10, %v3737_v8  ;;  %v648_v8 = vadd.f32 %v3633_v61, %v3631_v58 }
 0x5c1   :  { %1782 = vrot.lane.b32.xlu0 %v3704_v42, %s3509_s4 }
 0x612   :  { %v1639_v54 = vpop.f32.mrf.mxu0  ;;  %v1662_v62 = vpop.f32.mrf.mxu1 }
 0x613   :  { %v3846_v63 = vadd.f32 %v1639_v54, %v1448_v51  ;;  %v3848_v0 = vadd.f32 %v1662_v62, %v1471_v52  ;;  %v645_v54 = vadd.f32 %v3628_v44, %v3626_v39  ;;  %v1070_v62 = vmul.f32 0.125, %v648_v8  ;;  %v2014_v8 = vld [vmem:[#allocation8 + $0x250] sm:$0xff] }
 0x615   :  { %v1066_v10 = vmul.f32 0.125, %v645_v54 }
 0x61a   :  { %v1735_v7 = vpop.xlane.xlu1 %1734 }
 0x61b   :  { %v1737_v41 = vsub.f32 %v1729_v23, %v1735_v7  ;;  %v1808_v7 = vld [vmem:[#allocation8 + $0x180] sm:$0xff] }
 0x61d   :  { %v1740_v55 = vmul.f32 1.442695, %v1737_v41 }
 0x620   :  { %v1732_v46 = vpop.xlane.xlu0 %1731 }
 0x621   :  { %v1736_v49 = vsub.f32 %v1728_v26, %v1732_v46  ;;  %v1809_v46 = vld [vmem:[#allocation8 + $0x188] sm:$0xff] }
 0x622   :  { %1868 = vmatpush.msra.mxu1 %v1809_v46  ;;  %v2010_v46 = vld [vmem:[#allocation8 + $0x230] sm:$0xff] }
 0x623   :  { %v1738_v30 = vmul.f32 1.442695, %v1736_v49 }
 0x625   :  { %3261 = vpow2.f32 %v1738_v30 }
 0x626   :  { %3263 = vpow2.f32 %v1740_v55 }
 0x62b   :  { %v3262_v50 = vpop.eup %3261 }
 0x62c   :  { %v1742_v42 = vsel %vm1133_vm4, %v3262_v50, 0.0  ;;  %v3264_v57 = vpop.eup %3263 }
 0x62d   :  { %1743 = vadd.xlane.f32.xlu2 %v1742_v42  ;;  %v1745_v45 = vsel %vm1133_vm4, %v3264_v57, 0.0  ;;  %v1665_v42 = vpop.f32.mrf.mxu1 }
 0x62e   :  { %v1671_v32 = vadd.f32 %v1665_v42, %v1474_v13  ;;  %v2005_v42 = vld [vmem:[#allocation8 + $0x208] sm:$0xff] }
 0x633   :  { %v1783_v53 = vpop.permute.xlu0 %1782 }
 0x634   :  { %1803 = vmatpush.msra.mxu3 %v1783_v53 }
 0x635   :  { %1746 = vadd.xlane.f32.xlu2 %v1745_v45 }
 0x636   :  { %3183 = vmatpush.xpose.msk.msrb.mxu3 %vm1072_vm0, %v3853_v15 }
 0x64d   :  { %1755 = vrot.lane.b32.xlu2 %v3702_v9, %s3509_s4  ;;  %v1812_v9 = vld [vmem:[#allocation8 + $0x1a0] sm:$0xff] }
 0x64e   :  { %1843 = vmatpush.msra.mxu0 %v1812_v9 }
 0x650   :  { %1844 = vmatpush.msra.mxu0 %v1810_v29 }
 0x652   :  { %1845 = vmatpush.msra.mxu0 %v1808_v7  ;;  %v2013_v7 = vld [vmem:[#allocation8 + $0x248] sm:$0xff] }
 0x6a0   :  { %v1744_v35 = vpop.xlane.xlu2 %1743 }
 0x6a1   :  { %3265 = vrcp.f32 %v1744_v35 }
 0x6a7   :  { %v3266_v38 = vpop.eup %3265 }
 0x6a8   :  { %v1747_v37 = vpop.xlane.xlu2 %1746  ;;  %v1750_v23 = vmul.f32 %v3266_v38, %v3262_v50  ;;  %v1642_v50 = vpop.f32.mrf.mxu0 }
 0x6a9   :  { %3267 = vrcp.f32 %v1747_v37 }
 0x6aa   :  { %v1752_v51 = vsel %vm3718_vm3, 0.0, %v1750_v23 }
 0x6af   :  { %v3268_v40 = vpop.eup %3267 }
 0x6b0   :  { %v1751_v47 = vmul.f32 %v3268_v40, %v3264_v57  ;;  %v1756_v26 = vpop.permute.xlu2 %1755 }
 0x6b1   :  { %1776 = vmatpush.msra.mxu2 %v1756_v26  ;;  %v2019_v26 = vld [vmem:[#allocation8 + $0x278] sm:$0xff] }
 0x6b2   :  { %3175 = vmatmul.msk.f32.vlgmr.msra.gmra.mxu2 %vm1133_vm4, %v1752_v51  ;;  %v1753_v52 = vsel %vm3730_vm5, 0.0, %v1751_v47  ;;  %v2018_v47 = vld [vmem:[#allocation8 + $0x270] sm:$0xff]  ;;  %v2016_v51 = vld [vmem:[#allocation8 + $0x260] sm:$0xff]  ;;  %2057 = vmatpush.msrb.mxu1 %v2019_v26  ;;  %v2225_v26 = vld [vmem:[#allocation8 + $0x2e8] sm:$0xff] }
 0x6b3   :  { %3181 = vmatpush.xpose.msk.msrb.mxu2 %vm1072_vm0, %v829_v48  ;;  %3176 = vmatmul.msk.f32.vlgmr.msra.gmra.mxu3 %vm1133_vm4, %v1753_v52 }
 0x6b4   :  { %1999 = vmatpush.msra.mxu3 %v3750_v22  ;;  %2034 = vmatpush.msrb.mxu0 %v2018_v47  ;;  %v2224_v47 = vld [vmem:[#allocation8 + $0x2e0] sm:$0xff] }
 0x6b6   :  { %2035 = vmatpush.msrb.mxu0 %v2016_v51  ;;  %v2222_v51 = vld [vmem:[#allocation8 + $0x2d0] sm:$0xff] }
 0x6b7   :  { %1976 = vmatpush.msra.mxu2 %v3748_v18 }
 0x6b8   :  { %2036 = vmatpush.msrb.mxu0 %v2014_v8  ;;  %v2216_v8 = vld [vmem:[#allocation8 + $0x2a0] sm:$0xff] }
 0x6ba   :  { %3182 = vmatmul.msk.f32.vlgmr.msrb.gmra.mxu2 %vm1072_vm0, %v1066_v10 }
 0x6bb   :  { %3184 = vmatmul.msk.f32.vlgmr.msrb.gmra.mxu3 %vm1072_vm0, %v1070_v62 }
 0x735   :  { %v1778_v49 = vpop.f32.mrf.mxu2 }
 0x736   :  { %v1805_v41 = vpop.f32.mrf.mxu3  ;;  %3177 = vmatmul.msk.f32.vlgmr.msra.gmra.mxu0 %vm1072_vm0, %v1778_v49  ;;  %3179 = vmatmul.msk.f32.vlgmr.msra.gmra.mxu1 %vm1072_vm0, %v1778_v49  ;;  %v2011_v49 = vld [vmem:[#allocation8 + $0x238] sm:$0xff] }
 0x73d   :  { %v1903_v39 = vpop.f32.mrf.mxu2 }
 0x73e   :  { %v1932_v44 = vsel %vm3718_vm3, -1e+09, %v1903_v39  ;;  %3178 = vmatmul.msk.f32.gmra.mxu0 %vm1072_vm0, %v1805_v41  ;;  %3180 = vmatmul.msk.f32.gmra.mxu1 %vm1072_vm0, %v1805_v41  ;;  %v1929_v58 = vpop.f32.mrf.mxu3  ;;  %v2008_v41 = vld [vmem:[#allocation8 + $0x220] sm:$0xff]  ;;  %v2009_v39 = vld [vmem:[#allocation8 + $0x228] sm:$0xff] }
 0x73f   :  { %v1933_v61 = vsel %vm3730_vm5, -1e+09, %v1929_v58  ;;  %v1934_v30 = vsel %vm1133_vm4, %v1932_v44, -inf  ;;  %v2007_v58 = vld [vmem:[#allocation8 + $0x218] sm:$0xff] }
 0x740   :  { %1935 = vmax.xlane.f32.xlu1 %v1934_v30  ;;  %v1937_v55 = vsel %vm1133_vm4, %v1933_v61, -inf }
 0x741   :  { %1938 = vmax.xlane.f32.xlu2 %v1937_v55 }
 0x759   :  { %2106 = vrot.lane.b32.xlu2 %v3853_v15, %s3509_s4  ;;  %v1670_v15 = vadd.f32 %v1642_v50, %v1451_v11  ;;  %v2004_v50 = vld [vmem:[#allocation8 + $0x200] sm:$0xff] }
 0x7b3   :  { %v1936_v57 = vpop.xlane.xlu1 %1935  ;;  %v3889_v53 = vpop.f32.mrf.mxu0 }
 0x7b4   :  { %v1940_v45 = vsub.f32 %v1932_v44, %v1936_v57  ;;  %v3891_v16 = vpop.f32.mrf.mxu1  ;;  %v1939_v56 = vpop.xlane.xlu2 %1938  ;;  %v2006_v44 = vld [vmem:[#allocation8 + $0x210] sm:$0xff] }
 0x7b5   :  { %v1941_v17 = vsub.f32 %v1933_v61, %v1939_v56 }
 0x7b6   :  { %v1942_v24 = vmul.f32 1.442695, %v1940_v45 }
 0x7b7   :  { %v1944_v25 = vmul.f32 1.442695, %v1941_v17 }
 0x7b8   :  { %3269 = vpow2.f32 %v1942_v24 }
 0x7b9   :  { %3271 = vpow2.f32 %v1944_v25 }
 0x7bb   :  { %v1850_v35 = vpop.f32.mrf.mxu0 }
 0x7bc   :  { %v3897_v43 = vadd.f32 %v1850_v35, %v1670_v15  ;;  %v1873_v60 = vpop.f32.mrf.mxu1  ;;  %v2107_v9 = vpop.permute.xlu2 %2106 }
 0x7bd   :  { %v3899_v27 = vadd.f32 %v1873_v60, %v1671_v32  ;;  %3193 = vmatpush.xpose.msk.msrb.mxu3 %vm1072_vm0, %v2107_v9 }
 0x7be   :  { %v3270_v29 = vpop.eup %3269 }
 0x7bf   :  { %v3272_v36 = vpop.eup %3271  ;;  %v1946_v20 = vsel %vm1133_vm4, %v3270_v29, 0.0 }
 0x7c0   :  { %1947 = vadd.xlane.f32.xlu1 %v1946_v20  ;;  %v1949_v28 = vsel %vm1133_vm4, %v3272_v36, 0.0 }
 0x7c1   :  { %1950 = vadd.xlane.f32.xlu0 %v1949_v28 }
 0x7d9   :  { %2078 = vrot.lane.b32.xlu1 %v829_v48, %s3509_s4  ;;  %v2017_v48 = vld [vmem:[#allocation8 + $0x268] sm:$0xff] }
 0x7da   :  { %2058 = vmatpush.msrb.mxu1 %v2017_v48 }
 0x7e1   :  { %2076 = vrot.lane.b32.xlu1 %v1066_v10, %s3509_s4  ;;  %v2015_v10 = vld [vmem:[#allocation8 + $0x258] sm:$0xff] }
 0x7e2   :  { %2059 = vmatpush.msrb.mxu1 %v2015_v10  ;;  %v2217_v10 = vld [vmem:[#allocation8 + $0x2a8] sm:$0xff] }
 0x7e4   :  { %2060 = vmatpush.msrb.mxu1 %v2013_v7  ;;  %v2215_v7 = vld [vmem:[#allocation8 + $0x298] sm:$0xff] }
 0x7e6   :  { %2061 = vmatpush.msrb.mxu1 %v2011_v49 }
 0x7e8   :  { %2062 = vmatpush.msrb.mxu1 %v2009_v39 }
 0x7e9   :  { %2104 = vrot.lane.b32.xlu1 %v1070_v62, %s3509_s4  ;;  %v2012_v62 = vld [vmem:[#allocation8 + $0x240] sm:$0xff] }
 0x7ea   :  { %2037 = vmatpush.msrb.mxu0 %v2012_v62  ;;  %2063 = vmatpush.msrb.mxu1 %v2007_v58  ;;  %v2214_v62 = vld [vmem:[#allocation8 + $0x290] sm:$0xff] }
 0x7ec   :  { %2038 = vmatpush.msrb.mxu0 %v2010_v46  ;;  %2064 = vmatpush.msrb.mxu1 %v2005_v42 }
 0x7ee   :  { %2039 = vmatpush.msrb.mxu0 %v2008_v41  ;;  %v875_v41 = vadd.f32 %v3692_v3, %v3690_v19  ;;  %v694_v3 = vadd.f32 %v3676_v14, %v3674_v12 }
 0x7f0   :  { %2040 = vmatpush.msrb.mxu0 %v2006_v44 }
 0x7f2   :  { %2041 = vmatpush.msrb.mxu0 %v2004_v50  ;;  %v2212_v50 = vld [vmem:[#allocation8 + $0x280] sm:$0xff] }
 0x833   :  { %v1948_v21 = vpop.xlane.xlu1 %1947 }
 0x834   :  { %3273 = vrcp.f32 %v1948_v21  ;;  %v1951_v34 = vpop.xlane.xlu0 %1950 }
 0x835   :  { %3275 = vrcp.f32 %v1951_v34  ;;  %v691_v34 = vadd.f32 %v3672_v4, %v3670_v1  ;;  %v2221_v1 = vld [vmem:[#allocation8 + $0x2c8] sm:$0xff]  ;;  %v2218_v4 = vld [vmem:[#allocation8 + $0x2b0] sm:$0xff] }
 0x83a   :  { %v3274_v37 = vpop.eup %3273 }
 0x83b   :  { %v3276_v38 = vpop.eup %3275  ;;  %v1954_v23 = vmul.f32 %v3274_v37, %v3270_v29  ;;  %v1067_v37 = vmul.f32 0.125, %v691_v34  ;;  %v2421_v34 = vld [vmem:[#allocation8 + $0x368] sm:$0xff] }
 0x83c   :  { %v1955_v40 = vmul.f32 %v3276_v38, %v3272_v36 }
 0x83d   :  { %v1956_v52 = vsel %vm3718_vm3, 0.0, %v1954_v23  ;;  %v2226_v23 = vld [vmem:[#allocation8 + $0x2f0] sm:$0xff] }
 0x83e   :  { %3185 = vmatmul.msk.f32.vlgmr.msra.gmra.mxu2 %vm1133_vm4, %v1956_v52  ;;  %v1957_v54 = vsel %vm3730_vm5, 0.0, %v1955_v40  ;;  %v2227_v40 = vld [vmem:[#allocation8 + $0x2f8] sm:$0xff]  ;;  %2242 = vmatpush.msra.mxu0 %v2226_v23 }
 0x83f   :  { %3186 = vmatmul.msk.f32.vlgmr.msra.gmra.mxu3 %vm1133_vm4, %v1957_v54  ;;  %2265 = vmatpush.msra.mxu1 %v2227_v40  ;;  %v2223_v52 = vld [vmem:[#allocation8 + $0x2d8] sm:$0xff] }
 0x840   :  { %2243 = vmatpush.msra.mxu0 %v2224_v47  ;;  %v2416_v47 = vld [vmem:[#allocation8 + $0x340] sm:$0xff] }
 0x841   :  { %2266 = vmatpush.msra.mxu1 %v2225_v26  ;;  %v2417_v26 = vld [vmem:[#allocation8 + $0x348] sm:$0xff] }
 0x842   :  { %2244 = vmatpush.msra.mxu0 %v2222_v51  ;;  %v2414_v51 = vld [vmem:[#allocation8 + $0x330] sm:$0xff] }
 0x843   :  { %2267 = vmatpush.msra.mxu1 %v2223_v52  ;;  %v2415_v52 = vld [vmem:[#allocation8 + $0x338] sm:$0xff] }
 0x845   :  { %2268 = vmatpush.msra.mxu1 %v2221_v1  ;;  %v2413_v1 = vld [vmem:[#allocation8 + $0x328] sm:$0xff] }
 0x84b   :  { %v2079_v61 = vpop.permute.xlu1 %2078 }
 0x84c   :  { %3191 = vmatpush.xpose.msk.msrb.mxu2 %vm1072_vm0, %v2079_v61 }
 0x853   :  { %v2077_v30 = vpop.permute.xlu1 %2076 }
 0x854   :  { %3192 = vmatmul.msk.f32.vlgmr.msrb.gmra.mxu2 %vm1072_vm0, %v2077_v30  ;;  %v878_v30 = vadd.f32 %v3698_v6, %v3696_v5  ;;  %v2213_v5 = vld [vmem:[#allocation8 + $0x288] sm:$0xff] }
 0x85b   :  { %v2105_v55 = vpop.permute.xlu1 %2104 }
 0x85c   :  { %3194 = vmatmul.msk.f32.vlgmr.msrb.gmra.mxu3 %vm1072_vm0, %v2105_v55  ;;  %v1071_v55 = vmul.f32 0.125, %v694_v3 }
 0x8c1   :  { %v1978_v57 = vpop.f32.mrf.mxu2 }
 0x8c2   :  { %3187 = vmatmul.msk.f32.vlgmr.msrb.gmra.mxu0 %vm1072_vm0, %v1978_v57  ;;  %3189 = vmatmul.msk.f32.vlgmr.msrb.gmra.mxu1 %vm1072_vm0, %v1978_v57  ;;  %v2001_v45 = vpop.f32.mrf.mxu3 }
 0x8ca   :  { %3188 = vmatmul.msk.f32.gmra.mxu0 %vm1072_vm0, %v2001_v45  ;;  %3190 = vmatmul.msk.f32.gmra.mxu1 %vm1072_vm0, %v2001_v45 }
 0x8d7   :  { %v2101_v56 = vpop.f32.mrf.mxu2 }
 0x8d8   :  { %v2132_v17 = vsel %vm3718_vm3, -1e+09, %v2101_v56 }
 0x8d9   :  { %v2134_v24 = vsel %vm1133_vm4, %v2132_v17, -inf }
 0x8da   :  { %2135 = vmax.xlane.f32.xlu0 %v2134_v24 }
 0x8df   :  { %v2129_v25 = vpop.f32.mrf.mxu3 }
 0x8e0   :  { %v2133_v11 = vsel %vm3730_vm5, -1e+09, %v2129_v25 }
 0x8e1   :  { %v2137_v13 = vsel %vm1133_vm4, %v2133_v11, -inf }
 0x8e2   :  { %2138 = vmax.xlane.f32.xlu1 %v2137_v13 }
 0x94d   :  { %v2136_v15 = vpop.xlane.xlu0 %2135 }
 0x94e   :  { %v2140_v32 = vsub.f32 %v2132_v17, %v2136_v15 }
 0x950   :  { %v2142_v35 = vmul.f32 1.442695, %v2140_v32 }
 0x952   :  { %3277 = vpow2.f32 %v2142_v35 }
 0x955   :  { %v2139_v60 = vpop.xlane.xlu1 %2138 }
 0x956   :  { %v2141_v9 = vsub.f32 %v2133_v11, %v2139_v60 }
 0x958   :  { %v3278_v29 = vpop.eup %3277  ;;  %v2144_v36 = vmul.f32 1.442695, %v2141_v9 }
 0x959   :  { %v2146_v20 = vsel %vm1133_vm4, %v3278_v29, 0.0 }
 0x95a   :  { %3279 = vpow2.f32 %v2144_v36  ;;  %2147 = vadd.xlane.f32.xlu0 %v2146_v20  ;;  %v2422_v20 = vld [vmem:[#allocation8 + $0x370] sm:$0xff] }
 0x960   :  { %v3280_v28 = vpop.eup %3279 }
 0x961   :  { %v2149_v21 = vsel %vm1133_vm4, %v3280_v28, 0.0 }
 0x962   :  { %2150 = vadd.xlane.f32.xlu2 %v2149_v21  ;;  %v2420_v21 = vld [vmem:[#allocation8 + $0x360] sm:$0xff] }
 0x96e   :  { %2159 = vrot.lane.b32.xlu0 %v3748_v18, %s3509_s4  ;;  %v2220_v18 = vld [vmem:[#allocation8 + $0x2c0] sm:$0xff] }
 0x96f   :  { %2245 = vmatpush.msra.mxu0 %v2220_v18  ;;  %v2412_v18 = vld [vmem:[#allocation8 + $0x320] sm:$0xff] }
 0x971   :  { %2246 = vmatpush.msra.mxu0 %v2218_v4  ;;  %v2410_v4 = vld [vmem:[#allocation8 + $0x310] sm:$0xff] }
 0x973   :  { %2247 = vmatpush.msra.mxu0 %v2216_v8 }
 0x975   :  { %2248 = vmatpush.msra.mxu0 %v2214_v62 }
 0x976   :  { %2186 = vrot.lane.b32.xlu0 %v3750_v22, %s3509_s4  ;;  %v2219_v22 = vld [vmem:[#allocation8 + $0x2b8] sm:$0xff] }
 0x977   :  { %2269 = vmatpush.msra.mxu1 %v2219_v22  ;;  %2249 = vmatpush.msra.mxu0 %v2212_v50  ;;  %v2411_v22 = vld [vmem:[#allocation8 + $0x318] sm:$0xff] }
 0x979   :  { %2270 = vmatpush.msra.mxu1 %v2217_v10  ;;  %2438 = vmatpush.msrb.mxu0 %v2422_v20  ;;  %v2622_v20 = vld [vmem:[#allocation8 + $0x3b0] sm:$0xff] }
 0x97a   :  { %2480 = vrot.lane.b32.xlu2 %v1067_v37, %s3509_s4 }
 0x97b   :  { %2271 = vmatpush.msra.mxu1 %v2215_v7  ;;  %2439 = vmatpush.msrb.mxu0 %v2420_v21  ;;  %v2621_v21 = vld [vmem:[#allocation8 + $0x3a8] sm:$0xff] }
 0x97d   :  { %2272 = vmatpush.msra.mxu1 %v2213_v5 }
 0x9cd   :  { %v2148_v38 = vpop.xlane.xlu0 %2147 }
 0x9ce   :  { %3281 = vrcp.f32 %v2148_v38  ;;  %v2419_v38 = vld [vmem:[#allocation8 + $0x358] sm:$0xff] }
 0x9d4   :  { %v3282_v54 = vpop.eup %3281 }
 0x9d5   :  { %v2151_v48 = vpop.xlane.xlu2 %2150  ;;  %v2154_v46 = vmul.f32 %v3282_v54, %v3278_v29 }
 0x9d6   :  { %3283 = vrcp.f32 %v2151_v48 }
 0x9d7   :  { %v2156_v39 = vsel %vm3718_vm3, 0.0, %v2154_v46 }
 0x9dc   :  { %v3284_v44 = vpop.eup %3283 }
 0x9dd   :  { %v2155_v58 = vmul.f32 %v3284_v44, %v3280_v28  ;;  %v2423_v28 = vld [vmem:[#allocation8 + $0x378] sm:$0xff]  ;;  %v2481_v23 = vpop.permute.xlu2 %2480  ;;  %v2409_v44 = vld [vmem:[#allocation8 + $0x308] sm:$0xff] }
 0x9de   :  { %2461 = vmatpush.msrb.mxu1 %v2423_v28  ;;  %v2623_v28 = vld [vmem:[#allocation8 + $0x3b8] sm:$0xff] }
 0x9df   :  { %v2157_v19 = vsel %vm3730_vm5, 0.0, %v2155_v58 }
 0x9e0   :  { %v2160_v49 = vpop.permute.xlu0 %2159  ;;  %2462 = vmatpush.msrb.mxu1 %v2421_v34 }
 0x9e1   :  { %2180 = vmatpush.msra.mxu2 %v2160_v49 }
 0x9e2   :  { %3195 = vmatmul.msk.f32.vlgmr.msra.gmra.mxu2 %vm1133_vm4, %v2156_v39  ;;  %2463 = vmatpush.msrb.mxu1 %v2419_v38  ;;  %v2408_v39 = vld [vmem:[#allocation8 + $0x300] sm:$0xff]  ;;  %v2618_v38 = vld [vmem:[#allocation8 + $0x390] sm:$0xff] }
 0x9e3   :  { %3201 = vmatpush.xpose.msk.msrb.mxu2 %vm1072_vm0, %v875_v41 }
 0x9e4   :  { %2464 = vmatpush.msrb.mxu1 %v2417_v26 }
 0x9e6   :  { %2465 = vmatpush.msrb.mxu1 %v2415_v52 }
 0x9e7   :  { %2380 = vmatpush.msra.mxu2 %v3713_v33 }
 0x9e8   :  { %v2187_v61 = vpop.permute.xlu0 %2186  ;;  %2466 = vmatpush.msrb.mxu1 %v2413_v1  ;;  %v2616_v1 = vld [vmem:[#allocation8 + $0x380] sm:$0xff] }
 0x9e9   :  { %2207 = vmatpush.msra.mxu3 %v2187_v61 }
 0x9ea   :  { %3196 = vmatmul.msk.f32.vlgmr.msra.gmra.mxu3 %vm1133_vm4, %v2157_v19  ;;  %3202 = vmatmul.msk.f32.vlgmr.msrb.gmra.mxu2 %vm1072_vm0, %v1067_v37  ;;  %v2418_v37 = vld [vmem:[#allocation8 + $0x350] sm:$0xff] }
 0x9eb   :  { %3203 = vmatpush.xpose.msk.msrb.mxu3 %vm1072_vm0, %v878_v30  ;;  %2440 = vmatpush.msrb.mxu0 %v2418_v37 }
 0x9ec   :  { %2467 = vmatpush.msrb.mxu1 %v2411_v22 }
 0x9ed   :  { %2441 = vmatpush.msrb.mxu0 %v2416_v47 }
 0x9ee   :  { %2468 = vmatpush.msrb.mxu1 %v2409_v44 }
 0x9ef   :  { %2403 = vmatpush.msra.mxu3 %v3724_v59  ;;  %2442 = vmatpush.msrb.mxu0 %v2414_v51 }
 0x9f1   :  { %2443 = vmatpush.msrb.mxu0 %v2412_v18 }
 0x9f2   :  { %3204 = vmatmul.msk.f32.vlgmr.msrb.gmra.mxu3 %vm1072_vm0, %v1071_v55 }
 0x9f3   :  { %2444 = vmatpush.msrb.mxu0 %v2410_v4  ;;  %v2617_v4 = vld [vmem:[#allocation8 + $0x388] sm:$0xff] }
 0x9f5   :  { %2445 = vmatpush.msrb.mxu0 %v2408_v39 }
 0xa65   :  { %v2182_v6 = vpop.f32.mrf.mxu2 }
 0xa66   :  { %3197 = vmatmul.msk.f32.vlgmr.msra.gmra.mxu0 %vm1072_vm0, %v2182_v6  ;;  %3199 = vmatmul.msk.f32.vlgmr.msra.gmra.mxu1 %vm1072_vm0, %v2182_v6 }
 0xa6d   :  { %v2209_v42 = vpop.f32.mrf.mxu3  ;;  %v2307_v57 = vpop.f32.mrf.mxu2 }
 0xa6e   :  { %v2336_v45 = vsel %vm3718_vm3, -1e+09, %v2307_v57  ;;  %3198 = vmatmul.msk.f32.gmra.mxu0 %vm1072_vm0, %v2209_v42  ;;  %3200 = vmatmul.msk.f32.gmra.mxu1 %vm1072_vm0, %v2209_v42 }
 0xa6f   :  { %v2338_v12 = vsel %vm1133_vm4, %v2336_v45, -inf }
 0xa70   :  { %2339 = vmax.xlane.f32.xlu1 %v2338_v12 }
 0xa75   :  { %v2333_v14 = vpop.f32.mrf.mxu3 }
 0xa76   :  { %v2337_v56 = vsel %vm3730_vm5, -1e+09, %v2333_v14 }
 0xa77   :  { %v2341_v17 = vsel %vm1133_vm4, %v2337_v56, -inf }
 0xa78   :  { %2342 = vmax.xlane.f32.xlu0 %v2341_v17 }
 0xa89   :  { %2482 = vrot.lane.b32.xlu1 %v875_v41, %s3509_s4 }
 0xae3   :  { %v2340_v24 = vpop.xlane.xlu1 %2339 }
 0xae4   :  { %v2344_v25 = vsub.f32 %v2336_v45, %v2340_v24 }
 0xae6   :  { %v2346_v11 = vmul.f32 1.442695, %v2344_v25 }
 0xae8   :  { %3285 = vpow2.f32 %v2346_v11 }
 0xaeb   :  { %v2343_v13 = vpop.xlane.xlu0 %2342 }
 0xaec   :  { %v2345_v15 = vsub.f32 %v2337_v56, %v2343_v13  ;;  %v2631_v13 = vld [vmem:[#allocation8 + $0x3f8] sm:$0xff] }
 0xaed   :  { %2669 = vmatpush.msra.mxu1 %v2631_v13 }
 0xaee   :  { %v2348_v32 = vmul.f32 1.442695, %v2345_v15  ;;  %v3286_v35 = vpop.eup %3285  ;;  %v2628_v15 = vld [vmem:[#allocation8 + $0x3e0] sm:$0xff] }
 0xaef   :  { %v2350_v60 = vsel %vm1133_vm4, %v3286_v35, 0.0 }
 0xaf0   :  { %3287 = vpow2.f32 %v2348_v32  ;;  %2351 = vadd.xlane.f32.xlu1 %v2350_v60  ;;  %v2629_v32 = vld [vmem:[#allocation8 + $0x3e8] sm:$0xff]  ;;  %v2626_v60 = vld [vmem:[#allocation8 + $0x3d0] sm:$0xff] }
 0xaf1   :  { %2670 = vmatpush.msra.mxu1 %v2629_v32 }
 0xaf6   :  { %v3288_v9 = vpop.eup %3287 }
 0xaf7   :  { %v2353_v29 = vsel %vm1133_vm4, %v3288_v9, 0.0 }
 0xaf8   :  { %2354 = vadd.xlane.f32.xlu2 %v2353_v29  ;;  %v2624_v29 = vld [vmem:[#allocation8 + $0x3c0] sm:$0xff] }
 0xafb   :  { %v2483_v36 = vpop.permute.xlu1 %2482 }
 0xafc   :  { %3211 = vmatpush.xpose.msk.msrb.mxu2 %vm1072_vm0, %v2483_v36  ;;  %v2625_v36 = vld [vmem:[#allocation8 + $0x3c8] sm:$0xff] }
 0xb09   :  { %2510 = vrot.lane.b32.xlu1 %v878_v30, %s3509_s4 }
 0xb10   :  { %2508 = vrot.lane.b32.xlu2 %v1071_v55, %s3509_s4 }
 0xb63   :  { %v2352_v40 = vpop.xlane.xlu1 %2351 }
 0xb64   :  { %3289 = vrcp.f32 %v2352_v40 }
 0xb6a   :  { %v3290_v48 = vpop.eup %3289 }
 0xb6b   :  { %v2355_v54 = vpop.xlane.xlu2 %2354  ;;  %v2358_v8 = vmul.f32 %v3290_v48, %v3286_v35  ;;  %v2043_v48 = vpop.f32.mrf.mxu0 }
 0xb6c   :  { %3291 = vrcp.f32 %v2355_v54  ;;  %v2066_v54 = vpop.f32.mrf.mxu1 }
 0xb6d   :  { %v2360_v10 = vsel %vm3718_vm3, 0.0, %v2358_v8 }
 0xb6e   :  { %3205 = vmatmul.msk.f32.vlgmr.msra.gmra.mxu2 %vm1133_vm4, %v2360_v10 }
 0xb72   :  { %v3292_v62 = vpop.eup %3291 }
 0xb73   :  { %v2359_v7 = vmul.f32 %v3292_v62, %v3288_v9  ;;  %v2509_v41 = vpop.permute.xlu2 %2508  ;;  %v2627_v9 = vld [vmem:[#allocation8 + $0x3d8] sm:$0xff]  ;;  %v2046_v2 = vpop.f32.mrf.mxu0 }
 0xb74   :  { %2671 = vmatpush.msra.mxu1 %v2627_v9  ;;  %v2069_v8 = vpop.f32.mrf.mxu1  ;;  %v3318_v9 = vld [vmem:[#allocation2 + $0x18] sm:$0xff] }
 0xb75   :  { %v2361_v46 = vsel %vm3730_vm5, 0.0, %v2359_v7 }
 0xb76   :  { %3206 = vmatmul.msk.f32.vlgmr.msra.gmra.mxu3 %vm1133_vm4, %v2361_v46  ;;  %3212 = vmatmul.msk.f32.vlgmr.msrb.gmra.mxu2 %vm1072_vm0, %v2481_v23  ;;  %v2619_v23 = vld [vmem:[#allocation8 + $0x398] sm:$0xff] }
 0xb77   :  { %2672 = vmatpush.msra.mxu1 %v2625_v36 }
 0xb79   :  { %2673 = vmatpush.msra.mxu1 %v2623_v28 }
 0xb7b   :  { %v2511_v49 = vpop.permute.xlu1 %2510  ;;  %2674 = vmatpush.msra.mxu1 %v2621_v21  ;;  %v2251_v10 = vpop.f32.mrf.mxu0 }
 0xb7c   :  { %3213 = vmatpush.xpose.msk.msrb.mxu3 %vm1072_vm0, %v2511_v49  ;;  %v2274_v62 = vpop.f32.mrf.mxu1 }
 0xb7d   :  { %2675 = vmatpush.msra.mxu1 %v2619_v23  ;;  %v2812_v23 = vld [vmem:[#allocation10 + $0x1f8] sm:$0xff] }
 0xb7f   :  { %3214 = vmatmul.msk.f32.vlgmr.msrb.gmra.mxu3 %vm1072_vm0, %v2509_v41  ;;  %2676 = vmatpush.msra.mxu1 %v2617_v4  ;;  %v2776_v4 = vld [vmem:[#allocation10 + $0xd8] sm:$0xff] }
 0xb83   :  { %v2254_v7 = vpop.f32.mrf.mxu0 }
 0xb84   :  { %v2277_v46 = vpop.f32.mrf.mxu1 }
 0xbf1   :  { %v2382_v58 = vpop.f32.mrf.mxu2 }
 0xbf2   :  { %3207 = vmatmul.msk.f32.vlgmr.msrb.gmra.mxu0 %vm1072_vm0, %v2382_v58  ;;  %3209 = vmatmul.msk.f32.vlgmr.msrb.gmra.mxu1 %vm1072_vm0, %v2382_v58  ;;  %v1876_v58 = vadd.f32 %v3889_v53, %v3846_v63  ;;  %v2074_v63 = vadd.f32 %v2046_v2, %v3897_v43 }
 0xbf3   :  { %2882 = vmatpush.msrb.mxu1 %v2812_v23  ;;  %v2753_v23 = vld [vmem:[#allocation10 + $0x20] sm:$0xff] }
 0xbf4   :  { %v2282_v53 = vadd.f32 %v2254_v7, %v2074_v63  ;;  %v2765_v63 = vld [vmem:[#allocation10 + $0x80] sm:$0xff] }
 0xbf9   :  { %v2405_v61 = vpop.f32.mrf.mxu3  ;;  %v2505_v30 = vpop.f32.mrf.mxu2 }
 0xbfa   :  { %v2536_v19 = vsel %vm3718_vm3, -1e+09, %v2505_v30  ;;  %3208 = vmatmul.msk.f32.gmra.mxu0 %vm1072_vm0, %v2405_v61  ;;  %3210 = vmatmul.msk.f32.gmra.mxu1 %vm1072_vm0, %v2405_v61  ;;  %v1877_v61 = vadd.f32 %v3891_v16, %v3848_v0  ;;  %v2072_v30 = vadd.f32 %v2043_v48, %v1876_v58  ;;  %v2075_v0 = vadd.f32 %v2069_v8, %v3899_v27  ;;  %v2773_v48 = vld [vmem:[#allocation10 + $0xc0] sm:$0xff]  ;;  %v2774_v8 = vld [vmem:[#allocation10 + $0xc8] sm:$0xff] }
 0xbfb   :  { %v2538_v3 = vsel %vm1133_vm4, %v2536_v19, -inf }
 0xbfc   :  { %2539 = vmax.xlane.f32.xlu0 %v2538_v3  ;;  %v2280_v3 = vadd.f32 %v2251_v10, %v2072_v30  ;;  %v2283_v16 = vadd.f32 %v2277_v46, %v2075_v0  ;;  %v2806_v10 = vld [vmem:[#allocation10 + $0x1c8] sm:$0xff]  ;;  %v2797_v0 = vld [vmem:[#allocation10 + $0x180] sm:$0xff] }
 0xc02   :  { %v2533_v55 = vpop.f32.mrf.mxu3 }
 0xc03   :  { %v2537_v50 = vsel %vm3730_vm5, -1e+09, %v2533_v55 }
 0xc04   :  { %v2541_v5 = vsel %vm1133_vm4, %v2537_v50, -inf }
 0xc05   :  { %2542 = vmax.xlane.f32.xlu1 %v2541_v5 }
 0xc10   :  { %2563 = vrot.lane.b32.xlu0 %v3713_v33, %s3509_s4  ;;  %v2630_v33 = vld [vmem:[#allocation8 + $0x3f0] sm:$0xff] }
 0xc11   :  { %2646 = vmatpush.msra.mxu0 %v2630_v33 }
 0xc13   :  { %2647 = vmatpush.msra.mxu0 %v2628_v15 }
 0xc15   :  { %2648 = vmatpush.msra.mxu0 %v2626_v60 }
 0xc17   :  { %2649 = vmatpush.msra.mxu0 %v2624_v29 }
 0xc19   :  { %2650 = vmatpush.msra.mxu0 %v2622_v20  ;;  %v3511_v20 = vmov 256.0  }
 0xc6f   :  { %v2540_v6 = vpop.xlane.xlu0 %2539  ;;  %v2447_v49 = vpop.f32.mrf.mxu0 }
 0xc70   :  { %v2544_v42 = vsub.f32 %v2536_v19, %v2540_v6  ;;  %v2470_v41 = vpop.f32.mrf.mxu1  ;;  %v2073_v19 = vadd.f32 %v2066_v54, %v1877_v61  ;;  %v2805_v54 = vld [vmem:[#allocation10 + $0x1c0] sm:$0xff] }
 0xc72   :  { %v2546_v57 = vmul.f32 1.442695, %v2544_v42  ;;  %v2281_v55 = vadd.f32 %v2274_v62, %v2073_v19 }
 0xc74   :  { %3293 = vpow2.f32 %v2546_v57  ;;  %v2477_v5 = vadd.f32 %v2470_v41, %v2281_v55  ;;  %v2771_v55 = vld [vmem:[#allocation10 + $0xb0] sm:$0xff] }
 0xc77   :  { %v2450_v39 = vpop.f32.mrf.mxu0 }
 0xc78   :  { %v2543_v45 = vpop.xlane.xlu1 %2542  ;;  %v2473_v44 = vpop.f32.mrf.mxu1 }
 0xc79   :  { %v2545_v12 = vsub.f32 %v2537_v50, %v2543_v45  ;;  %v2476_v50 = vadd.f32 %v2447_v49, %v2280_v3 }
 0xc7a   :  { %v3294_v14 = vpop.eup %3293 }
 0xc7b   :  { %v2548_v56 = vmul.f32 1.442695, %v2545_v12  ;;  %v2550_v17 = vsel %vm1133_vm4, %v3294_v14, 0.0  ;;  %v3315_v12 = vld [vmem:[#allocation2] sm:$0xff] }
 0xc7c   :  { %2551 = vadd.xlane.f32.xlu2 %v2550_v17 }
 0xc7d   :  { %3295 = vpow2.f32 %v2548_v56  ;;  %v3316_v56 = vld [vmem:[#allocation2 + $0x8] sm:$0xff] }
 0xc82   :  { %v2564_v24 = vpop.permute.xlu0 %2563 }
 0xc83   :  { %v3296_v25 = vpop.eup %3295  ;;  %2584 = vmatpush.msra.mxu2 %v2564_v24 }
 0xc84   :  { %v2553_v11 = vsel %vm1133_vm4, %v3296_v25, 0.0 }
 0xc85   :  { %2554 = vadd.xlane.f32.xlu0 %v2553_v11  ;;  %v2479_v11 = vadd.f32 %v2473_v44, %v2283_v16  ;;  %v2798_v16 = vld [vmem:[#allocation10 + $0x188] sm:$0xff] }
 0xc99   :  { %2590 = vrot.lane.b32.xlu0 %v3724_v59, %s3509_s4  ;;  %v2620_v59 = vld [vmem:[#allocation8 + $0x3a0] sm:$0xff] }
 0xc9a   :  { %2651 = vmatpush.msra.mxu0 %v2620_v59 }
 0xc9c   :  { %2652 = vmatpush.msra.mxu0 %v2618_v38  ;;  %v2780_v38 = vld [vmem:[#allocation10 + $0xf8] sm:$0xff] }
 0xc9e   :  { %2653 = vmatpush.msra.mxu0 %v2616_v1  ;;  %v2807_v1 = vld [vmem:[#allocation10 + $0x1d0] sm:$0xff] }
 0xca0   :  { %2859 = vmatpush.msrb.mxu0 %v2780_v38  ;;  %v2788_v38 = vld [vmem:[#allocation10 + $0x138] sm:$0xff] }
 0xcef   :  { %v2552_v35 = vpop.xlane.xlu2 %2551 }
 0xcf0   :  { %3297 = vrcp.f32 %v2552_v35  ;;  %v3317_v35 = vld [vmem:[#allocation2 + $0x10] sm:$0xff] }
 0xcf6   :  { %v3298_v34 = vpop.eup %3297 }
 0xcf7   :  { %v2558_v37 = vmul.f32 %v3298_v34, %v3294_v14  ;;  %v2779_v34 = vld [vmem:[#allocation10 + $0xf0] sm:$0xff] }
 0xcf8   :  { %v2555_v47 = vpop.xlane.xlu0 %2554  ;;  %2813 = vmatpush.msrb.mxu2 %v2779_v34  ;;  %v2787_v34 = vld [vmem:[#allocation10 + $0x130] sm:$0xff] }
 0xcf9   :  { %v2560_v40 = vsel %vm3718_vm3, 0.0, %v2558_v37  ;;  %3299 = vrcp.f32 %v2555_v47  ;;  %v2811_v37 = vld [vmem:[#allocation10 + $0x1f0] sm:$0xff]  ;;  %v2809_v47 = vld [vmem:[#allocation10 + $0x1e0] sm:$0xff] }
 0xcfa   :  { %3215 = vmatmul.msk.f32.vlgmr.msra.gmra.mxu2 %vm1133_vm4, %v2560_v40  ;;  %3301 = vrcp.f32 %v3511_v20  ;;  %v2777_v40 = vld [vmem:[#allocation10 + $0xe0] sm:$0xff]  ;;  %v2792_v20 = vld [vmem:[#allocation10 + $0x158] sm:$0xff] }
 0xcfb   :  { %2814 = vmatpush.msrb.mxu2 %v2777_v40  ;;  %v2785_v40 = vld [vmem:[#allocation10 + $0x120] sm:$0xff] }
 0xcff   :  { %v3300_v26 = vpop.eup %3299 }
 0xd00   :  { %v2559_v51 = vmul.f32 %v3300_v26, %v3296_v25  ;;  %v2478_v25 = vadd.f32 %v2450_v39, %v2282_v53  ;;  %v3302_v28 = vpop.eup %3301  ;;  %v2766_v53 = vld [vmem:[#allocation10 + $0x88] sm:$0xff] }
 0xd01   :  { %v2699_v43 = vmul.f32 256.0, %v3302_v28  ;;  %vm2703_vm6 = vweird.f32 %v3302_v28 }
 0xd02   :  { %v2561_v18 = vsel %vm3730_vm5, 0.0, %v2559_v51  ;;  %v2778_v51 = vld [vmem:[#allocation10 + $0xe8] sm:$0xff] }
 0xd03   :  { %v2700_v59 = vsub.f32 1.0, %v2699_v43  ;;  %2860 = vmatpush.msrb.mxu0 %v2778_v51  ;;  %v2789_v43 = vld [vmem:[#allocation10 + $0x140] sm:$0xff]  ;;  %v2786_v51 = vld [vmem:[#allocation10 + $0x128] sm:$0xff] }
 0xd05   :  { %v2701_v27 = vmul.f32 %v3302_v28, %v2700_v59  ;;  %2861 = vmatpush.msrb.mxu0 %v2776_v4  ;;  %v2758_v59 = vld [vmem:[#allocation10 + $0x48] sm:$0xff]  ;;  %v2784_v4 = vld [vmem:[#allocation10 + $0x118] sm:$0xff] }
 0xd07   :  { %v2702_v21 = vadd.f32 %v3302_v28, %v2701_v27  ;;  %2862 = vmatpush.msrb.mxu0 %v2774_v8  ;;  %v2790_v27 = vld [vmem:[#allocation10 + $0x148] sm:$0xff] }
 0xd09   :  { %v4010_v26 = vsel %vm2703_vm6, %v3302_v28, %v2702_v21  ;;  %v2757_v28 = vld [vmem:[#allocation10 + $0x40] sm:$0xff]  ;;  %v2755_v21 = vld [vmem:[#allocation10 + $0x30] sm:$0xff] }
 0xd0b   :  { %v2591_v52 = vpop.permute.xlu0 %2590 }
 0xd0c   :  { %2611 = vmatpush.msra.mxu3 %v2591_v52  ;;  %v2810_v52 = vld [vmem:[#allocation10 + $0x1e8] sm:$0xff] }
 0xd0d   :  { %3216 = vmatmul.msk.f32.vlgmr.msra.gmra.mxu3 %vm1133_vm4, %v2561_v18  ;;  %v2775_v18 = vld [vmem:[#allocation10 + $0xd0] sm:$0xff]  ;;  %2883 = vmatpush.msrb.mxu1 %v2810_v52 }
 0xd0e   :  { %2836 = vmatpush.msrb.mxu3 %v2811_v37  ;;  %2815 = vmatpush.msrb.mxu2 %v2775_v18  ;;  %v2756_v37 = vld [vmem:[#allocation10 + $0x38] sm:$0xff]  ;;  %v2751_v52 = vld [vmem:[#allocation10 + $0x10] sm:$0xff] }
 0xd0f   :  { %v2783_v18 = vld [vmem:[#allocation10 + $0x110] sm:$0xff] }
 0xd10   :  { %2837 = vmatpush.msrb.mxu3 %v2809_v47  ;;  %2816 = vmatpush.msrb.mxu2 %v2773_v48  ;;  %v2754_v47 = vld [vmem:[#allocation10 + $0x28] sm:$0xff] }
 0xd11   :  { %v2750_v48 = vld [vmem:[#allocation10 + $0x8] sm:$0xff] }
 0xd12   :  { %2838 = vmatpush.msrb.mxu3 %v2807_v1  ;;  %2817 = vmatpush.msrb.mxu2 %v2771_v55  ;;  %v2752_v1 = vld [vmem:[#allocation10 + $0x18] sm:$0xff] }
 0xd13   :  { %v2968_v55 = vld [vmem:[#allocation11 + $0x1d8] sm:$0xff] }
 0xd14   :  { %2839 = vmatpush.msrb.mxu3 %v2805_v54  ;;  %v2782_v54 = vld [vmem:[#allocation10 + $0x108] sm:$0xff] }
 0xd7d   :  { %v2586_v31 = vpop.f32.mrf.mxu2 }
 0xd7e   :  { %3217 = vmatmul.msk.f32.vlgmr.msra.gmra.mxu0 %vm1072_vm0, %v2586_v31  ;;  %3219 = vmatmul.msk.f32.vlgmr.msra.gmra.mxu1 %vm1072_vm0, %v2586_v31  ;;  %v2808_v31 = vld [vmem:[#allocation10 + $0x1d8] sm:$0xff] }
 0xd7f   :  { %2884 = vmatpush.msrb.mxu1 %v2808_v31  ;;  %v2749_v31 = vld [vmem:[#allocation10] sm:$0xff] }
 0xd81   :  { %2885 = vmatpush.msrb.mxu1 %v2806_v10 }
 0xd90   :  { %v2613_v22 = vpop.f32.mrf.mxu3 }
 0xd91   :  { %3218 = vmatmul.msk.f32.gmra.mxu0 %vm1072_vm0, %v2613_v22  ;;  %3220 = vmatmul.msk.f32.gmra.mxu1 %vm1072_vm0, %v2613_v22 }
 0xdfb   :  { %v2655_v6 = vpop.f32.mrf.mxu0  ;;  %v2678_v42 = vpop.f32.mrf.mxu1 }
 0xdfc   :  { %v2684_v57 = vadd.f32 %v2655_v6, %v2476_v50  ;;  %v2685_v45 = vadd.f32 %v2678_v42, %v2477_v5  ;;  %v2803_v50 = vld [vmem:[#allocation10 + $0x1b0] sm:$0xff]  ;;  %v2772_v5 = vld [vmem:[#allocation10 + $0xb8] sm:$0xff]  ;;  %v2769_v42 = vld [vmem:[#allocation10 + $0xa0] sm:$0xff] }
 0xdfd   :  { %2840 = vmatpush.msrb.mxu3 %v2803_v50  ;;  %v2804_v6 = vld [vmem:[#allocation10 + $0x1b8] sm:$0xff]  ;;  %2863 = vmatpush.msrb.mxu0 %v2772_v5  ;;  %v2939_v50 = vld [vmem:[#allocation11 + $0xf0] sm:$0xff] }
 0xdfe   :  { %v2688_v14 = vadd.f32 %v3315_v12, %v2684_v57  ;;  %v2689_v17 = vadd.f32 %v3316_v56, %v2685_v45  ;;  %2886 = vmatpush.msrb.mxu1 %v2804_v6  ;;  %v2801_v57 = vld [vmem:[#allocation10 + $0x1a0] sm:$0xff]  ;;  %v2770_v45 = vld [vmem:[#allocation10 + $0xa8] sm:$0xff]  ;;  %2818 = vmatpush.msrb.mxu2 %v2769_v42  ;;  %v2799_v56 = vld [vmem:[#allocation10 + $0x190] sm:$0xff] }
 0xdff   :  { %2841 = vmatpush.msrb.mxu3 %v2801_v57  ;;  %v2802_v12 = vld [vmem:[#allocation10 + $0x1a8] sm:$0xff]  ;;  %2864 = vmatpush.msrb.mxu0 %v2770_v45  ;;  %v2940_v6 = vld [vmem:[#allocation11 + $0xf8] sm:$0xff]  ;;  %v2937_v42 = vld [vmem:[#allocation11 + $0xe0] sm:$0xff] }
 0xe00   :  { %v2692_v24 = vadd.f32 %v2689_v17, %v2688_v14  ;;  %2887 = vmatpush.msrb.mxu1 %v2802_v12  ;;  %v2965_v57 = vld [vmem:[#allocation11 + $0x1c0] sm:$0xff]  ;;  %v2966_v45 = vld [vmem:[#allocation11 + $0x1c8] sm:$0xff] }
 0xe01   :  { %2842 = vmatpush.msrb.mxu3 %v2799_v56  ;;  %v2938_v12 = vld [vmem:[#allocation11 + $0xe8] sm:$0xff]  ;;  %v2935_v56 = vld [vmem:[#allocation11 + $0xd0] sm:$0xff] }
 0xe02   :  { %2693 = vadd.xlane.f32.xlu0 %v2692_v24  ;;  %v2800_v24 = vld [vmem:[#allocation10 + $0x198] sm:$0xff] }
 0xe03   :  { %2888 = vmatpush.msrb.mxu1 %v2800_v24  ;;  %2843 = vmatpush.msrb.mxu3 %v2797_v0  ;;  %v2964_v0 = vld [vmem:[#allocation11 + $0x1b8] sm:$0xff] }
 0xe05   :  { %2889 = vmatpush.msrb.mxu1 %v2798_v16 }
 0xe0e   :  { %v2658_v33 = vpop.f32.mrf.mxu0  ;;  %v2681_v13 = vpop.f32.mrf.mxu1 }
 0xe0f   :  { %v2686_v15 = vadd.f32 %v2658_v33, %v2478_v25  ;;  %v2687_v32 = vadd.f32 %v2681_v13, %v2479_v11  ;;  %v2763_v25 = vld [vmem:[#allocation10 + $0x70] sm:$0xff]  ;;  %v2764_v33 = vld [vmem:[#allocation10 + $0x78] sm:$0xff] }
 0xe10   :  { %v2795_v11 = vld [vmem:[#allocation10 + $0x170] sm:$0xff]  ;;  %v2796_v13 = vld [vmem:[#allocation10 + $0x178] sm:$0xff] }
 0xe11   :  { %v2690_v60 = vadd.f32 %v3317_v35, %v2686_v15  ;;  %v2691_v29 = vadd.f32 %v3318_v9, %v2687_v32  ;;  %2844 = vmatpush.msrb.mxu3 %v2795_v11  ;;  %2890 = vmatpush.msrb.mxu1 %v2796_v13  ;;  %v2761_v15 = vld [vmem:[#allocation10 + $0x60] sm:$0xff]  ;;  %v2762_v35 = vld [vmem:[#allocation10 + $0x68] sm:$0xff]  ;;  %v2759_v9 = vld [vmem:[#allocation10 + $0x50] sm:$0xff] }
 0xe12   :  { %v2793_v32 = vld [vmem:[#allocation10 + $0x160] sm:$0xff]  ;;  %v2934_v11 = vld [vmem:[#allocation11 + $0xc8] sm:$0xff] }
 0xe13   :  { %v2695_v36 = vadd.f32 %v2691_v29, %v2690_v60  ;;  %2845 = vmatpush.msrb.mxu3 %v2793_v32  ;;  %v2962_v13 = vld [vmem:[#allocation11 + $0x1a8] sm:$0xff] }
 0xe15   :  { %2696 = vadd.xlane.f32.xlu1 %v2695_v36  ;;  %v2760_v36 = vld [vmem:[#allocation10 + $0x58] sm:$0xff] }
 0xe75   :  { %v2694_v22 = vpop.xlane.xlu0 %2693 }
 0xe76   :  { %v2705_v2 = vmul.f32 %v4010_v26, %v2694_v22  ;;  %v2781_v22 = vld [vmem:[#allocation10 + $0x100] sm:$0xff] }
 0xe78   :  { %v4013_v62 = vsub.f32 %v2688_v14, %v2705_v2  ;;  %v4015_v7 = vsub.f32 %v2689_v17, %v2705_v2  ;;  %v2767_v14 = vld [vmem:[#allocation10 + $0x90] sm:$0xff]  ;;  %v2768_v17 = vld [vmem:[#allocation10 + $0x98] sm:$0xff] }
 0xe79   :  { %2819 = vmatpush.msrb.mxu2 %v2767_v14  ;;  %2865 = vmatpush.msrb.mxu0 %v2768_v17  ;;  %v2936_v17 = vld [vmem:[#allocation11 + $0xd8] sm:$0xff] }
 0xe7a   :  { %v2711_v46 = vmul.f32 %v4013_v62, %v4013_v62  ;;  %v2712_v49 = vmul.f32 %v4015_v7, %v4015_v7 }
 0xe7b   :  { %2820 = vmatpush.msrb.mxu2 %v2765_v63  ;;  %2866 = vmatpush.msrb.mxu0 %v2766_v53  ;;  %v2963_v63 = vld [vmem:[#allocation11 + $0x1b0] sm:$0xff] }
 0xe7c   :  { %v2715_v41 = vadd.f32 %v2712_v49, %v2711_v46 }
 0xe7d   :  { %2821 = vmatpush.msrb.mxu2 %v2763_v25  ;;  %2867 = vmatpush.msrb.mxu0 %v2764_v33  ;;  %v2933_v25 = vld [vmem:[#allocation11 + $0xc0] sm:$0xff] }
 0xe7e   :  { %2716 = vadd.xlane.f32.xlu2 %v2715_v41  ;;  %v2971_v41 = vld [vmem:[#allocation11 + $0x1f0] sm:$0xff]  ;;  %v2961_v33 = vld [vmem:[#allocation11 + $0x1a0] sm:$0xff] }
 0xe7f   :  { %2822 = vmatpush.msrb.mxu2 %v2761_v15  ;;  %2868 = vmatpush.msrb.mxu0 %v2762_v35 }
 0xe81   :  { %2823 = vmatpush.msrb.mxu2 %v2759_v9  ;;  %2869 = vmatpush.msrb.mxu0 %v2760_v36  ;;  %v2959_v9 = vld [vmem:[#allocation11 + $0x190] sm:$0xff] }
 0xe82   :  { %v2931_v36 = vld [vmem:[#allocation11 + $0xb0] sm:$0xff] }
 0xe83   :  { %2824 = vmatpush.msrb.mxu2 %v2757_v28  ;;  %2870 = vmatpush.msrb.mxu0 %v2758_v59  ;;  %v2929_v28 = vld [vmem:[#allocation11 + $0xa0] sm:$0xff]  ;;  %v2955_v59 = vld [vmem:[#allocation11 + $0x170] sm:$0xff] }
 0xe85   :  { %2825 = vmatpush.msrb.mxu2 %v2755_v21  ;;  %2871 = vmatpush.msrb.mxu0 %v2756_v37  ;;  %v2927_v21 = vld [vmem:[#allocation11 + $0x90] sm:$0xff] }
 0xe87   :  { %2826 = vmatpush.msrb.mxu2 %v2753_v23  ;;  %2872 = vmatpush.msrb.mxu0 %v2754_v47  ;;  %v2954_v23 = vld [vmem:[#allocation11 + $0x168] sm:$0xff]  ;;  %v2925_v47 = vld [vmem:[#allocation11 + $0x80] sm:$0xff] }
 0xe88   :  { %v2697_v39 = vpop.xlane.xlu1 %2696 }
 0xe89   :  { %v2706_v44 = vmul.f32 %v4010_v26, %v2697_v39  ;;  %2827 = vmatpush.msrb.mxu2 %v2751_v52  ;;  %2873 = vmatpush.msrb.mxu0 %v2752_v1  ;;  %v2972_v39 = vld [vmem:[#allocation11 + $0x1f8] sm:$0xff]  ;;  %v2951_v52 = vld [vmem:[#allocation11 + $0x150] sm:$0xff] }
 0xe8b   :  { %v4022_v58 = vsub.f32 %v2690_v60, %v2706_v44  ;;  %v4024_v61 = vsub.f32 %v2691_v29, %v2706_v44  ;;  %v2794_v60 = vld [vmem:[#allocation10 + $0x168] sm:$0xff]  ;;  %v2791_v29 = vld [vmem:[#allocation10 + $0x150] sm:$0xff]  ;;  %2828 = vmatpush.msrb.mxu2 %v2749_v31  ;;  %2874 = vmatpush.msrb.mxu0 %v2750_v48  ;;  %v2924_v31 = vld [vmem:[#allocation11 + $0x78] sm:$0xff] }
 0xe8c   :  { %2891 = vmatpush.msrb.mxu1 %v2794_v60  ;;  %2846 = vmatpush.msrb.mxu3 %v2791_v29  ;;  %v2960_v29 = vld [vmem:[#allocation11 + $0x198] sm:$0xff]  ;;  %v2950_v48 = vld [vmem:[#allocation11 + $0x148] sm:$0xff] }
 0xe8d   :  { %v2713_v30 = vmul.f32 %v4022_v58, %v4022_v58  ;;  %v2714_v19 = vmul.f32 %v4024_v61, %v4024_v61  ;;  %2973 = vmatpush.msra.mxu2 %v2939_v50  ;;  %3019 = vmatpush.msra.mxu0 %v2940_v6  ;;  %v2946_v50 = vld [vmem:[#allocation11 + $0x128] sm:$0xff]  ;;  %v2944_v6 = vld [vmem:[#allocation11 + $0x118] sm:$0xff] }
 0xe8e   :  { %2892 = vmatpush.msrb.mxu1 %v2792_v20  ;;  %2847 = vmatpush.msrb.mxu3 %v2789_v43  ;;  %v2932_v20 = vld [vmem:[#allocation11 + $0xb8] sm:$0xff]  ;;  %v2930_v43 = vld [vmem:[#allocation11 + $0xa8] sm:$0xff] }
 0xe8f   :  { %v2718_v3 = vadd.f32 %v2714_v19, %v2713_v30  ;;  %v2969_v30 = vld [vmem:[#allocation11 + $0x1e0] sm:$0xff]  ;;  %v2970_v19 = vld [vmem:[#allocation11 + $0x1e8] sm:$0xff]  ;;  %2974 = vmatpush.msra.mxu2 %v2937_v42  ;;  %3020 = vmatpush.msra.mxu0 %v2938_v12  ;;  %v2915_v42 = vld [vmem:[#allocation11 + $0x30] sm:$0xff] }
 0xe90   :  { %2893 = vmatpush.msrb.mxu1 %v2790_v27  ;;  %2848 = vmatpush.msrb.mxu3 %v2787_v34  ;;  %v2956_v27 = vld [vmem:[#allocation11 + $0x178] sm:$0xff]  ;;  %v2942_v12 = vld [vmem:[#allocation11 + $0x108] sm:$0xff] }
 0xe91   :  { %2719 = vadd.xlane.f32.xlu1 %v2718_v3  ;;  %v2967_v3 = vld [vmem:[#allocation11 + $0x1d0] sm:$0xff]  ;;  %2975 = vmatpush.msra.mxu2 %v2935_v56  ;;  %v2928_v34 = vld [vmem:[#allocation11 + $0x98] sm:$0xff]  ;;  %v2914_v56 = vld [vmem:[#allocation11 + $0x28] sm:$0xff] }
 0xe92   :  { %2894 = vmatpush.msrb.mxu1 %v2788_v38  ;;  %2849 = vmatpush.msrb.mxu3 %v2785_v40  ;;  %v2953_v38 = vld [vmem:[#allocation11 + $0x160] sm:$0xff] }
 0xe93   :  { %3021 = vmatpush.msra.mxu0 %v2936_v17  ;;  %2976 = vmatpush.msra.mxu2 %v2933_v25  ;;  %v2911_v17 = vld [vmem:[#allocation11 + $0x10] sm:$0xff] }
 0xe94   :  { %2895 = vmatpush.msrb.mxu1 %v2786_v51  ;;  %2850 = vmatpush.msrb.mxu3 %v2783_v18  ;;  %v2926_v51 = vld [vmem:[#allocation11 + $0x88] sm:$0xff]  ;;  %v2952_v18 = vld [vmem:[#allocation11 + $0x158] sm:$0xff] }
 0xe95   :  { %3022 = vmatpush.msra.mxu0 %v2934_v11  ;;  %2977 = vmatpush.msra.mxu2 %v2931_v36 }
 0xe96   :  { %2896 = vmatpush.msrb.mxu1 %v2784_v4  ;;  %2851 = vmatpush.msrb.mxu3 %v2781_v22  ;;  %v2923_v4 = vld [vmem:[#allocation11 + $0x70] sm:$0xff]  ;;  %v2949_v22 = vld [vmem:[#allocation11 + $0x140] sm:$0xff] }
 0xe97   :  { %3023 = vmatpush.msra.mxu0 %v2932_v20  ;;  %2978 = vmatpush.msra.mxu2 %v2929_v28 }
 0xe98   :  { %2897 = vmatpush.msrb.mxu1 %v2782_v54  ;;  %2996 = vmatpush.msra.mxu3 %v2971_v41 }
 0xe99   :  { %3024 = vmatpush.msra.mxu0 %v2930_v43  ;;  %2979 = vmatpush.msra.mxu2 %v2927_v21 }
 0xe9a   :  { %3042 = vmatpush.msra.mxu1 %v2972_v39  ;;  %2997 = vmatpush.msra.mxu3 %v2969_v30 }
 0xe9b   :  { %3025 = vmatpush.msra.mxu0 %v2928_v34  ;;  %2980 = vmatpush.msra.mxu2 %v2925_v47 }
 0xe9c   :  { %3043 = vmatpush.msra.mxu1 %v2970_v19  ;;  %2998 = vmatpush.msra.mxu3 %v2967_v3  ;;  %v2919_v19 = vld [vmem:[#allocation11 + $0x50] sm:$0xff]  ;;  %v2945_v3 = vld [vmem:[#allocation11 + $0x120] sm:$0xff] }
 0xe9d   :  { %3026 = vmatpush.msra.mxu0 %v2926_v51  ;;  %2981 = vmatpush.msra.mxu2 %v2923_v4 }
 0xe9e   :  { %3044 = vmatpush.msra.mxu1 %v2968_v55  ;;  %2999 = vmatpush.msra.mxu3 %v2965_v57  ;;  %v2920_v55 = vld [vmem:[#allocation11 + $0x58] sm:$0xff]  ;;  %v2941_v57 = vld [vmem:[#allocation11 + $0x100] sm:$0xff] }
 0xe9f   :  { %3027 = vmatpush.msra.mxu0 %v2924_v31 }
 0xea0   :  { %3045 = vmatpush.msra.mxu1 %v2966_v45  ;;  %3000 = vmatpush.msra.mxu3 %v2963_v63  ;;  %v2916_v45 = vld [vmem:[#allocation11 + $0x38] sm:$0xff]  ;;  %v2909_v63 = vld [vmem:[#allocation11] sm:$0xff] }
 0xea2   :  { %3046 = vmatpush.msra.mxu1 %v2964_v0  ;;  %3001 = vmatpush.msra.mxu3 %v2961_v33  ;;  %v2910_v0 = vld [vmem:[#allocation11 + $0x8] sm:$0xff] }
 0xea4   :  { %3047 = vmatpush.msra.mxu1 %v2962_v13  ;;  %3002 = vmatpush.msra.mxu3 %v2959_v9 }
 0xea6   :  { %3048 = vmatpush.msra.mxu1 %v2960_v29 }
 0xef1   :  { %v2717_v2 = vpop.xlane.xlu2 %2716 }
 0xef2   :  { %v2721_v8 = vmul.f32 %v2717_v2, %v4010_v26  ;;  %v2921_v2 = vld [vmem:[#allocation11 + $0x60] sm:$0xff] }
 0xef3   :  { %2982 = vmatpush.msra.mxu2 %v2921_v2 }
 0xef4   :  { %v2723_v10 = vadd.f32 1e-05, %v2721_v8  ;;  %v2922_v8 = vld [vmem:[#allocation11 + $0x68] sm:$0xff] }
 0xef5   :  { %3028 = vmatpush.msra.mxu0 %v2922_v8  ;;  %2983 = vmatpush.msra.mxu2 %v2919_v19 }
 0xef6   :  { %3303 = vrsqrt.f32 %v2723_v10  ;;  %vm2731_vm8 = vweird.f32 %v2723_v10 }
 0xef7   :  { %3029 = vmatpush.msra.mxu0 %v2920_v55 }
 0xefc   :  { %v3304_v46 = vpop.eup %3303 }
 0xefd   :  { %v2726_v49 = vmul.f32 %v3304_v46, %v2723_v10  ;;  %vm2732_vm7 = vweird.f32 %v3304_v46  ;;  %v2947_v10 = vld [vmem:[#allocation11 + $0x130] sm:$0xff] }
 0xefe   :  { %vm2733_vm9 = vmor %vm2731_vm8, %vm2732_vm7 }
 0xeff   :  { %v2727_v44 = vmul.f32 %v3304_v46, %v2726_v49 }
 0xf01   :  { %v2728_v5 = vmul.f32 0.5, %v2727_v44 }
 0xf03   :  { %v2729_v14 = vsub.f32 1.5, %v2728_v5  ;;  %v2943_v5 = vld [vmem:[#allocation11 + $0x110] sm:$0xff] }
 0xf04   :  { %v2720_v24 = vpop.xlane.xlu1 %2719 }
 0xf05   :  { %v2730_v53 = vmul.f32 %v3304_v46, %v2729_v14  ;;  %v2722_v16 = vmul.f32 %v2720_v24, %v4010_v26  ;;  %v2913_v14 = vld [vmem:[#allocation11 + $0x20] sm:$0xff]  ;;  %v2912_v24 = vld [vmem:[#allocation11 + $0x18] sm:$0xff] }
 0xf07   :  { %v2734_v15 = vsel %vm2733_vm9, %v3304_v46, %v2730_v53  ;;  %v4033_v32 = vadd.f32 1e-05, %v2722_v16  ;;  %v2948_v46 = vld [vmem:[#allocation11 + $0x138] sm:$0xff] }
 0xf08   :  { %v4036_v35 = vmul.f32 %v2734_v15, %v4013_v62  ;;  %v4039_v60 = vmul.f32 %v2734_v15, %v4015_v7  ;;  %v2957_v62 = vld [vmem:[#allocation11 + $0x180] sm:$0xff]  ;;  %v2958_v7 = vld [vmem:[#allocation11 + $0x188] sm:$0xff] }
 0xf09   :  { %3305 = vrsqrt.f32 %v4033_v32  ;;  %3003 = vmatpush.msra.mxu3 %v2957_v62  ;;  %3049 = vmatpush.msra.mxu1 %v2958_v7  ;;  %vm2741_vm11 = vweird.f32 %v4033_v32 }
 0xf0a   :  { %2829 = vmatmul.f32.vlgmr.msrb.gmra.mxu2 %v4036_v35  ;;  %2852 = vmatmul.f32.vlgmr.msrb.gmra.mxu3 %v4039_v60 }
 0xf0b   :  { %2875 = vmatmul.f32.vlgmr.msrb.gmra.mxu0 %v4036_v35  ;;  %2898 = vmatmul.f32.vlgmr.msrb.gmra.mxu1 %v4039_v60 }
 0xf0c   :  { %3004 = vmatpush.msra.mxu3 %v2955_v59  ;;  %3050 = vmatpush.msra.mxu1 %v2956_v27 }
 0xf0e   :  { %3005 = vmatpush.msra.mxu3 %v2953_v38  ;;  %3051 = vmatpush.msra.mxu1 %v2954_v23 }
 0xf0f   :  { %v3306_v37 = vpop.eup %3305 }
 0xf10   :  { %v2736_v40 = vmul.f32 %v3306_v37, %v4033_v32  ;;  %3006 = vmatpush.msra.mxu3 %v2951_v52  ;;  %3052 = vmatpush.msra.mxu1 %v2952_v18  ;;  %vm2742_vm10 = vweird.f32 %v3306_v37 }
 0xf11   :  { %vm2743_vm12 = vmor %vm2741_vm11, %vm2742_vm10 }
 0xf12   :  { %v2737_v1 = vmul.f32 %v3306_v37, %v2736_v40  ;;  %3007 = vmatpush.msra.mxu3 %v2949_v22  ;;  %3053 = vmatpush.msra.mxu1 %v2950_v48 }
 0xf14   :  { %v2738_v54 = vmul.f32 0.5, %v2737_v1  ;;  %3008 = vmatpush.msra.mxu3 %v2947_v10  ;;  %3054 = vmatpush.msra.mxu1 %v2948_v46 }
 0xf16   :  { %v2739_v49 = vsub.f32 1.5, %v2738_v54  ;;  %3009 = vmatpush.msra.mxu3 %v2945_v3  ;;  %3055 = vmatpush.msra.mxu1 %v2946_v50 }
 0xf18   :  { %v2740_v41 = vmul.f32 %v3306_v37, %v2739_v49  ;;  %3010 = vmatpush.msra.mxu3 %v2943_v5  ;;  %3056 = vmatpush.msra.mxu1 %v2944_v6 }
 0xf1a   :  { %v2744_v39 = vsel %vm2743_vm12, %v3306_v37, %v2740_v41  ;;  %3011 = vmatpush.msra.mxu3 %v2941_v57  ;;  %3057 = vmatpush.msra.mxu1 %v2942_v12 }
 0xf1b   :  { %v4049_v44 = vmul.f32 %v2744_v39, %v4022_v58  ;;  %v4052_v30 = vmul.f32 %v2744_v39, %v4024_v61  ;;  %v2917_v58 = vld [vmem:[#allocation11 + $0x40] sm:$0xff]  ;;  %v2918_v61 = vld [vmem:[#allocation11 + $0x48] sm:$0xff] }
 0xf1c   :  { %2984 = vmatpush.msra.mxu2 %v2917_v58  ;;  %3030 = vmatpush.msra.mxu0 %v2918_v61 }
 0xf1d   :  { %2832 = vmatmul.f32.gmra.mxu2 %v4049_v44  ;;  %2855 = vmatmul.f32.gmra.mxu3 %v4052_v30 }
 0xf1e   :  { %2878 = vmatmul.f32.gmra.mxu0 %v4049_v44  ;;  %2901 = vmatmul.f32.gmra.mxu1 %v4052_v30 }
 0xf1f   :  { %2985 = vmatpush.msra.mxu2 %v2915_v42  ;;  %3031 = vmatpush.msra.mxu0 %v2916_v45 }
 0xf21   :  { %2986 = vmatpush.msra.mxu2 %v2913_v14  ;;  %3032 = vmatpush.msra.mxu0 %v2914_v56 }
 0xf23   :  { %2987 = vmatpush.msra.mxu2 %v2911_v17  ;;  %3033 = vmatpush.msra.mxu0 %v2912_v24 }
 0xf25   :  { %2988 = vmatpush.msra.mxu2 %v2909_v63  ;;  %3034 = vmatpush.msra.mxu0 %v2910_v0 }
 0xf88   :  { %v2876_v53 = vpop.f32.mrf.mxu0  ;;  %v2899_v16 = vpop.f32.mrf.mxu1 }
 0xf89   :  { %v2900_v25 = vadd.f32 %v2899_v16, %v2876_v53 }
 0xf8b   :  { %v2906_v11 = vmax.f32 %v2900_v25, 0.0 }
 0xf8d   :  { %3012 = vmatmul.f32.vlgmr.msra.gmra.mxu3 %v2906_v11  ;;  %3058 = vmatmul.f32.vlgmr.msra.gmra.mxu1 %v2906_v11  ;;  %v2830_v33 = vpop.f32.mrf.mxu2  ;;  %v2853_v13 = vpop.f32.mrf.mxu3 }
 0xf8e   :  { %v2854_v15 = vadd.f32 %v2853_v13, %v2830_v33 }
 0xf90   :  { %v2905_v32 = vmax.f32 %v2854_v15, 0.0 }
 0xf92   :  { %2989 = vmatmul.f32.vlgmr.msra.gmra.mxu2 %v2905_v32  ;;  %3035 = vmatmul.f32.vlgmr.msra.gmra.mxu0 %v2905_v32 }
 0xf9b   :  { %v2879_v9 = vpop.f32.mrf.mxu0  ;;  %v2902_v29 = vpop.f32.mrf.mxu1 }
 0xf9c   :  { %v2903_v36 = vadd.f32 %v2902_v29, %v2879_v9 }
 0xf9e   :  { %v2908_v20 = vmax.f32 %v2903_v36, 0.0 }
 0xfa0   :  { %3015 = vmatmul.f32.gmra.mxu3 %v2908_v20  ;;  %3061 = vmatmul.f32.gmra.mxu1 %v2908_v20  ;;  %v2833_v62 = vpop.f32.mrf.mxu2  ;;  %v2856_v7 = vpop.f32.mrf.mxu3 }
 0xfa1   :  { %v2857_v28 = vadd.f32 %v2856_v7, %v2833_v62 }
 0xfa3   :  { %v2907_v43 = vmax.f32 %v2857_v28, 0.0 }
 0xfa5   :  { %2992 = vmatmul.f32.gmra.mxu2 %v2907_v43  ;;  %3038 = vmatmul.f32.gmra.mxu0 %v2907_v43 }
0x100a   :  { %v3059_v37 = vpop.f32.mrf.mxu1 }
0x100f   :  { %v3036_v59 = vpop.f32.mrf.mxu0 }
0x1010   :  { %v3037_v27 = vadd.f32 %v3036_v59, %v4039_v60  ;;  %v3013_v38 = vpop.f32.mrf.mxu3 }
0x1012   :  { %v3060_v23 = vadd.f32 %v3059_v37, %v3037_v27 }
0x1015   :  { %v2990_v21 = vpop.f32.mrf.mxu2 }
0x1016   :  { %v2991_v34 = vadd.f32 %v2990_v21, %v4036_v35 }
0x1018   :  { %v3014_v40 = vadd.f32 %v3013_v38, %v2991_v34 }
0x101a   :  { %v3065_v47 = vadd.f32 %v3060_v23, %v3014_v40 }
0x101c   :  { %3066 = vadd.xlane.f32.xlu2 %v3065_v47 }
0x101d   :  { %v3062_v4 = vpop.f32.mrf.mxu1 }
0x1022   :  { %v3039_v51 = vpop.f32.mrf.mxu0 }
0x1023   :  { %v3040_v52 = vadd.f32 %v3039_v51, %v4052_v30  ;;  %v3016_v31 = vpop.f32.mrf.mxu3 }
0x1025   :  { %v3063_v22 = vadd.f32 %v3062_v4, %v3040_v52 }
0x1028   :  { %v2993_v18 = vpop.f32.mrf.mxu2 }
0x1029   :  { %v2994_v1 = vadd.f32 %v2993_v18, %v4049_v44 }
0x102b   :  { %v3017_v48 = vadd.f32 %v3016_v31, %v2994_v1 }
0x102d   :  { %v3068_v60 = vadd.f32 %v3063_v22, %v3017_v48 }
0x102f   :  { %3069 = vadd.xlane.f32.xlu1 %v3068_v60 }
0x108f   :  { %v3067_v54 = vpop.xlane.xlu2 %3066 }
0x1090   :  { %v3071_v35 = vmul.f32 %v3067_v54, %v4010_v26 }
0x1092   :  { %v3073_v2 = vsub.f32 %v3014_v40, %v3071_v35  ;;  %v3074_v8 = vsub.f32 %v3060_v23, %v3071_v35 }
0x1094   :  { %v3077_v10 = vmul.f32 %v3073_v2, %v3073_v2  ;;  %v3078_v46 = vmul.f32 %v3074_v8, %v3074_v8 }
0x1096   :  { %v3081_v49 = vadd.f32 %v3078_v46, %v3077_v10 }
0x1098   :  { %3082 = vadd.xlane.f32.xlu2 %v3081_v49 }
0x10a2   :  { %v3070_v41 = vpop.xlane.xlu1 %3069 }
0x10a3   :  { %v3072_v39 = vmul.f32 %v3070_v41, %v4010_v26 }
0x10a5   :  { %v3075_v30 = vsub.f32 %v3017_v48, %v3072_v39  ;;  %v3076_v44 = vsub.f32 %v3063_v22, %v3072_v39 }
0x10a7   :  { %v3079_v19 = vmul.f32 %v3075_v30, %v3075_v30  ;;  %v3080_v3 = vmul.f32 %v3076_v44, %v3076_v44 }
0x10a9   :  { %v3084_v55 = vadd.f32 %v3080_v3, %v3079_v19 }
0x10ab   :  { %3085 = vadd.xlane.f32.xlu1 %v3084_v55 }
0x110b   :  { %v3083_v50 = vpop.xlane.xlu2 %3082 }
0x110c   :  { %v3087_v58 = vmul.f32 %v3083_v50, %v4010_v26 }
0x110e   :  { %v3089_v5 = vadd.f32 1e-05, %v3087_v58 }
0x1110   :  { %3307 = vrsqrt.f32 %v3089_v5  ;;  %vm3097_vm14 = vweird.f32 %v3089_v5 }
0x1116   :  { %v3308_v61 = vpop.eup %3307 }
0x1117   :  { %v3092_v6 = vmul.f32 %v3308_v61, %v3089_v5  ;;  %vm3098_vm13 = vweird.f32 %v3308_v61 }
0x1118   :  { %vm3099_vm15 = vmor %vm3097_vm14, %vm3098_vm13 }
0x1119   :  { %v3093_v42 = vmul.f32 %v3308_v61, %v3092_v6 }
0x111b   :  { %v3094_v57 = vmul.f32 0.5, %v3093_v42 }
0x111d   :  { %v3095_v45 = vsub.f32 1.5, %v3094_v57 }
0x111e   :  { %v3086_v12 = vpop.xlane.xlu1 %3085 }
0x111f   :  { %v3096_v14 = vmul.f32 %v3308_v61, %v3095_v45  ;;  %v3088_v56 = vmul.f32 %v3086_v12, %v4010_v26 }
0x1121   :  { %v3100_v17 = vsel %vm3099_vm15, %v3308_v61, %v3096_v14  ;;  %v3090_v24 = vadd.f32 1e-05, %v3088_v56 }
0x1122   :  { %v3111_v63 = vmul.f32 %v3100_v17, %v3073_v2  ;;  %v3112_v0 = vmul.f32 %v3100_v17, %v3074_v8 }
0x1123   :  { %3309 = vrsqrt.f32 %v3090_v24  ;;  %vm3107_vm1 = vweird.f32 %v3090_v24 }
0x1124   :  { %3115 = vst [vmem:[#allocation13] sm:$0xff] %v3111_v63 }
0x1125   :  { %3116 = vst [vmem:[#allocation13 + $0x8] sm:$0xff] %v3112_v0 }
0x1129   :  { %v3310_v53 = vpop.eup %3309 }
0x112a   :  { %v3102_v16 = vmul.f32 %v3310_v53, %v3090_v24  ;;  %vm3108_vm0 = vweird.f32 %v3310_v53 }
0x112b   :  { %vm3109_vm2 = vmor %vm3107_vm1, %vm3108_vm0 }
0x112c   :  { %v3103_v25 = vmul.f32 %v3310_v53, %v3102_v16 }
0x112e   :  { %v3104_v11 = vmul.f32 0.5, %v3103_v25 }
0x1130   :  { %v3105_v33 = vsub.f32 1.5, %v3104_v11 }
0x1132   :  { %v3106_v13 = vmul.f32 %v3310_v53, %v3105_v33 }
0x1134   :  { %v3110_v26 = vsel %vm3109_vm2, %v3310_v53, %v3106_v13 }
0x1135   :  { %v3113_v15 = vmul.f32 %v3110_v26, %v3075_v30  ;;  %v3114_v32 = vmul.f32 %v3110_v26, %v3076_v44 }
0x1137   :  { %3117 = vst [vmem:[#allocation13 + $0x10] sm:$0xff] %v3113_v15 }
0x1138   :  { %3118 = vst [vmem:[#allocation13 + $0x18] sm:$0xff] %v3114_v32 }
0x1139   :  { %3131 = dma.vmem_to_hbm [thread:$0]  %s3124_s29, 512, %s3126_s8, [#allocation4], %s3501_s1, %s3501_s1, %s3502_s12  }
0x113a   :  { %3495 = dma.done.wait [#allocation4], 512  }
0x113b   :  { %3496 = vsyncadd [#allocation4], 4294966784 }
0x113c   :  { %3136 = vsyncpa [#allocation3], 1 }
0x113d   :  { %3137 = vsyncpa [#allocation6], 1 }
0x113e   :  { %3138 = vsyncpa [#allocation9], 1 }
0x113f   :  { %3139 = vsyncpa [#allocation12], 1 }
0x1140   :  { %3140 = vsyncpa [#allocation4], 1 }

</bundles_post_ra>
